<compile_context>
chip_gen: v5e
topology: v5e:2x2
jax: 0.10.0
libtpu: 0.0.40
codegen_flags: <defaults>
</compile_context>

<pallas_src>
import functools

import jax
import jax.numpy as jnp
from jax.experimental import pallas as pl
from jax.experimental.pallas import tpu as pltpu


# ---------------------------------------------------------------------------
# Kernels
# ---------------------------------------------------------------------------

def _renorm_scale_kernel(w_ref, scale_ref, *, max_norm):
    """Per-row L2 clip scale for nn.Embedding(max_norm=...).

    scale[v] = max_norm / ||w_v||  if ||w_v|| > max_norm  else 1.0
    Runs once per vocab tile; hoisted out of the (batch, vocab) grid of the
    main encoder kernel.
    """
    w = w_ref[...]                                            # (Vt, D)
    sq = jnp.sum(w * w, axis=-1, keepdims=True)               # (Vt, 1) lane reduce
    scale_ref[...] = jnp.where(sq > max_norm * max_norm,
                               max_norm * jax.lax.rsqrt(sq),  # one EUP op
                               jnp.float32(1.0))


def _cbow_encoder_kernel(ids_ref, scale_ref, enc_w_ref, out_ref, *,
                         inv_c2, compute_dtype):
    """One (batch-tile, vocab-tile) grid step of the encoder mean.

    ids_ref   : (TB, 2C)  int32  context ids (resident across the vocab axis)
    scale_ref : (1, Vt)   f32    precomputed renorm scale for this vocab tile
    enc_w_ref : (Vt, D)   f32    encoder table tile (streamed / double-buffered)
    out_ref   : (TB, D)   f32    accumulator across vocab tiles
    """
    k = pl.program_id(1)

    @pl.when(k == 0)
    def _init():
        out_ref[...] = jnp.zeros_like(out_ref)

    TB, C2 = ids_ref.shape
    Vt = enc_w_ref.shape[0]
    base = k * Vt                                             # first vocab row of tile

    # counts[b, v] = #occurrences of (base + v) in ids[b, :]; built fully in 2-D.
    ids = ids_ref[...] - base                                 # (TB, C2)
    iota_v = jax.lax.broadcasted_iota(jnp.int32, (TB, Vt), 1)
    counts = (ids[:, 0:1] == iota_v).astype(jnp.float32)
    for c in range(1, C2):                                    # C2 is small & static
        counts = counts + (ids[:, c:c + 1] == iota_v).astype(jnp.float32)

    # Fold the renorm scale AND the 1/(2*context) mean factor into the counts:
    # out = sum_v counts[b,v] * inv_c2 * scale[v] * enc[v, :]
    counts = counts * (scale_ref[...] * inv_c2)               # (1,Vt) broadcast

    lhs = counts.astype(compute_dtype)
    rhs = enc_w_ref[...].astype(compute_dtype)
    out_ref[...] += jnp.dot(lhs, rhs, preferred_element_type=jnp.float32)


def _row_gather_kernel(dec_ids_ref, row_ref, out_ref):
    """Pure row gather: dec_ids (scalar-prefetch, SMEM) drives the input
    index_map; the body just forwards the fetched (1, 1, D) row."""
    del dec_ids_ref          # only used inside the index_maps
    out_ref[...] = row_ref[...]


# ---------------------------------------------------------------------------
# Tile sizing (generation-aware)
# ---------------------------------------------------------------------------

def _round_up(x, m):
    return ((x + m - 1) // m) * m


def _vmem_budget():
    """(tile budget bytes, vmem_limit_bytes) derived from the chip's VMEM."""
    try:
        cap = pltpu.get_tpu_info().vmem_capacity_bytes
    except Exception:
        cap = 64 << 20                     # v7x-safe fallback
    return (cap * 2) // 5, cap // 2        # ~40% for tiles, 50% scoped limit


def _pick_batch_tile(B):
    """MXU M dimension; keep >= 2 batch tiles when possible so the v7x megacore
    can split the 'parallel' batch axis across its two TensorCores."""
    if B < 128:
        return _round_up(max(B, 8), 8)             # tiny batch: single tile
    if B < 256:
        return _round_up((B + 1) // 2, 8)          # two tiles
    best = None
    for tb in (256, 128):
        bp = _round_up(B, tb)
        if bp // tb < 2:
            continue
        key = (bp - B, -tb)                        # least padding, then larger tile
        if best is None or key < best[0]:
            best = (key, tb)
    return best[1]


def _pick_vocab_tile(V, D, TB, budget_bytes):
    """Largest 128-multiple vocab tile dividing V whose per-step VMEM footprint
    (enc-table double buffer + scale + counts/iota intermediates + accumulator
    and ids blocks) fits the budget."""
    if V % 128 != 0:
        return V                                   # small / odd vocab: one full tile
    per_row = 4 * (2 * D + 16 + 3 * TB)            # enc dbl-buf, scale, intermediates
    fixed = 4 * (2 * TB * D + 2 * TB * 128)        # out accumulator + ids blocks
    vt = max(budget_bytes - fixed, 0) // per_row
    vt = max(128, min(vt, V))
    vt = (vt // 128) * 128
    while vt > 128 and V % vt != 0:
        vt -= 128
    return vt


# ---------------------------------------------------------------------------
# Wrapper
# ---------------------------------------------------------------------------

def cbow_negative_sampling(ids, pos, neg, enc_w, dec_w, max_norm=1.0, *,
                           vocab_tile=None, batch_tile=None,
                           use_bf16_matmul=False):
    """ids:(B,2C) pos:(B,) neg:(B,N) enc_w/dec_w:(V,D) -> (out, pos_out, neg_out)."""
    ids = jnp.asarray(ids, jnp.int32)
    pos = jnp.asarray(pos, jnp.int32)
    neg = jnp.asarray(neg, jnp.int32)
    enc_w = jnp.asarray(enc_w, jnp.float32)
    dec_w = jnp.asarray(dec_w, jnp.float32)

    B, C2 = ids.shape
    _, N = neg.shape
    V, D = enc_w.shape
    assert dec_w.shape == (V, D)
    assert pos.shape == (B,)

    budget, vmem_limit = _vmem_budget()
    TB = batch_tile if batch_tile is not None else _pick_batch_tile(B)
    assert TB % 8 == 0 or TB == B, "batch tile must be a multiple of 8"
    Bp = _round_up(B, TB)
    Vt = vocab_tile if vocab_tile is not None else _pick_vocab_tile(V, D, TB, budget)
    assert V % Vt == 0 and (Vt == V or Vt % 128 == 0), "bad vocab tile"

    if Bp != B:                                     # pad batch to the tile (id 0 rows,
        padb = Bp - B                               # results sliced off below)
        ids = jnp.pad(ids, ((0, padb), (0, 0)))
        pos = jnp.pad(pos, ((0, padb),))
        neg = jnp.pad(neg, ((0, padb), (0, 0)))

    nb, nk = Bp // TB, V // Vt
    compute_dtype = jnp.bfloat16 if use_bf16_matmul else jnp.float32

    # --- pre-pass: per-row renorm scale, hoisted out of the (nb, nk) grid -----
    scale = pl.pallas_call(
        functools.partial(_renorm_scale_kernel, max_norm=float(max_norm)),
        out_shape=jax.ShapeDtypeStruct((V, 1), jnp.float32),
        grid_spec=pltpu.PrefetchScalarGridSpec(
            num_scalar_prefetch=0,
            grid=(nk,),
            in_specs=[pl.BlockSpec((Vt, D), lambda k: (k, 0))],
            out_specs=pl.BlockSpec((Vt, 1), lambda k: (k, 0))),
        compiler_params=pltpu.CompilerParams(
            dimension_semantics=("arbitrary",),
            vmem_limit_bytes=vmem_limit),
    )(enc_w)
    scale_row = scale.reshape(1, V)                 # lane-dense for the main kernel

    # --- encoder: streamed count-matrix matmul over a (batch, vocab) grid -----
    enc_kernel = functools.partial(_cbow_encoder_kernel,
                                   inv_c2=1.0 / float(C2),
                                   compute_dtype=compute_dtype)
    out = pl.pallas_call(
        enc_kernel,
        out_shape=jax.ShapeDtypeStruct((Bp, D), jnp.float32),
        grid_spec=pltpu.PrefetchScalarGridSpec(
            num_scalar_prefetch=0,
            grid=(nb, nk),                                      # reduction axis last
            in_specs=[
                pl.BlockSpec((TB, C2), lambda i, k: (i, 0)),    # ids (resident over k)
                pl.BlockSpec((1, Vt), lambda i, k: (0, k)),     # renorm scale tile
                pl.BlockSpec((Vt, D), lambda i, k: (k, 0)),     # enc table tile
            ],
            out_specs=pl.BlockSpec((TB, D), lambda i, k: (i, 0))),  # accumulator over k
        compiler_params=pltpu.CompilerParams(
            dimension_semantics=("parallel", "arbitrary"),      # megacore on batch
            vmem_limit_bytes=vmem_limit),
    )(ids, scale_row, enc_w)

    # --- decoder: pos/neg are plain row gathers (scalar-prefetch DMA gather) ---
    R = Bp * (N + 1)
    dec_ids = jnp.concatenate([pos.reshape(Bp, 1), neg], axis=1).reshape(R)
    dec_rows = pl.pallas_call(
        _row_gather_kernel,
        out_shape=jax.ShapeDtypeStruct((R, 1, D), jnp.float32),
        grid_spec=pltpu.PrefetchScalarGridSpec(
            num_scalar_prefetch=1,                              # dec_ids -> SMEM
            grid=(R,),
            in_specs=[pl.BlockSpec((1, 1, D),
                                   lambda r, ids_ref: (ids_ref[r], 0, 0))],
            out_specs=pl.BlockSpec((1, 1, D),
                                   lambda r, ids_ref: (r, 0, 0))),
        compiler_params=pltpu.CompilerParams(
            dimension_semantics=("arbitrary",)),
    )(dec_ids, dec_w.reshape(V, 1, D))              # size-1 dim keeps blocks (8,128)-legal

    dec_rows = dec_rows.reshape(Bp, N + 1, D)[:B]
    return out[:B], dec_rows[:, 0, :], dec_rows[:, 1:, :]


# ---------------------------------------------------------------------------
# Reference & demo
# ---------------------------------------------------------------------------

def _reference(ids, pos, neg, enc_w, dec_w, max_norm=1.0):
    norm = jnp.linalg.norm(enc_w, axis=1, keepdims=True)
    enc_renorm = jnp.where(norm > max_norm, max_norm * enc_w / (norm + 1e-7), enc_w)
    out = enc_renorm[ids].mean(axis=1)              # (B, D)
    return out, dec_w[pos], dec_w[neg]


if __name__ == "__main__":
    vocab_size, embed_dim = 1024, 128
    batch, context_size, num_neg = 16, 3, 5

    key = jax.random.PRNGKey(0)
    k1, k2, k3, k4, k5 = jax.random.split(key, 5)

    # Row scales chosen so some enc rows have L2 norm > 1 and some < 1,
    # exercising the max_norm clipping path.
    row_scale = jnp.linspace(0.01, 0.2, vocab_size)[:, None]
    enc_weight = jax.random.normal(k1, (vocab_size, embed_dim), jnp.float32) * row_scale
    dec_weight = jax.random.normal(k2, (vocab_size, embed_dim), jnp.float32) * 0.1

    ids = jax.random.randint(k3, (batch, 2 * context_size), 0, vocab_size, jnp.int32)
    pos = jax.random.randint(k4, (batch,), 0, vocab_size, jnp.int32)
    neg = jax.random.randint(k5, (batch, num_neg), 0, vocab_size, jnp.int32)

    ref_out, ref_pos, ref_neg = _reference(ids, pos, neg, enc_weight, dec_weight, 1.0)

    # 1) Production-policy defaults (generation-aware auto tile picker).
    out, pos_out, neg_out = cbow_negative_sampling(
        ids, pos, neg, enc_weight, dec_weight, max_norm=1.0)
    jax.block_until_ready((out, pos_out, neg_out))
    assert out.shape == (batch, embed_dim)
    assert pos_out.shape == (batch, embed_dim)
    assert neg_out.shape == (batch, num_neg, embed_dim)
    assert jnp.allclose(out, ref_out, atol=1e-5, rtol=1e-5)
    assert jnp.allclose(pos_out, ref_pos, atol=1e-5, rtol=1e-5)
    assert jnp.allclose(neg_out, ref_neg, atol=1e-5, rtol=1e-5)

    # 2) Forced small tiles (correctness coverage of the multi-tile vocab
    #    reduction and the batch grid axis: grid = (2, 4) at these demo sizes).
    out2, pos2, neg2 = cbow_negative_sampling(
        ids, pos, neg, enc_weight, dec_weight, max_norm=1.0,
        vocab_tile=256, batch_tile=8)
    jax.block_until_ready((out2, pos2, neg2))
    assert jnp.allclose(out2, ref_out, atol=1e-5, rtol=1e-5)
    assert jnp.allclose(pos2, ref_pos, atol=1e-5, rtol=1e-5)
    assert jnp.allclose(neg2, ref_neg, atol=1e-5, rtol=1e-5)

    # 3) bf16 MXU operands (single-pass MXU on v6e/v7x); accumulation stays f32,
    #    so only a loose tolerance on the encoder mean is expected.
    out3, pos3, neg3 = cbow_negative_sampling(
        ids, pos, neg, enc_weight, dec_weight, max_norm=1.0,
        use_bf16_matmul=True)
    jax.block_until_ready((out3, pos3, neg3))
    assert jnp.allclose(out3, ref_out, atol=2e-2, rtol=2e-2)
    assert jnp.allclose(pos3, ref_pos, atol=1e-5, rtol=1e-5)
    assert jnp.allclose(neg3, ref_neg, atol=1e-5, rtol=1e-5)

    print("KERNEL_OK")
</pallas_src>

<mosaic_0001>
module attributes {stable_mosaic.version = 11 : i64} {
  func.func @_renorm_scale_kernel(%arg0: i32, %arg1: memref<1024x128xf32, #tpu.memory_space<vmem>>, %arg2: memref<1024x1xf32, #tpu.memory_space<vmem>>) attributes {dimension_semantics = [#tpu.dimension_semantics<arbitrary>], iteration_bounds = array<i64: 1>, scalar_prefetch = 0 : i64, scratch_operands = 0 : i64, tpu.core_type = #tpu.core_type<tc>, window_params = [{transform_indices = @transform_0, window_bounds = array<i64: 1024, 128>}, {transform_indices = @transform_1, window_bounds = array<i64: 1024, 1>}]} {
    %c0 = arith.constant 0 : index
    %c0_0 = arith.constant 0 : index
    %0 = vector.load %arg1[%c0, %c0_0] : memref<1024x128xf32, #tpu.memory_space<vmem>>, vector<1024x128xf32>
    %1 = arith.mulf %0, %0 : vector<1024x128xf32>
    %cst = arith.constant dense<0.000000e+00> : vector<1024xf32>
    %2 = vector.multi_reduction <add>, %1, %cst [1] : vector<1024x128xf32> to vector<1024xf32>
    %3 = vector.shape_cast %2 : vector<1024xf32> to vector<1024x1xf32>
    %cst_1 = arith.constant 1.000000e+00 : f32
    %4 = vector.broadcast %cst_1 : f32 to vector<1024x1xf32>
    %5 = arith.cmpf ogt, %3, %4 : vector<1024x1xf32>
    %6 = math.rsqrt %3 : vector<1024x1xf32>
    %cst_2 = arith.constant 1.000000e+00 : f32
    %7 = vector.broadcast %cst_2 : f32 to vector<1024x1xf32>
    %8 = arith.mulf %7, %6 : vector<1024x1xf32>
    %cst_3 = arith.constant 1.000000e+00 : f32
    %9 = vector.broadcast %cst_3 : f32 to vector<1024x1xf32>
    %10 = arith.select %5, %8, %9 : vector<1024x1xi1>, vector<1024x1xf32>
    %c0_4 = arith.constant 0 : index
    %c0_5 = arith.constant 0 : index
    %11 = vector.load %arg2[%c0_4, %c0_5] : memref<1024x1xf32, #tpu.memory_space<vmem>>, vector<1024x1xf32>
    tpu.vector_store %arg2[%c0_4, %c0_5], %10 {strides = array<i32>} : memref<1024x1xf32, #tpu.memory_space<vmem>>, vector<1024x1xf32>,
    return
  }
  func.func @transform_0(%arg0: i32) -> (i32, i32) {
    %c0_i32 = arith.constant 0 : i32
    %c0_i32_0 = arith.constant 0 : i32
    return %arg0, %c0_i32 : i32, i32
  }
  func.func @transform_1(%arg0: i32) -> (i32, i32) {
    %c0_i32 = arith.constant 0 : i32
    %c0_i32_0 = arith.constant 0 : i32
    return %arg0, %c0_i32 : i32, i32
  }
}

</mosaic_0001>

<bundles_post_ra>
// kernel: tpu_custom_call.1
= control target key start
LH: loop header
LB: loop body
LE: loop exit
PB: predicated region body
PF: predicated region fallthrough
CT: control target
= control target key end

     0   :  { %6 = vsyncpa [#allocation3], 0  ;;  %s2491_s9 = smov [#allocation2]   ;;  %s2492_s11 = smov 128   ;;  %s5322_s0 = inlined_call_operand.hbm [shape: f32[1024,128], index: 0, kind: input, shape index: {}]   ;;  %s5323_s1 = inlined_call_operand.vmem [shape: f32[1024,1], index: 1, kind: output, shape index: {}]  }
   0x1   :  { %s11_s8 = sshll.u32 %s5322_s0, 4  ;;  %s13_s10 = sshll.u32 %s2491_s9, 4  ;;  %s12_s8 = int_to_ptr.hbm [resolvable:$true] %s11_s8  ;;  %s14_s10 = int_to_ptr.vmem [resolvable:$true] %s13_s10 }
   0x2   :  { %s2493_s12 = smov 8  }
   0x3   :  { %19 = dma.hbm_to_vmem [thread:$0]  %s12_s8, 16384, %s14_s10, [#allocation3], %s2492_s11, %s2492_s11, %s2493_s12  }
   0x4   :  { %2489 = dma.done.wait [#allocation3], 16384  }
   0x5   :  { %2490 = vsyncadd [#allocation3], 4294950912  ;;  %v28_v0 = vld [vmem:[#allocation2 + $0x20] sm:$0xff]  ;;  %v26_v1 = vld [vmem:[#allocation2 + $0x10] sm:$0xff]  ;;  %vm2072_vm0 = vcmask 7168  }
   0x6   :  { %v24_v2 = vld [vmem:[#allocation2] sm:$0xff]  ;;  %v156_v3 = vmul.f32 %v28_v0, %v28_v0  ;;  %v154_v4 = vmul.f32 %v26_v1, %v26_v1  ;;  %v29_v6 = vld [vmem:[#allocation2 + $0x28] sm:$0xff]  ;;  %v27_v7 = vld [vmem:[#allocation2 + $0x18] sm:$0xff] }
   0x7   :  { %v152_v5 = vmul.f32 %v24_v2, %v24_v2  ;;  %v25_v8 = vld [vmem:[#allocation2 + $0x8] sm:$0xff]  ;;  %v157_v9 = vmul.f32 %v29_v6, %v29_v6  ;;  %v155_v10 = vmul.f32 %v27_v7, %v27_v7  ;;  %v32_v12 = vld [vmem:[#allocation2 + $0x40] sm:$0xff]  ;;  %v31_v13 = vld [vmem:[#allocation2 + $0x38] sm:$0xff] }
   0x8   :  { %288 = vadd.xlane.f32.xlu2 %v156_v3  ;;  %284 = vadd.xlane.f32.xlu1 %v154_v4  ;;  %v153_v11 = vmul.f32 %v25_v8, %v25_v8  ;;  %v30_v14 = vld [vmem:[#allocation2 + $0x30] sm:$0xff]  ;;  %v160_v15 = vmul.f32 %v32_v12, %v32_v12  ;;  %v159_v16 = vmul.f32 %v31_v13, %v31_v13  ;;  %v35_v18 = vld [vmem:[#allocation2 + $0x58] sm:$0xff]  ;;  %v33_v20 = vld [vmem:[#allocation2 + $0x48] sm:$0xff] }
   0x9   :  { %280 = vadd.xlane.f32.xlu0 %v152_v5  ;;  %v158_v17 = vmul.f32 %v30_v14, %v30_v14  ;;  %v34_v19 = vld [vmem:[#allocation2 + $0x50] sm:$0xff]  ;;  %v163_v21 = vmul.f32 %v35_v18, %v35_v18  ;;  %v161_v23 = vmul.f32 %v33_v20, %v33_v20  ;;  %v37_v25 = vld [vmem:[#allocation2 + $0x68] sm:$0xff]  ;;  %v36_v26 = vld [vmem:[#allocation2 + $0x60] sm:$0xff] }
   0xa   :  { %v162_v22 = vmul.f32 %v34_v19, %v34_v19  ;;  %v38_v24 = vld [vmem:[#allocation2 + $0x70] sm:$0xff]  ;;  %v165_v28 = vmul.f32 %v37_v25, %v37_v25  ;;  %v164_v29 = vmul.f32 %v36_v26, %v36_v26  ;;  %v41_v30 = vld [vmem:[#allocation2 + $0x88] sm:$0xff]  ;;  %v40_v31 = vld [vmem:[#allocation2 + $0x80] sm:$0xff] }
   0xb   :  { %v166_v27 = vmul.f32 %v38_v24, %v38_v24  ;;  %v39_v32 = vld [vmem:[#allocation2 + $0x78] sm:$0xff]  ;;  %v169_v33 = vmul.f32 %v41_v30, %v41_v30  ;;  %v168_v34 = vmul.f32 %v40_v31, %v40_v31  ;;  %v44_v36 = vld [vmem:[#allocation2 + $0xa0] sm:$0xff]  ;;  %v42_v38 = vld [vmem:[#allocation2 + $0x90] sm:$0xff] }
   0xc   :  { %v167_v35 = vmul.f32 %v39_v32, %v39_v32  ;;  %v43_v37 = vld [vmem:[#allocation2 + $0x98] sm:$0xff]  ;;  %v172_v39 = vmul.f32 %v44_v36, %v44_v36  ;;  %v170_v41 = vmul.f32 %v42_v38, %v42_v38  ;;  %v46_v43 = vld [vmem:[#allocation2 + $0xb0] sm:$0xff]  ;;  %v45_v44 = vld [vmem:[#allocation2 + $0xa8] sm:$0xff] }
   0xd   :  { %v171_v40 = vmul.f32 %v43_v37, %v43_v37  ;;  %v47_v42 = vld [vmem:[#allocation2 + $0xb8] sm:$0xff]  ;;  %v174_v46 = vmul.f32 %v46_v43, %v46_v43  ;;  %v173_v47 = vmul.f32 %v45_v44, %v45_v44  ;;  %v50_v48 = vld [vmem:[#allocation2 + $0xd0] sm:$0xff]  ;;  %v49_v49 = vld [vmem:[#allocation2 + $0xc8] sm:$0xff] }
   0xe   :  { %v175_v45 = vmul.f32 %v47_v42, %v47_v42  ;;  %v48_v50 = vld [vmem:[#allocation2 + $0xc0] sm:$0xff]  ;;  %v178_v51 = vmul.f32 %v50_v48, %v50_v48  ;;  %v177_v52 = vmul.f32 %v49_v49, %v49_v49  ;;  %v53_v54 = vld [vmem:[#allocation2 + $0xe8] sm:$0xff]  ;;  %v51_v56 = vld [vmem:[#allocation2 + $0xd8] sm:$0xff] }
   0xf   :  { %v176_v53 = vmul.f32 %v48_v50, %v48_v50  ;;  %v52_v55 = vld [vmem:[#allocation2 + $0xe0] sm:$0xff]  ;;  %v181_v57 = vmul.f32 %v53_v54, %v53_v54  ;;  %v179_v59 = vmul.f32 %v51_v56, %v51_v56  ;;  %v55_v61 = vld [vmem:[#allocation2 + $0xf8] sm:$0xff]  ;;  %v54_v62 = vld [vmem:[#allocation2 + $0xf0] sm:$0xff] }
  0x10   :  { %290 = vadd.xlane.f32.xlu2 %v157_v9  ;;  %286 = vadd.xlane.f32.xlu1 %v155_v10  ;;  %v180_v58 = vmul.f32 %v52_v55, %v52_v55  ;;  %v56_v60 = vld [vmem:[#allocation2 + $0x100] sm:$0xff]  ;;  %v183_v0 = vmul.f32 %v55_v61, %v55_v61  ;;  %v182_v1 = vmul.f32 %v54_v62, %v54_v62  ;;  %v59_v2 = vld [vmem:[#allocation2 + $0x118] sm:$0xff]  ;;  %v58_v3 = vld [vmem:[#allocation2 + $0x110] sm:$0xff] }
  0x11   :  { %282 = vadd.xlane.f32.xlu0 %v153_v11  ;;  %v184_v63 = vmul.f32 %v56_v60, %v56_v60  ;;  %v57_v4 = vld [vmem:[#allocation2 + $0x108] sm:$0xff]  ;;  %v187_v5 = vmul.f32 %v59_v2, %v59_v2  ;;  %v186_v6 = vmul.f32 %v58_v3, %v58_v3  ;;  %v62_v8 = vld [vmem:[#allocation2 + $0x130] sm:$0xff]  ;;  %v60_v10 = vld [vmem:[#allocation2 + $0x120] sm:$0xff] }
  0x12   :  { %v185_v7 = vmul.f32 %v57_v4, %v57_v4  ;;  %v61_v9 = vld [vmem:[#allocation2 + $0x128] sm:$0xff]  ;;  %v190_v11 = vmul.f32 %v62_v8, %v62_v8  ;;  %v188_v13 = vmul.f32 %v60_v10, %v60_v10  ;;  %v68_v20 = vld [vmem:[#allocation2 + $0x160] sm:$0xff]  ;;  %v71_v26 = vld [vmem:[#allocation2 + $0x178] sm:$0xff] }
  0x13   :  { %v189_v12 = vmul.f32 %v61_v9, %v61_v9  ;;  %v65_v14 = vld [vmem:[#allocation2 + $0x148] sm:$0xff]  ;;  %v199_v32 = vmul.f32 %v71_v26, %v71_v26  ;;  %v72_v38 = vld [vmem:[#allocation2 + $0x180] sm:$0xff] }
  0x14   :  { %v73_v36 = vld [vmem:[#allocation2 + $0x188] sm:$0xff]  ;;  %v76_v44 = vld [vmem:[#allocation2 + $0x1a0] sm:$0xff] }
  0x15   :  { %v201_v50 = vmul.f32 %v73_v36, %v73_v36  ;;  %v204_v56 = vmul.f32 %v76_v44, %v76_v44  ;;  %v80_v60 = vld [vmem:[#allocation2 + $0x1c0] sm:$0xff]  ;;  %v81_v44 = vld [vmem:[#allocation2 + $0x1c8] sm:$0xff] }
  0x16   :  { %v2552_v4 = vmul.f32 %v80_v60, %v80_v60 }
  0x18   :  { %296 = vadd.xlane.f32.xlu2 %v160_v15  ;;  %294 = vadd.xlane.f32.xlu1 %v159_v16  ;;  %v64_v15 = vld [vmem:[#allocation2 + $0x140] sm:$0xff]  ;;  %v63_v16 = vld [vmem:[#allocation2 + $0x138] sm:$0xff] }
  0x19   :  { %292 = vadd.xlane.f32.xlu0 %v158_v17  ;;  %v193_v17 = vmul.f32 %v65_v14, %v65_v14  ;;  %v192_v18 = vmul.f32 %v64_v15, %v64_v15  ;;  %v191_v19 = vmul.f32 %v63_v16, %v63_v16 }
  0x20   :  { %302 = vadd.xlane.f32.xlu2 %v163_v21  ;;  %300 = vadd.xlane.f32.xlu1 %v162_v22  ;;  %v67_v21 = vld [vmem:[#allocation2 + $0x158] sm:$0xff]  ;;  %v66_v22 = vld [vmem:[#allocation2 + $0x150] sm:$0xff] }
  0x21   :  { %298 = vadd.xlane.f32.xlu0 %v161_v23  ;;  %v196_v23 = vmul.f32 %v68_v20, %v68_v20  ;;  %v195_v24 = vmul.f32 %v67_v21, %v67_v21  ;;  %v194_v25 = vmul.f32 %v66_v22, %v66_v22 }
  0x28   :  { %308 = vadd.xlane.f32.xlu2 %v166_v27  ;;  %306 = vadd.xlane.f32.xlu1 %v165_v28  ;;  %v70_v27 = vld [vmem:[#allocation2 + $0x170] sm:$0xff]  ;;  %v69_v28 = vld [vmem:[#allocation2 + $0x168] sm:$0xff] }
  0x29   :  { %304 = vadd.xlane.f32.xlu0 %v164_v29 }
  0x30   :  { %314 = vadd.xlane.f32.xlu2 %v169_v33  ;;  %312 = vadd.xlane.f32.xlu1 %v168_v34  ;;  %v198_v33 = vmul.f32 %v70_v27, %v70_v27  ;;  %v197_v34 = vmul.f32 %v69_v28, %v69_v28 }
  0x31   :  { %310 = vadd.xlane.f32.xlu0 %v167_v35  ;;  %v74_v35 = vld [vmem:[#allocation2 + $0x190] sm:$0xff] }
  0x32   :  { %v202_v49 = vmul.f32 %v74_v35, %v74_v35 }
  0x38   :  { %320 = vadd.xlane.f32.xlu2 %v172_v39  ;;  %318 = vadd.xlane.f32.xlu1 %v171_v40  ;;  %v77_v39 = vld [vmem:[#allocation2 + $0x1a8] sm:$0xff] }
  0x39   :  { %316 = vadd.xlane.f32.xlu0 %v170_v41  ;;  %v205_v54 = vmul.f32 %v77_v39, %v77_v39  ;;  %v82_v39 = vld [vmem:[#allocation2 + $0x1d0] sm:$0xff] }
  0x40   :  { %326 = vadd.xlane.f32.xlu2 %v175_v45  ;;  %324 = vadd.xlane.f32.xlu1 %v174_v46  ;;  %v75_v45 = vld [vmem:[#allocation2 + $0x198] sm:$0xff] }
  0x41   :  { %322 = vadd.xlane.f32.xlu0 %v173_v47 }
  0x48   :  { %332 = vadd.xlane.f32.xlu2 %v178_v51  ;;  %330 = vadd.xlane.f32.xlu1 %v177_v52 }
  0x49   :  { %328 = vadd.xlane.f32.xlu0 %v176_v53  ;;  %v200_v53 = vmul.f32 %v72_v38, %v72_v38 }
  0x50   :  { %338 = vadd.xlane.f32.xlu2 %v181_v57  ;;  %336 = vadd.xlane.f32.xlu1 %v180_v58  ;;  %v2538_v57 = vmul.f32 %v75_v45, %v75_v45 }
  0x51   :  { %334 = vadd.xlane.f32.xlu0 %v179_v59 }
  0x58   :  { %344 = vadd.xlane.f32.xlu2 %v184_v63  ;;  %342 = vadd.xlane.f32.xlu1 %v183_v0  ;;  %v79_v0 = vld [vmem:[#allocation2 + $0x1b8] sm:$0xff] }
  0x59   :  { %340 = vadd.xlane.f32.xlu0 %v182_v1  ;;  %v78_v1 = vld [vmem:[#allocation2 + $0x1b0] sm:$0xff] }
  0x5a   :  { %v2574_v14 = vmul.f32 %v78_v1, %v78_v1 }
  0x60   :  { %350 = vadd.xlane.f32.xlu2 %v187_v5  ;;  %348 = vadd.xlane.f32.xlu1 %v186_v6 }
  0x61   :  { %346 = vadd.xlane.f32.xlu0 %v185_v7 }
  0x68   :  { %356 = vadd.xlane.f32.xlu2 %v190_v11  ;;  %354 = vadd.xlane.f32.xlu1 %v189_v12 }
  0x69   :  { %352 = vadd.xlane.f32.xlu0 %v188_v13  ;;  %v2572_v13 = vmul.f32 %v79_v0, %v79_v0 }
  0x70   :  { %362 = vadd.xlane.f32.xlu2 %v193_v17  ;;  %360 = vadd.xlane.f32.xlu1 %v192_v18 }
  0x71   :  { %358 = vadd.xlane.f32.xlu0 %v191_v19 }
  0x78   :  { %368 = vadd.xlane.f32.xlu2 %v196_v23  ;;  %366 = vadd.xlane.f32.xlu1 %v195_v24 }
  0x79   :  { %364 = vadd.xlane.f32.xlu0 %v194_v25 }
  0x7b   :  { %v2507_v29 = vpop.xlane.xlu2 %288  ;;  %v2509_v30 = vpop.xlane.xlu1 %284 }
  0x7c   :  { %2209 = vrsqrt.f32 %v2507_v29  ;;  %v2512_v31 = vpop.xlane.xlu0 %280  ;;  %vm540_vm1 = vcmp.gt.f32.partialorder %v2507_v29, 1.0  ;;  %vm710_vm2 = vweird.f32 %v2507_v29  ;;  %vm538_vm3 = vcmp.gt.f32.partialorder %v2509_v30, 1.0 }
  0x7d   :  { %2211 = vrsqrt.f32 %v2509_v30  ;;  %vm690_vm4 = vweird.f32 %v2509_v30  ;;  %vm536_vm6 = vcmp.gt.f32.partialorder %v2512_v31, 1.0  ;;  %vm670_vm8 = vweird.f32 %v2512_v31 }
  0x7e   :  { %2213 = vrsqrt.f32 %v2512_v31 }
  0x80   :  { %374 = vadd.xlane.f32.xlu2 %v199_v32  ;;  %372 = vadd.xlane.f32.xlu1 %v198_v33  ;;  %v83_v33 = vld [vmem:[#allocation2 + $0x1d8] sm:$0xff] }
  0x81   :  { %370 = vadd.xlane.f32.xlu0 %v197_v34 }
  0x82   :  { %v2516_v37 = vpop.eup %2209 }
  0x83   :  { %v2518_v40 = vpop.eup %2211  ;;  %v705_v41 = vmul.f32 %v2516_v37, %v2507_v29  ;;  %v2522_v42 = vpop.xlane.xlu2 %290  ;;  %vm711_vm5 = vweird.f32 %v2516_v37 }
  0x84   :  { %v2524_v43 = vpop.xlane.xlu1 %286  ;;  %v2526_v46 = vpop.eup %2213  ;;  %v685_v47 = vmul.f32 %v2518_v40, %v2509_v30  ;;  %2215 = vrsqrt.f32 %v2522_v42  ;;  %vm691_vm7 = vweird.f32 %v2518_v40  ;;  %vm712_vm10 = vmor %vm710_vm2, %vm711_vm5  ;;  %vm541_vm13 = vcmp.gt.f32.partialorder %v2522_v42, 1.0 }
  0x85   :  { %v2531_v48 = vpop.xlane.xlu0 %282  ;;  %v706_v51 = vmul.f32 %v2516_v37, %v705_v41  ;;  %v665_v52 = vmul.f32 %v2526_v46, %v2512_v31  ;;  %2217 = vrsqrt.f32 %v2524_v43  ;;  %vm671_vm9 = vweird.f32 %v2526_v46  ;;  %vm692_vm11 = vmor %vm690_vm4, %vm691_vm7 }
  0x86   :  { %v686_v55 = vmul.f32 %v2518_v40, %v685_v47  ;;  %2219 = vrsqrt.f32 %v2531_v48  ;;  %vm672_vm12 = vmor %vm670_vm8, %vm671_vm9  ;;  %vm720_vm14 = vweird.f32 %v2522_v42  ;;  %vm539_vm15 = vcmp.gt.f32.partialorder %v2524_v43, 1.0 }
  0x87   :  { %v707_v58 = vmul.f32 0.5, %v706_v51  ;;  %v666_v59 = vmul.f32 %v2526_v46, %v665_v52  ;;  %vm700_vm2 = vweird.f32 %v2524_v43  ;;  %v210_v52 = vmul.f32 %v82_v39, %v82_v39 }
  0x88   :  { %v687_v61 = vmul.f32 0.5, %v686_v55  ;;  %380 = vadd.xlane.f32.xlu2 %v202_v49  ;;  %378 = vadd.xlane.f32.xlu1 %v201_v50  ;;  %v2646_v49 = vmul.f32 %v83_v33, %v83_v33  ;;  %v209_v55 = vmul.f32 %v81_v44, %v81_v44 }
  0x89   :  { %v708_v62 = vsub.f32 1.5, %v707_v58  ;;  %v667_v63 = vmul.f32 0.5, %v666_v59  ;;  %376 = vadd.xlane.f32.xlu0 %v200_v53 }
  0x8a   :  { %v2548_v2 = vpop.eup %2215  ;;  %v688_v3 = vsub.f32 1.5, %v687_v61 }
  0x8b   :  { %v709_v5 = vmul.f32 %v2516_v37, %v708_v62  ;;  %v668_v6 = vsub.f32 1.5, %v667_v63  ;;  %v715_v7 = vmul.f32 %v2548_v2, %v2522_v42  ;;  %v2558_v8 = vpop.xlane.xlu2 %296  ;;  %v2562_v10 = vpop.eup %2217 }
  0x8c   :  { %v2560_v9 = vpop.xlane.xlu1 %294  ;;  %v689_v11 = vmul.f32 %v2518_v40, %v688_v3  ;;  %2221 = vrsqrt.f32 %v2558_v8  ;;  %v2576_v15 = vpop.eup %2219  ;;  %v695_v19 = vmul.f32 %v2562_v10, %v2524_v43  ;;  %vm701_vm4 = vweird.f32 %v2562_v10 }
  0x8d   :  { %v2570_v12 = vpop.xlane.xlu0 %292  ;;  %v713_v16 = vsel %vm712_vm10, %v2516_v37, %v709_v5  ;;  %v669_v17 = vmul.f32 %v2526_v46, %v668_v6  ;;  %v716_v18 = vmul.f32 %v2548_v2, %v715_v7  ;;  %v675_v22 = vmul.f32 %v2576_v15, %v2531_v48  ;;  %vm702_vm8 = vmor %vm700_vm2, %vm701_vm4  ;;  %v86_v7 = vld [vmem:[#allocation2 + $0x1f0] sm:$0xff] }
  0x8e   :  { %v1948_v20 = vsel %vm540_vm1, %v713_v16, 1.0  ;;  %v693_v21 = vsel %vm692_vm11, %v2518_v40, %v689_v11  ;;  %v696_v26 = vmul.f32 %v2562_v10, %v695_v19  ;;  %vm721_vm1 = vweird.f32 %v2548_v2  ;;  %v85_v16 = vld [vmem:[#allocation2 + $0x1e8] sm:$0xff] }
  0x8f   :  { %2077 = vst.msk [vmem:[%s5323_s1 + $0x20] sm:$0xff] %vm2072_vm0, %v1948_v20  ;;  %v1946_v23 = vsel %vm538_vm3, %v693_v21, 1.0  ;;  %v673_v24 = vsel %vm672_vm12, %v2526_v46, %v669_v17  ;;  %v717_v25 = vmul.f32 0.5, %v716_v18  ;;  %v676_v28 = vmul.f32 %v2576_v15, %v675_v22  ;;  %vm722_vm5 = vmor %vm720_vm14, %vm721_vm1 }
  0x90   :  { %2075 = vst.msk [vmem:[%s5323_s1 + $0x10] sm:$0xff] %vm2072_vm0, %v1946_v23  ;;  %v1944_v27 = vsel %vm536_vm6, %v673_v24, 1.0  ;;  %386 = vadd.xlane.f32.xlu2 %v205_v54  ;;  %384 = vadd.xlane.f32.xlu1 %v204_v56  ;;  %v697_v30 = vmul.f32 0.5, %v696_v26  ;;  %2223 = vrsqrt.f32 %v2560_v9  ;;  %vm537_vm3 = vcmp.gt.f32.partialorder %v2531_v48, 1.0 }
  0x91   :  { %2073 = vst.msk [vmem:[%s5323_s1] sm:$0xff] %vm2072_vm0, %v1944_v27  ;;  %v718_v29 = vsub.f32 1.5, %v717_v25  ;;  %382 = vadd.xlane.f32.xlu0 %v2538_v57  ;;  %v677_v32 = vmul.f32 0.5, %v676_v28  ;;  %2225 = vrsqrt.f32 %v2570_v12  ;;  %vm680_vm6 = vweird.f32 %v2531_v48 }
  0x92   :  { %v2621_v31 = vpop.eup %2221  ;;  %v698_v35 = vsub.f32 1.5, %v697_v30  ;;  %vm681_vm7 = vweird.f32 %v2576_v15  ;;  %vm750_vm10 = vweird.f32 %v2558_v8  ;;  %vm544_vm12 = vcmp.gt.f32.partialorder %v2558_v8, 1.0 }
  0x93   :  { %v719_v34 = vmul.f32 %v2548_v2, %v718_v29  ;;  %v745_v36 = vmul.f32 %v2621_v31, %v2558_v8  ;;  %v2630_v37 = vpop.xlane.xlu2 %302  ;;  %v678_v40 = vsub.f32 1.5, %v677_v32  ;;  %vm682_vm9 = vmor %vm680_vm6, %vm681_vm7  ;;  %vm751_vm11 = vweird.f32 %v2621_v31 }
  0x94   :  { %v2632_v38 = vpop.xlane.xlu1 %300  ;;  %2227 = vrsqrt.f32 %v2630_v37  ;;  %v699_v46 = vmul.f32 %v2562_v10, %v698_v35  ;;  %vm740_vm14 = vweird.f32 %v2560_v9  ;;  %vm730_vm1 = vweird.f32 %v2570_v12  ;;  %vm752_vm2 = vmor %vm750_vm10, %vm751_vm11 }
  0x95   :  { %v2641_v41 = vpop.xlane.xlu0 %298  ;;  %v723_v45 = vsel %vm722_vm5, %v2548_v2, %v719_v34  ;;  %v746_v47 = vmul.f32 %v2621_v31, %v745_v36  ;;  %v679_v51 = vmul.f32 %v2576_v15, %v678_v40  ;;  %2229 = vrsqrt.f32 %v2632_v38 }
  0x96   :  { %v1949_v50 = vsel %vm541_vm13, %v723_v45, 1.0  ;;  %v2656_v53 = vpop.eup %2223  ;;  %v703_v42 = vsel %vm702_vm8, %v2562_v10, %v699_v46  ;;  %2231 = vrsqrt.f32 %v2641_v41  ;;  %vm543_vm13 = vcmp.gt.f32.partialorder %v2560_v9, 1.0 }
  0x97   :  { %2078 = vst.msk [vmem:[%s5323_s1 + $0x28] sm:$0xff] %vm2072_vm0, %v1949_v50  ;;  %v747_v54 = vmul.f32 0.5, %v746_v47  ;;  %v2668_v56 = vpop.eup %2225  ;;  %v1947_v57 = vsel %vm539_vm15, %v703_v42, 1.0  ;;  %v683_v58 = vsel %vm682_vm9, %v2576_v15, %v679_v51  ;;  %v735_v59 = vmul.f32 %v2656_v53, %v2560_v9 }
  0x98   :  { %392 = vadd.xlane.f32.xlu2 %v2552_v4  ;;  %390 = vadd.xlane.f32.xlu1 %v2572_v13  ;;  %2076 = vst.msk [vmem:[%s5323_s1 + $0x18] sm:$0xff] %vm2072_vm0, %v1947_v57  ;;  %v1945_v43 = vsel %vm537_vm3, %v683_v58, 1.0  ;;  %v725_v61 = vmul.f32 %v2668_v56, %v2570_v12  ;;  %vm542_vm15 = vcmp.gt.f32.partialorder %v2570_v12, 1.0  ;;  %vm741_vm3 = vweird.f32 %v2656_v53  ;;  %v84_v58 = vld [vmem:[#allocation2 + $0x1e0] sm:$0xff] }
  0x99   :  { %v748_v60 = vsub.f32 1.5, %v747_v54  ;;  %388 = vadd.xlane.f32.xlu0 %v2574_v14  ;;  %2074 = vst.msk [vmem:[%s5323_s1 + $0x8] sm:$0xff] %vm2072_vm0, %v1945_v43  ;;  %v736_v48 = vmul.f32 %v2656_v53, %v735_v59  ;;  %vm780_vm4 = vweird.f32 %v2630_v37  ;;  %vm547_vm5 = vcmp.gt.f32.partialorder %v2630_v37, 1.0  ;;  %vm742_vm7 = vmor %vm740_vm14, %vm741_vm3 }
  0x9a   :  { %v2688_v62 = vpop.eup %2227  ;;  %v726_v0 = vmul.f32 %v2668_v56, %v725_v61  ;;  %vm731_vm6 = vweird.f32 %v2668_v56  ;;  %v214_v23 = vmul.f32 %v86_v7, %v86_v7  ;;  %v213_v25 = vmul.f32 %v85_v16, %v85_v16 }
  0x9b   :  { %v749_v63 = vmul.f32 %v2621_v31, %v748_v60  ;;  %v775_v1 = vmul.f32 %v2688_v62, %v2630_v37  ;;  %v2704_v2 = vpop.xlane.xlu2 %308  ;;  %v2708_v4 = vpop.eup %2229  ;;  %v737_v5 = vmul.f32 0.5, %v736_v48  ;;  %vm781_vm8 = vweird.f32 %v2688_v62  ;;  %vm732_vm9 = vmor %vm730_vm1, %vm731_vm6 }
  0x9c   :  { %v2706_v3 = vpop.xlane.xlu1 %306  ;;  %2233 = vrsqrt.f32 %v2704_v2  ;;  %v2719_v10 = vpop.eup %2231  ;;  %v727_v13 = vmul.f32 0.5, %v726_v0  ;;  %v765_v15 = vmul.f32 %v2708_v4, %v2632_v38  ;;  %vm771_vm10 = vweird.f32 %v2708_v4  ;;  %vm782_vm11 = vmor %vm780_vm4, %vm781_vm8 }
  0x9d   :  { %v2717_v6 = vpop.xlane.xlu0 %304  ;;  %v753_v11 = vsel %vm752_vm2, %v2621_v31, %v749_v63  ;;  %v776_v14 = vmul.f32 %v2688_v62, %v775_v1  ;;  %v738_v18 = vsub.f32 1.5, %v737_v5  ;;  %v755_v19 = vmul.f32 %v2719_v10, %v2641_v41 }
  0x9e   :  { %v1952_v17 = vsel %vm544_vm12, %v753_v11, 1.0  ;;  %v728_v20 = vsub.f32 1.5, %v727_v13  ;;  %v766_v22 = vmul.f32 %v2708_v4, %v765_v15  ;;  %2235 = vrsqrt.f32 %v2706_v3 }
  0x9f   :  { %2081 = vst.msk [vmem:[%s5323_s1 + $0x40] sm:$0xff] %vm2072_vm0, %v1952_v17  ;;  %v777_v21 = vmul.f32 0.5, %v776_v14  ;;  %v739_v24 = vmul.f32 %v2656_v53, %v738_v18  ;;  %v756_v8 = vmul.f32 %v2719_v10, %v755_v19  ;;  %2237 = vrsqrt.f32 %v2717_v6 }
  0xa0   :  { %398 = vadd.xlane.f32.xlu2 %v2646_v49  ;;  %396 = vadd.xlane.f32.xlu1 %v210_v52  ;;  %v729_v26 = vmul.f32 %v2668_v56, %v728_v20  ;;  %v767_v28 = vmul.f32 0.5, %v766_v22  ;;  %vm761_vm12 = vweird.f32 %v2719_v10  ;;  %vm760_vm14 = vweird.f32 %v2641_v41  ;;  %v89_v20 = vld [vmem:[#allocation2 + $0x208] sm:$0xff] }
  0xa1   :  { %v778_v27 = vsub.f32 1.5, %v777_v21  ;;  %394 = vadd.xlane.f32.xlu0 %v209_v55  ;;  %v743_v30 = vsel %vm742_vm7, %v2656_v53, %v739_v24  ;;  %v757_v31 = vmul.f32 0.5, %v756_v8  ;;  %vm546_vm1 = vcmp.gt.f32.partialorder %v2632_v38, 1.0  ;;  %vm762_vm2 = vmor %vm760_vm14, %vm761_vm12 }
  0xa2   :  { %v2746_v29 = vpop.eup %2233  ;;  %v1951_v32 = vsel %vm543_vm13, %v743_v30, 1.0  ;;  %v733_v33 = vsel %vm732_vm9, %v2668_v56, %v729_v26  ;;  %v768_v35 = vsub.f32 1.5, %v767_v28  ;;  %vm770_vm13 = vweird.f32 %v2632_v38  ;;  %v87_v28 = vld [vmem:[#allocation2 + $0x1f8] sm:$0xff] }
  0xa3   :  { %v779_v34 = vmul.f32 %v2688_v62, %v778_v27  ;;  %v2759_v36 = vpop.xlane.xlu2 %314  ;;  %2080 = vst.msk [vmem:[%s5323_s1 + $0x38] sm:$0xff] %vm2072_vm0, %v1951_v32  ;;  %v1950_v40 = vsel %vm542_vm15, %v733_v33, 1.0  ;;  %v758_v9 = vsub.f32 1.5, %v757_v31  ;;  %v805_v44 = vmul.f32 %v2746_v29, %v2704_v2  ;;  %vm772_vm15 = vmor %vm770_vm13, %vm771_vm10  ;;  %v88_v27 = vld [vmem:[#allocation2 + $0x200] sm:$0xff] }
  0xa4   :  { %v2761_v39 = vpop.xlane.xlu1 %312  ;;  %2079 = vst.msk [vmem:[%s5323_s1 + $0x30] sm:$0xff] %vm2072_vm0, %v1950_v40  ;;  %v769_v46 = vmul.f32 %v2708_v4, %v768_v35  ;;  %v2786_v47 = vpop.eup %2235  ;;  %2239 = vrsqrt.f32 %v2759_v36  ;;  %vm545_vm3 = vcmp.gt.f32.partialorder %v2641_v41, 1.0  ;;  %vm550_vm4 = vcmp.gt.f32.partialorder %v2704_v2, 1.0 }
  0xa5   :  { %v2776_v45 = vpop.xlane.xlu0 %310  ;;  %v783_v12 = vsel %vm782_vm11, %v2688_v62, %v779_v34  ;;  %v759_v50 = vmul.f32 %v2719_v10, %v758_v9  ;;  %v806_v51 = vmul.f32 %v2746_v29, %v805_v44  ;;  %v795_v37 = vmul.f32 %v2786_v47, %v2706_v3  ;;  %v2805_v53 = vpop.eup %2237 }
  0xa6   :  { %v1955_v49 = vsel %vm547_vm5, %v783_v12, 1.0  ;;  %v773_v52 = vsel %vm772_vm15, %v2708_v4, %v769_v46  ;;  %v785_v57 = vmul.f32 %v2805_v53, %v2717_v6  ;;  %vm810_vm5 = vweird.f32 %v2704_v2 }
  0xa7   :  { %2084 = vst.msk [vmem:[%s5323_s1 + $0x58] sm:$0xff] %vm2072_vm0, %v1955_v49  ;;  %v1954_v42 = vsel %vm546_vm1, %v773_v52, 1.0  ;;  %v763_v54 = vsel %vm762_vm2, %v2719_v10, %v759_v50  ;;  %v807_v55 = vmul.f32 0.5, %v806_v51  ;;  %v796_v56 = vmul.f32 %v2786_v47, %v795_v37 }
  0xa8   :  { %404 = vadd.xlane.f32.xlu2 %v214_v23  ;;  %402 = vadd.xlane.f32.xlu1 %v213_v25  ;;  %2083 = vst.msk [vmem:[%s5323_s1 + $0x50] sm:$0xff] %vm2072_vm0, %v1954_v42  ;;  %v1953_v38 = vsel %vm545_vm3, %v763_v54, 1.0  ;;  %vm811_vm6 = vweird.f32 %v2746_v29  ;;  %2241 = vrsqrt.f32 %v2761_v39  ;;  %vm549_vm7 = vcmp.gt.f32.partialorder %v2706_v3, 1.0  ;;  %v95_v23 = vld [vmem:[#allocation2 + $0x238] sm:$0xff] }
  0xa9   :  { %2082 = vst.msk [vmem:[%s5323_s1 + $0x48] sm:$0xff] %vm2072_vm0, %v1953_v38  ;;  %v808_v41 = vsub.f32 1.5, %v807_v55  ;;  %v797_v59 = vmul.f32 0.5, %v796_v56  ;;  %v786_v43 = vmul.f32 %v2805_v53, %v785_v57  ;;  %2243 = vrsqrt.f32 %v2776_v45  ;;  %vm812_vm9 = vmor %vm810_vm5, %vm811_vm6 }
  0xaa   :  { %v2831_v62 = vpop.eup %2239  ;;  %vm800_vm8 = vweird.f32 %v2706_v3  ;;  %v212_v63 = vmul.f32 %v84_v58, %v84_v58  ;;  %vm801_vm10 = vweird.f32 %v2786_v47  ;;  %vm548_vm11 = vcmp.gt.f32.partialorder %v2717_v6, 1.0 }
  0xab   :  { %v2827_v60 = vpop.xlane.xlu2 %320  ;;  %v809_v48 = vmul.f32 %v2746_v29, %v808_v41  ;;  %v798_v1 = vsub.f32 1.5, %v797_v59  ;;  %v787_v4 = vmul.f32 0.5, %v786_v43  ;;  %v835_v5 = vmul.f32 %v2831_v62, %v2759_v36  ;;  %vm802_vm13 = vmor %vm800_vm8, %vm801_vm10 }
  0xac   :  { %v2829_v61 = vpop.xlane.xlu1 %318  ;;  %2245 = vrsqrt.f32 %v2827_v60  ;;  %vm791_vm12 = vweird.f32 %v2805_v53  ;;  %400 = vadd.xlane.f32.xlu0 %v212_v63  ;;  %vm790_vm14 = vweird.f32 %v2717_v6  ;;  %vm553_vm15 = vcmp.gt.f32.partialorder %v2759_v36, 1.0 }
  0xad   :  { %v2836_v0 = vpop.xlane.xlu0 %316  ;;  %v813_v7 = vsel %vm812_vm9, %v2746_v29, %v809_v48  ;;  %2247 = vrsqrt.f32 %v2829_v61  ;;  %v799_v11 = vmul.f32 %v2786_v47, %v798_v1  ;;  %v788_v13 = vsub.f32 1.5, %v787_v4  ;;  %vm2876_vm3 = vmor %vm790_vm14, %vm791_vm12 }
  0xae   :  { %v1958_v10 = vsel %vm550_vm4, %v813_v7, 1.0  ;;  %v836_v14 = vmul.f32 %v2831_v62, %v835_v5  ;;  %v2851_v15 = vpop.eup %2241  ;;  %vm840_vm1 = vweird.f32 %v2759_v36  ;;  %2249 = vrsqrt.f32 %v2836_v0  ;;  %v92_v5 = vld [vmem:[#allocation2 + $0x220] sm:$0xff]  ;;  %v91_v7 = vld [vmem:[#allocation2 + $0x218] sm:$0xff] }
  0xaf   :  { %2087 = vst.msk [vmem:[%s5323_s1 + $0x70] sm:$0xff] %vm2072_vm0, %v1958_v10  ;;  %v2863_v2 = vpop.eup %2243  ;;  %v803_v16 = vsel %vm802_vm13, %v2786_v47, %v799_v11  ;;  %v789_v17 = vmul.f32 %v2805_v53, %v788_v13  ;;  %v825_v19 = vmul.f32 %v2851_v15, %v2761_v39  ;;  %vm830_vm2 = vweird.f32 %v2761_v39 }
  0xb0   :  { %v837_v18 = vmul.f32 0.5, %v836_v14  ;;  %v1957_v22 = vsel %vm549_vm7, %v803_v16, 1.0  ;;  %vm841_vm4 = vweird.f32 %v2831_v62  ;;  %v815_v24 = vmul.f32 %v2863_v2, %v2776_v45  ;;  %v90_v14 = vld [vmem:[#allocation2 + $0x210] sm:$0xff] }
  0xb1   :  { %vm820_vm5 = vweird.f32 %v2776_v45  ;;  %2086 = vst.msk [vmem:[%s5323_s1 + $0x68] sm:$0xff] %vm2072_vm0, %v1957_v22  ;;  %v793_v3 = vsel %vm2876_vm3, %v2805_v53, %v789_v17  ;;  %vm552_vm6 = vcmp.gt.f32.partialorder %v2761_v39, 1.0  ;;  %v826_v25 = vmul.f32 %v2851_v15, %v825_v19  ;;  %vm842_vm9 = vmor %vm840_vm1, %vm841_vm4 }
  0xb2   :  { %v2870_v21 = vpop.eup %2245  ;;  %v838_v8 = vsub.f32 1.5, %v837_v18  ;;  %v1956_v32 = vsel %vm548_vm11, %v793_v3, 1.0  ;;  %vm551_vm7 = vcmp.gt.f32.partialorder %v2776_v45, 1.0  ;;  %v816_v33 = vmul.f32 %v2863_v2, %v815_v24 }
  0xb3   :  { %v865_v26 = vmul.f32 %v2870_v21, %v2827_v60  ;;  %v2895_v29 = vpop.xlane.xlu2 %326  ;;  %v2899_v31 = vpop.eup %2247  ;;  %vm870_vm8 = vweird.f32 %v2827_v60  ;;  %v217_v34 = vmul.f32 %v89_v20, %v89_v20  ;;  %2085 = vst.msk [vmem:[%s5323_s1 + $0x60] sm:$0xff] %vm2072_vm0, %v1956_v32  ;;  %v827_v9 = vmul.f32 0.5, %v826_v25  ;;  %v94_v25 = vld [vmem:[#allocation2 + $0x230] sm:$0xff] }
  0xb4   :  { %v2897_v30 = vpop.xlane.xlu1 %324  ;;  %v839_v40 = vmul.f32 %v2831_v62, %v838_v8  ;;  %v855_v44 = vmul.f32 %v2899_v31, %v2829_v61  ;;  %v2916_v12 = vpop.eup %2249  ;;  %vm831_vm10 = vweird.f32 %v2851_v15  ;;  %v817_v46 = vmul.f32 0.5, %v816_v33 }
  0xb5   :  { %v2906_v35 = vpop.xlane.xlu0 %322  ;;  %v866_v6 = vmul.f32 %v2870_v21, %v865_v26  ;;  %410 = vadd.xlane.f32.xlu2 %v217_v34  ;;  %v216_v47 = vmul.f32 %v88_v27, %v88_v27  ;;  %v215_v49 = vmul.f32 %v87_v28, %v87_v28  ;;  %v828_v51 = vsub.f32 1.5, %v827_v9  ;;  %vm832_vm13 = vmor %vm830_vm2, %vm831_vm10  ;;  %v93_v26 = vld [vmem:[#allocation2 + $0x228] sm:$0xff] }
  0xb6   :  { %v843_v50 = vsel %vm842_vm9, %v2831_v62, %v839_v40  ;;  %v856_v37 = vmul.f32 %v2899_v31, %v855_v44  ;;  %v818_v42 = vsub.f32 1.5, %v817_v46  ;;  %vm821_vm11 = vweird.f32 %v2863_v2 }
  0xb7   :  { %v867_v52 = vmul.f32 0.5, %v866_v6  ;;  %v1961_v53 = vsel %vm553_vm15, %v843_v50, 1.0  ;;  %v845_v54 = vmul.f32 %v2916_v12, %v2836_v0  ;;  %408 = vadd.xlane.f32.xlu1 %v216_v47  ;;  %406 = vadd.xlane.f32.xlu0 %v215_v49  ;;  %v829_v55 = vmul.f32 %v2851_v15, %v828_v51  ;;  %vm2949_vm15 = vmor %vm820_vm5, %vm821_vm11 }
  0xb8   :  { %2090 = vst.msk [vmem:[%s5323_s1 + $0x88] sm:$0xff] %vm2072_vm0, %v1961_v53  ;;  %vm871_vm12 = vweird.f32 %v2870_v21  ;;  %v857_v36 = vmul.f32 0.5, %v856_v37  ;;  %v819_v56 = vmul.f32 %v2863_v2, %v818_v42  ;;  %vm556_vm14 = vcmp.gt.f32.partialorder %v2827_v60, 1.0 }
  0xb9   :  { %v868_v38 = vsub.f32 1.5, %v867_v52  ;;  %v846_v57 = vmul.f32 %v2916_v12, %v845_v54  ;;  %2251 = vrsqrt.f32 %v2895_v29  ;;  %v833_v58 = vsel %vm832_vm13, %v2851_v15, %v829_v55  ;;  %vm872_vm2 = vmor %vm870_vm8, %vm871_vm12 }
  0xba   :  { %v858_v43 = vsub.f32 1.5, %v857_v36  ;;  %vm861_vm1 = vweird.f32 %v2899_v31  ;;  %v1960_v63 = vsel %vm552_vm6, %v833_v58, 1.0  ;;  %v823_v1 = vsel %vm2949_vm15, %v2863_v2, %v819_v56 }
  0xbb   :  { %v869_v59 = vmul.f32 %v2870_v21, %v868_v38  ;;  %v2955_v62 = vpop.xlane.xlu2 %332  ;;  %v847_v4 = vmul.f32 0.5, %v846_v57  ;;  %2253 = vrsqrt.f32 %v2897_v30  ;;  %2089 = vst.msk [vmem:[%s5323_s1 + $0x80] sm:$0xff] %vm2072_vm0, %v1960_v63  ;;  %v1959_v39 = vsel %vm551_vm7, %v823_v1, 1.0 }
  0xbc   :  { %v2957_v48 = vpop.xlane.xlu1 %330  ;;  %v859_v13 = vmul.f32 %v2899_v31, %v858_v43  ;;  %vm860_vm3 = vweird.f32 %v2829_v61  ;;  %2088 = vst.msk [vmem:[%s5323_s1 + $0x78] sm:$0xff] %vm2072_vm0, %v1959_v39  ;;  %vm851_vm5 = vweird.f32 %v2916_v12  ;;  %2255 = vrsqrt.f32 %v2906_v35 }
  0xbd   :  { %v2969_v10 = vpop.xlane.xlu0 %328  ;;  %v873_v11 = vsel %vm872_vm2, %v2870_v21, %v869_v59  ;;  %vm862_vm4 = vmor %vm860_vm3, %vm861_vm1  ;;  %v848_v45 = vsub.f32 1.5, %v847_v4  ;;  %vm555_vm6 = vcmp.gt.f32.partialorder %v2829_v61, 1.0  ;;  %v220_v16 = vmul.f32 %v92_v5, %v92_v5 }
  0xbe   :  { %v1964_v15 = vsel %vm556_vm14, %v873_v11, 1.0  ;;  %v863_v2 = vsel %vm862_vm4, %v2899_v31, %v859_v13  ;;  %v219_v60 = vmul.f32 %v91_v7, %v91_v7  ;;  %vm850_vm7 = vweird.f32 %v2836_v0 }
  0xbf   :  { %2093 = vst.msk [vmem:[%s5323_s1 + $0xa0] sm:$0xff] %vm2072_vm0, %v1964_v15  ;;  %v2996_v17 = vpop.eup %2251  ;;  %v1963_v18 = vsel %vm555_vm6, %v863_v2, 1.0  ;;  %v849_v19 = vmul.f32 %v2916_v12, %v848_v45  ;;  %v218_v20 = vmul.f32 %v90_v14, %v90_v14  ;;  %vm852_vm8 = vmor %vm850_vm7, %vm851_vm5  ;;  %416 = vadd.xlane.f32.xlu2 %v220_v16  ;;  %2257 = vrsqrt.f32 %v2955_v62 }
  0xc0   :  { %2092 = vst.msk [vmem:[%s5323_s1 + $0x98] sm:$0xff] %vm2072_vm0, %v1963_v18  ;;  %v895_v61 = vmul.f32 %v2996_v17, %v2895_v29  ;;  %414 = vadd.xlane.f32.xlu1 %v219_v60  ;;  %vm554_vm9 = vcmp.gt.f32.partialorder %v2836_v0, 1.0  ;;  %2259 = vrsqrt.f32 %v2957_v48  ;;  %vm559_vm10 = vcmp.gt.f32.partialorder %v2895_v29, 1.0  ;;  %v98_v60 = vld [vmem:[#allocation2 + $0x250] sm:$0xff] }
  0xc1   :  { %v3007_v21 = vpop.eup %2253  ;;  %v853_v22 = vsel %vm852_vm8, %v2916_v12, %v849_v19  ;;  %412 = vadd.xlane.f32.xlu0 %v218_v20  ;;  %vm900_vm11 = vweird.f32 %v2895_v29  ;;  %2261 = vrsqrt.f32 %v2969_v10  ;;  %vm558_vm12 = vcmp.gt.f32.partialorder %v2897_v30, 1.0 }
  0xc2   :  { %v1962_v24 = vsel %vm554_vm9, %v853_v22, 1.0  ;;  %v896_v3 = vmul.f32 %v2996_v17, %v895_v61  ;;  %v885_v8 = vmul.f32 %v3007_v21, %v2897_v30  ;;  %v3019_v31 = vpop.eup %2255  ;;  %v223_v40 = vmul.f32 %v95_v23, %v95_v23  ;;  %v96_v22 = vld [vmem:[#allocation2 + $0x240] sm:$0xff] }
  0xc3   :  { %v3015_v27 = vpop.xlane.xlu2 %338  ;;  %2091 = vst.msk [vmem:[%s5323_s1 + $0x90] sm:$0xff] %vm2072_vm0, %v1962_v24  ;;  %v875_v34 = vmul.f32 %v3019_v31, %v2906_v35  ;;  %vm890_vm13 = vweird.f32 %v2897_v30  ;;  %v222_v9 = vmul.f32 %v94_v25, %v94_v25  ;;  %v221_v6 = vmul.f32 %v93_v26, %v93_v26 }
  0xc4   :  { %v3017_v28 = vpop.xlane.xlu1 %336  ;;  %v897_v32 = vmul.f32 0.5, %v896_v3  ;;  %v886_v33 = vmul.f32 %v3007_v21, %v885_v8  ;;  %2263 = vrsqrt.f32 %v3015_v27  ;;  %vm901_vm14 = vweird.f32 %v2996_v17 }
  0xc5   :  { %v3028_v0 = vpop.xlane.xlu0 %334  ;;  %v3036_v44 = vpop.eup %2257  ;;  %vm557_vm15 = vcmp.gt.f32.partialorder %v2906_v35, 1.0  ;;  %v876_v47 = vmul.f32 %v3019_v31, %v875_v34  ;;  %vm891_vm1 = vweird.f32 %v3007_v21  ;;  %vm880_vm2 = vweird.f32 %v2906_v35  ;;  %vm3057_vm3 = vmor %vm900_vm11, %vm901_vm14 }
  0xc6   :  { %v898_v12 = vsub.f32 1.5, %v897_v32  ;;  %v887_v46 = vmul.f32 0.5, %v886_v33  ;;  %v3041_v49 = vpop.eup %2259  ;;  %v925_v50 = vmul.f32 %v3036_v44, %v2955_v62  ;;  %2265 = vrsqrt.f32 %v3017_v28  ;;  %vm892_vm11 = vmor %vm890_vm13, %vm891_vm1 }
  0xc7   :  { %v877_v37 = vmul.f32 0.5, %v876_v47  ;;  %v915_v53 = vmul.f32 %v3041_v49, %v2957_v48  ;;  %422 = vadd.xlane.f32.xlu2 %v223_v40  ;;  %v3051_v42 = vpop.eup %2261  ;;  %vm881_vm4 = vweird.f32 %v3019_v31  ;;  %vm562_vm5 = vcmp.gt.f32.partialorder %v2955_v62, 1.0 }
  0xc8   :  { %v899_v51 = vmul.f32 %v2996_v17, %v898_v12  ;;  %v888_v52 = vsub.f32 1.5, %v887_v46  ;;  %420 = vadd.xlane.f32.xlu1 %v222_v9  ;;  %v926_v55 = vmul.f32 %v3036_v44, %v925_v50  ;;  %vm930_vm6 = vweird.f32 %v2955_v62  ;;  %v101_v46 = vld [vmem:[#allocation2 + $0x268] sm:$0xff] }
  0xc9   :  { %vm920_vm7 = vweird.f32 %v2957_v48  ;;  %418 = vadd.xlane.f32.xlu0 %v221_v6  ;;  %v878_v56 = vsub.f32 1.5, %v877_v37  ;;  %vm561_vm8 = vcmp.gt.f32.partialorder %v2957_v48, 1.0  ;;  %v916_v57 = vmul.f32 %v3041_v49, %v915_v53 }
  0xca   :  { %v903_v38 = vsel %vm3057_vm3, %v2996_v17, %v899_v51  ;;  %v889_v36 = vmul.f32 %v3007_v21, %v888_v52  ;;  %vm960_vm9 = vweird.f32 %v3015_v27  ;;  %v3077_v59 = vpop.eup %2263  ;;  %v927_v63 = vmul.f32 0.5, %v926_v55  ;;  %v100_v51 = vld [vmem:[#allocation2 + $0x260] sm:$0xff]  ;;  %v99_v52 = vld [vmem:[#allocation2 + $0x258] sm:$0xff] }
  0xcb   :  { %v3073_v58 = vpop.xlane.xlu2 %344  ;;  %v1967_v43 = vsel %vm559_vm10, %v903_v38, 1.0  ;;  %vm931_vm14 = vweird.f32 %v3036_v44  ;;  %v905_v1 = vmul.f32 %v3051_v42, %v2969_v10  ;;  %vm910_vm3 = vweird.f32 %v2969_v10  ;;  %vm882_vm10 = vmor %vm880_vm2, %vm881_vm4 }
  0xcc   :  { %v3075_v41 = vpop.xlane.xlu1 %342  ;;  %2096 = vst.msk [vmem:[%s5323_s1 + $0xb8] sm:$0xff] %vm2072_vm0, %v1967_v43  ;;  %v893_v29 = vsel %vm892_vm11, %v3007_v21, %v889_v36  ;;  %v879_v5 = vmul.f32 %v3019_v31, %v878_v56  ;;  %v917_v7 = vmul.f32 0.5, %v916_v57  ;;  %v955_v39 = vmul.f32 %v3077_v59, %v3015_v27  ;;  %v3099_v11 = vpop.eup %2265  ;;  %vm932_vm1 = vmor %vm930_vm6, %vm931_vm14  ;;  %v97_v21 = vld [vmem:[#allocation2 + $0x248] sm:$0xff] }
  0xcd   :  { %v3089_v4 = vpop.xlane.xlu0 %340  ;;  %v1966_v13 = vsel %vm558_vm12, %v893_v29, 1.0  ;;  %v928_v14 = vsub.f32 1.5, %v927_v63  ;;  %vm921_vm13 = vweird.f32 %v3041_v49  ;;  %v906_v15 = vmul.f32 %v3051_v42, %v905_v1 }
  0xce   :  { %2095 = vst.msk [vmem:[%s5323_s1 + $0xb0] sm:$0xff] %vm2072_vm0, %v1966_v13  ;;  %v883_v45 = vsel %vm882_vm10, %v3019_v31, %v879_v5  ;;  %v918_v2 = vsub.f32 1.5, %v917_v7  ;;  %v956_v30 = vmul.f32 %v3077_v59, %v955_v39  ;;  %v945_v16 = vmul.f32 %v3099_v11, %v3017_v28  ;;  %v104_v5 = vld [vmem:[#allocation2 + $0x280] sm:$0xff]  ;;  %v102_v13 = vld [vmem:[#allocation2 + $0x270] sm:$0xff] }
  0xcf   :  { %v1965_v17 = vsel %vm557_vm15, %v883_v45, 1.0  ;;  %v929_v18 = vmul.f32 %v3036_v44, %v928_v14  ;;  %v907_v19 = vmul.f32 0.5, %v906_v15  ;;  %vm911_vm12 = vweird.f32 %v3051_v42  ;;  %vm922_vm15 = vmor %vm920_vm7, %vm921_vm13 }
  0xd0   :  { %2094 = vst.msk [vmem:[%s5323_s1 + $0xa8] sm:$0xff] %vm2072_vm0, %v1965_v17  ;;  %v919_v20 = vmul.f32 %v3041_v49, %v918_v2  ;;  %v957_v61 = vmul.f32 0.5, %v956_v30  ;;  %v946_v35 = vmul.f32 %v3099_v11, %v945_v16  ;;  %2267 = vrsqrt.f32 %v3028_v0  ;;  %vm912_vm4 = vmor %vm910_vm3, %vm911_vm12 }
  0xd1   :  { %v933_v23 = vsel %vm932_vm1, %v3036_v44, %v929_v18  ;;  %v908_v24 = vsub.f32 1.5, %v907_v19  ;;  %vm961_vm2 = vweird.f32 %v3077_v59  ;;  %v226_v3 = vmul.f32 %v98_v60, %v98_v60 }
  0xd2   :  { %v1970_v8 = vsel %vm562_vm5, %v933_v23, 1.0  ;;  %v923_v25 = vsel %vm922_vm15, %v3041_v49, %v919_v20  ;;  %v958_v26 = vsub.f32 1.5, %v957_v61  ;;  %v947_v31 = vmul.f32 0.5, %v946_v35 }
  0xd3   :  { %v3141_v32 = vpop.xlane.xlu2 %350  ;;  %2099 = vst.msk [vmem:[%s5323_s1 + $0xd0] sm:$0xff] %vm2072_vm0, %v1970_v8  ;;  %v1969_v34 = vsel %vm561_vm8, %v923_v25, 1.0  ;;  %v909_v40 = vmul.f32 %v3051_v42, %v908_v24  ;;  %428 = vadd.xlane.f32.xlu2 %v226_v3  ;;  %v225_v62 = vmul.f32 %v97_v21, %v97_v21  ;;  %v224_v9 = vmul.f32 %v96_v22, %v96_v22  ;;  %vm962_vm8 = vmor %vm960_vm9, %vm961_vm2 }
  0xd4   :  { %v3143_v33 = vpop.xlane.xlu1 %348  ;;  %2098 = vst.msk [vmem:[%s5323_s1 + $0xc8] sm:$0xff] %vm2072_vm0, %v1969_v34  ;;  %v959_v48 = vmul.f32 %v3077_v59, %v958_v26  ;;  %v948_v44 = vsub.f32 1.5, %v947_v31  ;;  %vm951_vm5 = vweird.f32 %v3099_v11  ;;  %2269 = vrsqrt.f32 %v3073_v58 }
  0xd5   :  { %v3152_v6 = vpop.xlane.xlu0 %346  ;;  %vm560_vm6 = vcmp.gt.f32.partialorder %v2969_v10, 1.0  ;;  %v913_v12 = vsel %vm912_vm4, %v3051_v42, %v909_v40  ;;  %vm565_vm7 = vcmp.gt.f32.partialorder %v3015_v27, 1.0  ;;  %426 = vadd.xlane.f32.xlu1 %v225_v62  ;;  %424 = vadd.xlane.f32.xlu0 %v224_v9  ;;  %2271 = vrsqrt.f32 %v3075_v41 }
  0xd6   :  { %v3173_v47 = vpop.eup %2267  ;;  %v1968_v49 = vsel %vm560_vm6, %v913_v12, 1.0  ;;  %v963_v50 = vsel %vm962_vm8, %v3077_v59, %v959_v48  ;;  %v949_v10 = vmul.f32 %v3099_v11, %v948_v44  ;;  %vm950_vm11 = vweird.f32 %v3017_v28 }
  0xd7   :  { %2097 = vst.msk [vmem:[%s5323_s1 + $0xc0] sm:$0xff] %vm2072_vm0, %v1968_v49  ;;  %v1973_v27 = vsel %vm565_vm7, %v963_v50, 1.0  ;;  %vm952_vm9 = vmor %vm950_vm11, %vm951_vm5  ;;  %v935_v37 = vmul.f32 %v3173_v47, %v3028_v0  ;;  %vm564_vm14 = vcmp.gt.f32.partialorder %v3017_v28, 1.0  ;;  %2273 = vrsqrt.f32 %v3089_v4 }
  0xd8   :  { %2102 = vst.msk [vmem:[%s5323_s1 + $0xe8] sm:$0xff] %vm2072_vm0, %v1973_v27  ;;  %v953_v53 = vsel %vm952_vm9, %v3099_v11, %v949_v10  ;;  %v229_v42 = vmul.f32 %v101_v46, %v101_v46  ;;  %v228_v38 = vmul.f32 %v100_v51, %v100_v51  ;;  %v227_v36 = vmul.f32 %v99_v52, %v99_v52  ;;  %v103_v11 = vld [vmem:[#allocation2 + $0x278] sm:$0xff] }
  0xd9   :  { %v1972_v54 = vsel %vm564_vm14, %v953_v53, 1.0  ;;  %v936_v55 = vmul.f32 %v3173_v47, %v935_v37  ;;  %2275 = vrsqrt.f32 %v3141_v32  ;;  %vm563_vm3 = vcmp.gt.f32.partialorder %v3028_v0, 1.0 }
  0xda   :  { %v3194_v56 = vpop.eup %2269  ;;  %2101 = vst.msk [vmem:[%s5323_s1 + $0xe0] sm:$0xff] %vm2072_vm0, %v1972_v54  ;;  %2277 = vrsqrt.f32 %v3143_v33  ;;  %vm940_vm10 = vweird.f32 %v3028_v0  ;;  %vm990_vm13 = vweird.f32 %v3073_v58  ;;  %vm941_vm12 = vweird.f32 %v3173_v47 }
  0xdb   :  { %v3201_v28 = vpop.xlane.xlu2 %356  ;;  %v3205_v59 = vpop.eup %2271  ;;  %v937_v43 = vmul.f32 0.5, %v936_v55  ;;  %v985_v63 = vmul.f32 %v3194_v56, %v3073_v58  ;;  %434 = vadd.xlane.f32.xlu2 %v229_v42  ;;  %vm568_vm1 = vcmp.gt.f32.partialorder %v3073_v58, 1.0  ;;  %2279 = vrsqrt.f32 %v3152_v6  ;;  %vm942_vm7 = vmor %vm940_vm10, %vm941_vm12 }
  0xdc   :  { %v3203_v57 = vpop.xlane.xlu1 %354  ;;  %v975_v29 = vmul.f32 %v3205_v59, %v3075_v41  ;;  %vm991_vm15 = vweird.f32 %v3194_v56  ;;  %vm567_vm2 = vcmp.gt.f32.partialorder %v3075_v41, 1.0  ;;  %vm980_vm4 = vweird.f32 %v3075_v41 }
  0xdd   :  { %v3210_v1 = vpop.xlane.xlu0 %352  ;;  %v938_v7 = vsub.f32 1.5, %v937_v43  ;;  %v986_v39 = vmul.f32 %v3194_v56, %v985_v63  ;;  %432 = vadd.xlane.f32.xlu1 %v228_v38  ;;  %430 = vadd.xlane.f32.xlu0 %v227_v36  ;;  %v3221_v14 = vpop.eup %2273  ;;  %vm970_vm5 = vweird.f32 %v3089_v4  ;;  %vm1020_vm6 = vweird.f32 %v3141_v32  ;;  %v107_v36 = vld [vmem:[#allocation2 + $0x298] sm:$0xff] }
  0xde   :  { %v976_v15 = vmul.f32 %v3205_v59, %v975_v29  ;;  %v965_v30 = vmul.f32 %v3221_v14, %v3089_v4  ;;  %v232_v16 = vmul.f32 %v104_v5, %v104_v5  ;;  %v231_v18 = vmul.f32 %v103_v11, %v103_v11  ;;  %v106_v29 = vld [vmem:[#allocation2 + $0x290] sm:$0xff]  ;;  %v105_v5 = vld [vmem:[#allocation2 + $0x288] sm:$0xff] }
  0xdf   :  { %v939_v45 = vmul.f32 %v3173_v47, %v938_v7  ;;  %v987_v2 = vmul.f32 0.5, %v986_v39  ;;  %v3232_v60 = vpop.eup %2275  ;;  %v230_v19 = vmul.f32 %v102_v13, %v102_v13  ;;  %2281 = vrsqrt.f32 %v3201_v28 }
  0xe0   :  { %v977_v17 = vmul.f32 0.5, %v976_v15  ;;  %v3239_v20 = vpop.eup %2277  ;;  %vm566_vm8 = vcmp.gt.f32.partialorder %v3089_v4, 1.0  ;;  %v966_v21 = vmul.f32 %v3221_v14, %v965_v30  ;;  %v1015_v22 = vmul.f32 %v3232_v60, %v3141_v32 }
  0xe1   :  { %v943_v61 = vsel %vm942_vm7, %v3173_v47, %v939_v45  ;;  %v988_v35 = vsub.f32 1.5, %v987_v2  ;;  %vm981_vm11 = vweird.f32 %v3205_v59  ;;  %v1005_v3 = vmul.f32 %v3239_v20, %v3143_v33  ;;  %v3255_v26 = vpop.eup %2279 }
  0xe2   :  { %v1971_v23 = vsel %vm563_vm3, %v943_v61, 1.0  ;;  %v978_v24 = vsub.f32 1.5, %v977_v17  ;;  %v967_v31 = vmul.f32 0.5, %v966_v21  ;;  %vm571_vm9 = vcmp.gt.f32.partialorder %v3141_v32, 1.0  ;;  %vm3271_vm3 = vmor %vm990_vm13, %vm991_vm15  ;;  %v110_v61 = vld [vmem:[#allocation2 + $0x2b0] sm:$0xff] }
  0xe3   :  { %v3251_v8 = vpop.xlane.xlu2 %362  ;;  %2100 = vst.msk [vmem:[%s5323_s1 + $0xd8] sm:$0xff] %vm2072_vm0, %v1971_v23  ;;  %v989_v0 = vmul.f32 %v3194_v56, %v988_v35  ;;  %v1016_v34 = vmul.f32 %v3232_v60, %v1015_v22  ;;  %vm1010_vm14 = vweird.f32 %v3143_v33  ;;  %440 = vadd.xlane.f32.xlu2 %v232_v16  ;;  %vm971_vm10 = vweird.f32 %v3221_v14  ;;  %vm982_vm13 = vmor %vm980_vm4, %vm981_vm11  ;;  %v108_v35 = vld [vmem:[#allocation2 + $0x2a0] sm:$0xff] }
  0xe4   :  { %v3253_v25 = vpop.xlane.xlu1 %360  ;;  %v979_v9 = vmul.f32 %v3205_v59, %v978_v24  ;;  %vm570_vm12 = vcmp.gt.f32.partialorder %v3143_v33, 1.0  ;;  %v1006_v48 = vmul.f32 %v3239_v20, %v1005_v3  ;;  %v995_v44 = vmul.f32 %v3255_v26, %v3152_v6 }
  0xe5   :  { %v3265_v40 = vpop.xlane.xlu0 %358  ;;  %vm1000_vm7 = vweird.f32 %v3152_v6  ;;  %v993_v12 = vsel %vm3271_vm3, %v3194_v56, %v989_v0  ;;  %v968_v46 = vsub.f32 1.5, %v967_v31  ;;  %v1017_v47 = vmul.f32 0.5, %v1016_v34  ;;  %438 = vadd.xlane.f32.xlu1 %v231_v18  ;;  %436 = vadd.xlane.f32.xlu0 %v230_v19  ;;  %v3290_v49 = vpop.eup %2281 }
  0xe6   :  { %vm1021_vm15 = vweird.f32 %v3232_v60  ;;  %v1976_v50 = vsel %vm568_vm1, %v993_v12, 1.0  ;;  %v983_v10 = vsel %vm982_vm13, %v3205_v59, %v979_v9  ;;  %v1007_v51 = vmul.f32 0.5, %v1006_v48  ;;  %vm972_vm1 = vmor %vm970_vm5, %vm971_vm10 }
  0xe7   :  { %v996_v52 = vmul.f32 %v3255_v26, %v995_v44  ;;  %2105 = vst.msk [vmem:[%s5323_s1 + $0x100] sm:$0xff] %vm2072_vm0, %v1976_v50  ;;  %v1975_v27 = vsel %vm567_vm2, %v983_v10, 1.0  ;;  %v969_v37 = vmul.f32 %v3221_v14, %v968_v46  ;;  %v1018_v53 = vsub.f32 1.5, %v1017_v47  ;;  %vm3325_vm5 = vmor %vm1020_vm6, %vm1021_vm15 }
  0xe8   :  { %v1045_v58 = vmul.f32 %v3290_v49, %v3201_v28  ;;  %2104 = vst.msk [vmem:[%s5323_s1 + $0xf8] sm:$0xff] %vm2072_vm0, %v1975_v27  ;;  %v1008_v42 = vsub.f32 1.5, %v1007_v51  ;;  %vm1011_vm4 = vweird.f32 %v3239_v20  ;;  %2283 = vrsqrt.f32 %v3203_v57  ;;  %v113_v27 = vld [vmem:[#allocation2 + $0x2c8] sm:$0xff] }
  0xe9   :  { %v997_v41 = vmul.f32 0.5, %v996_v52  ;;  %v973_v54 = vsel %vm972_vm1, %v3221_v14, %v969_v37  ;;  %v1019_v55 = vmul.f32 %v3232_v60, %v1018_v53  ;;  %vm1050_vm2 = vweird.f32 %v3201_v28  ;;  %vm1012_vm6 = vmor %vm1010_vm14, %vm1011_vm4 }
  0xea   :  { %v1046_v38 = vmul.f32 %v3290_v49, %v1045_v58  ;;  %v1974_v56 = vsel %vm566_vm8, %v973_v54, 1.0  ;;  %v1009_v43 = vmul.f32 %v3239_v20, %v1008_v42  ;;  %vm1001_vm11 = vweird.f32 %v3255_v26  ;;  %v112_v58 = vld [vmem:[#allocation2 + $0x2c0] sm:$0xff] }
  0xeb   :  { %v998_v63 = vsub.f32 1.5, %v997_v41  ;;  %v3331_v7 = vpop.xlane.xlu2 %368  ;;  %2103 = vst.msk [vmem:[%s5323_s1 + $0xf0] sm:$0xff] %vm2072_vm0, %v1974_v56  ;;  %v1023_v4 = vsel %vm3325_vm5, %v3232_v60, %v1019_v55  ;;  %vm1051_vm8 = vweird.f32 %v3290_v49  ;;  %2285 = vrsqrt.f32 %v3210_v1  ;;  %vm1002_vm14 = vmor %vm1000_vm7, %vm1001_vm11 }
  0xec   :  { %v3333_v39 = vpop.xlane.xlu1 %366  ;;  %v1047_v11 = vmul.f32 0.5, %v1046_v38  ;;  %v1979_v14 = vsel %vm571_vm9, %v1023_v4, 1.0  ;;  %v1013_v15 = vsel %vm1012_vm6, %v3239_v20, %v1009_v43  ;;  %v235_v2 = vmul.f32 %v107_v36, %v107_v36  ;;  %vm1052_vm3 = vmor %vm1050_vm2, %vm1051_vm8 }
  0xed   :  { %v3348_v13 = vpop.xlane.xlu0 %364  ;;  %v999_v45 = vmul.f32 %v3255_v26, %v998_v63  ;;  %2108 = vst.msk [vmem:[%s5323_s1 + $0x118] sm:$0xff] %vm2072_vm0, %v1979_v14  ;;  %v1978_v30 = vsel %vm570_vm12, %v1013_v15, 1.0  ;;  %v234_v16 = vmul.f32 %v106_v29, %v106_v29  ;;  %v233_v60 = vmul.f32 %v105_v5, %v105_v5 }
  0xee   :  { %v1048_v32 = vsub.f32 1.5, %v1047_v11  ;;  %v3364_v17 = vpop.eup %2283  ;;  %2107 = vst.msk [vmem:[%s5323_s1 + $0x110] sm:$0xff] %vm2072_vm0, %v1978_v30  ;;  %vm569_vm9 = vcmp.gt.f32.partialorder %v3152_v6, 1.0  ;;  %446 = vadd.xlane.f32.xlu2 %v235_v2  ;;  %2287 = vrsqrt.f32 %v3251_v8  ;;  %v109_v6 = vld [vmem:[#allocation2 + $0x2a8] sm:$0xff]  ;;  %vm574_vm10 = vcmp.gt.f32.partialorder %v3201_v28, 1.0 }
  0xef   :  { %v1003_v33 = vsel %vm1002_vm14, %v3255_v26, %v999_v45  ;;  %v1035_v20 = vmul.f32 %v3364_v17, %v3203_v57  ;;  %444 = vadd.xlane.f32.xlu1 %v234_v16  ;;  %442 = vadd.xlane.f32.xlu0 %v233_v60  ;;  %2289 = vrsqrt.f32 %v3253_v25  ;;  %v238_v26 = vmul.f32 %v110_v61, %v110_v61 }
  0xf0   :  { %v1977_v18 = vsel %vm569_vm9, %v1003_v33, 1.0  ;;  %v1049_v19 = vmul.f32 %v3290_v49, %v1048_v32  ;;  %2291 = vrsqrt.f32 %v3265_v40  ;;  %vm573_vm12 = vcmp.gt.f32.partialorder %v3203_v57, 1.0  ;;  %v111_v32 = vld [vmem:[#allocation2 + $0x2b8] sm:$0xff] }
  0xf1   :  { %2106 = vst.msk [vmem:[%s5323_s1 + $0x108] sm:$0xff] %vm2072_vm0, %v1977_v18  ;;  %v3385_v21 = vpop.eup %2285  ;;  %v1036_v23 = vmul.f32 %v3364_v17, %v1035_v20  ;;  %v237_v34 = vmul.f32 %v109_v6, %v109_v6  ;;  %v236_v62 = vmul.f32 %v108_v35, %v108_v35  ;;  %vm1040_vm7 = vweird.f32 %v3203_v57 }
  0xf2   :  { %v1053_v22 = vsel %vm1052_vm3, %v3290_v49, %v1049_v19  ;;  %v1025_v3 = vmul.f32 %v3385_v21, %v3210_v1  ;;  %vm572_vm13 = vcmp.gt.f32.partialorder %v3210_v1, 1.0  ;;  %2293 = vrsqrt.f32 %v3331_v7 }
  0xf3   :  { %v1982_v24 = vsel %vm574_vm10, %v1053_v22, 1.0  ;;  %v3393_v0 = vpop.xlane.xlu2 %374  ;;  %v1037_v28 = vmul.f32 0.5, %v1036_v23  ;;  %vm1041_vm15 = vweird.f32 %v3364_v17  ;;  %2295 = vrsqrt.f32 %v3333_v39 }
  0xf4   :  { %v3395_v31 = vpop.xlane.xlu1 %372  ;;  %2111 = vst.msk [vmem:[%s5323_s1 + $0x130] sm:$0xff] %vm2072_vm0, %v1982_v24  ;;  %v3404_v48 = vpop.eup %2287  ;;  %v1026_v44 = vmul.f32 %v3385_v21, %v1025_v3  ;;  %vm1030_vm1 = vweird.f32 %v3210_v1  ;;  %vm1080_vm4 = vweird.f32 %v3251_v8  ;;  %2297 = vrsqrt.f32 %v3348_v13  ;;  %vm1042_vm11 = vmor %vm1040_vm7, %vm1041_vm15 }
  0xf5   :  { %v3402_v9 = vpop.xlane.xlu0 %370  ;;  %v1038_v12 = vsub.f32 1.5, %v1037_v28  ;;  %v1075_v46 = vmul.f32 %v3404_v48, %v3251_v8  ;;  %v3414_v47 = vpop.eup %2289  ;;  %vm577_vm2 = vcmp.gt.f32.partialorder %v3251_v8, 1.0  ;;  %vm1070_vm5 = vweird.f32 %v3253_v25 }
  0xf6   :  { %v1027_v49 = vmul.f32 0.5, %v1026_v44  ;;  %452 = vadd.xlane.f32.xlu2 %v238_v26  ;;  %v3419_v50 = vpop.eup %2291  ;;  %v1065_v52 = vmul.f32 %v3414_v47, %v3253_v25  ;;  %vm1031_vm6 = vweird.f32 %v3385_v21  ;;  %vm1081_vm8 = vweird.f32 %v3404_v48 }
  0xf7   :  { %v1039_v10 = vmul.f32 %v3364_v17, %v1038_v12  ;;  %v1076_v51 = vmul.f32 %v3404_v48, %v1075_v46  ;;  %450 = vadd.xlane.f32.xlu1 %v237_v34  ;;  %448 = vadd.xlane.f32.xlu0 %v236_v62  ;;  %v1055_v53 = vmul.f32 %v3419_v50, %v3265_v40  ;;  %vm1060_vm14 = vweird.f32 %v3265_v40  ;;  %v116_v46 = vld [vmem:[#allocation2 + $0x2e0] sm:$0xff] }
  0xf8   :  { %v1028_v37 = vsub.f32 1.5, %v1027_v49  ;;  %vm576_vm9 = vcmp.gt.f32.partialorder %v3253_v25, 1.0  ;;  %v1066_v54 = vmul.f32 %v3414_v47, %v1065_v52  ;;  %vm1071_vm3 = vweird.f32 %v3414_v47  ;;  %v3441_v55 = vpop.eup %2293 }
  0xf9   :  { %v1043_v42 = vsel %vm1042_vm11, %v3364_v17, %v1039_v10  ;;  %v1077_v41 = vmul.f32 0.5, %v1076_v51  ;;  %vm1110_vm10 = vweird.f32 %v3331_v7  ;;  %vm575_vm7 = vcmp.gt.f32.partialorder %v3265_v40, 1.0  ;;  %v3452_v29 = vpop.eup %2295  ;;  %v114_v10 = vld [vmem:[#allocation2 + $0x2d0] sm:$0xff] }
  0xfa   :  { %v1981_v38 = vsel %vm573_vm12, %v1043_v42, 1.0  ;;  %v1029_v36 = vmul.f32 %v3385_v21, %v1028_v37  ;;  %v1056_v56 = vmul.f32 %v3419_v50, %v1055_v53  ;;  %v241_v59 = vmul.f32 %v113_v27, %v113_v27  ;;  %vm1032_vm12 = vmor %vm1030_vm1, %vm1031_vm6  ;;  %v3466_v15 = vpop.eup %2297 }
  0xfb   :  { %v3448_v43 = vpop.xlane.xlu2 %380  ;;  %2110 = vst.msk [vmem:[%s5323_s1 + $0x128] sm:$0xff] %vm2072_vm0, %v1981_v38  ;;  %v1078_v57 = vsub.f32 1.5, %v1077_v41  ;;  %v1067_v5 = vmul.f32 0.5, %v1066_v54  ;;  %v1105_v4 = vmul.f32 %v3441_v55, %v3331_v7  ;;  %v240_v11 = vmul.f32 %v112_v58, %v112_v58  ;;  %vm1082_vm1 = vmor %vm1080_vm4, %vm1081_vm8  ;;  %v119_v38 = vld [vmem:[#allocation2 + $0x2f8] sm:$0xff] }
  0xfc   :  { %v3450_v63 = vpop.xlane.xlu1 %378  ;;  %v1033_v45 = vsel %vm1032_vm12, %v3385_v21, %v1029_v36  ;;  %v1057_v2 = vmul.f32 0.5, %v1056_v56  ;;  %vm1061_vm15 = vweird.f32 %v3419_v50  ;;  %v1095_v30 = vmul.f32 %v3452_v29, %v3333_v39  ;;  %v118_v56 = vld [vmem:[#allocation2 + $0x2f0] sm:$0xff] }
  0xfd   :  { %v3464_v14 = vpop.xlane.xlu0 %376  ;;  %v1980_v16 = vsel %vm572_vm13, %v1033_v45, 1.0  ;;  %v1079_v60 = vmul.f32 %v3404_v48, %v1078_v57  ;;  %v1068_v17 = vsub.f32 1.5, %v1067_v5  ;;  %v1106_v33 = vmul.f32 %v3441_v55, %v1105_v4  ;;  %vm1072_vm13 = vmor %vm1070_vm5, %vm1071_vm3 }
  0xfe   :  { %2109 = vst.msk [vmem:[%s5323_s1 + $0x120] sm:$0xff] %vm2072_vm0, %v1980_v16  ;;  %v1058_v18 = vsub.f32 1.5, %v1057_v2  ;;  %vm1111_vm11 = vweird.f32 %v3441_v55  ;;  %v1096_v1 = vmul.f32 %v3452_v29, %v1095_v30  ;;  %v1085_v19 = vmul.f32 %v3466_v15, %v3348_v13  ;;  %458 = vadd.xlane.f32.xlu2 %v241_v59  ;;  %vm1062_vm4 = vmor %vm1060_vm14, %vm1061_vm15  ;;  %v117_v59 = vld [vmem:[#allocation2 + $0x2e8] sm:$0xff] }
  0xff   :  { %v1083_v20 = vsel %vm1082_vm1, %v3404_v48, %v1079_v60  ;;  %v1069_v61 = vmul.f32 %v3414_v47, %v1068_v17  ;;  %v1107_v6 = vmul.f32 0.5, %v1106_v33  ;;  %456 = vadd.xlane.f32.xlu1 %v240_v11  ;;  %v239_v35 = vmul.f32 %v111_v32, %v111_v32  ;;  %vm1112_vm8 = vmor %vm1110_vm10, %vm1111_vm11 }
 0x100   :  { %v1985_v21 = vsel %vm577_vm2, %v1083_v20, 1.0  ;;  %v1059_v22 = vmul.f32 %v3419_v50, %v1058_v18  ;;  %v1097_v23 = vmul.f32 0.5, %v1096_v1  ;;  %v1086_v24 = vmul.f32 %v3466_v15, %v1085_v19 }
 0x101   :  { %2114 = vst.msk [vmem:[%s5323_s1 + $0x148] sm:$0xff] %vm2072_vm0, %v1985_v21  ;;  %v1073_v3 = vsel %vm1072_vm13, %v3414_v47, %v1069_v61  ;;  %v1108_v8 = vsub.f32 1.5, %v1107_v6  ;;  %vm1101_vm2 = vweird.f32 %v3452_v29  ;;  %454 = vadd.xlane.f32.xlu0 %v239_v35  ;;  %2299 = vrsqrt.f32 %v3393_v0 }
 0x102   :  { %v1984_v26 = vsel %vm576_vm9, %v1073_v3, 1.0  ;;  %v1063_v28 = vsel %vm1062_vm4, %v3419_v50, %v1059_v22  ;;  %v1098_v34 = vsub.f32 1.5, %v1097_v23  ;;  %v1087_v62 = vmul.f32 0.5, %v1086_v24  ;;  %v115_v50 = vld [vmem:[#allocation2 + $0x2d8] sm:$0xff] }
 0x103   :  { %v3512_v48 = vpop.xlane.xlu2 %386  ;;  %2113 = vst.msk [vmem:[%s5323_s1 + $0x140] sm:$0xff] %vm2072_vm0, %v1984_v26  ;;  %v1983_v12 = vsel %vm575_vm7, %v1063_v28, 1.0  ;;  %vm580_vm5 = vcmp.gt.f32.partialorder %v3331_v7, 1.0  ;;  %v1109_v25 = vmul.f32 %v3441_v55, %v1108_v8  ;;  %vm1100_vm6 = vweird.f32 %v3333_v39 }
 0x104   :  { %v3514_v44 = vpop.xlane.xlu1 %384  ;;  %2112 = vst.msk [vmem:[%s5323_s1 + $0x138] sm:$0xff] %vm2072_vm0, %v1983_v12  ;;  %v1099_v40 = vmul.f32 %v3452_v29, %v1098_v34  ;;  %v1088_v49 = vsub.f32 1.5, %v1087_v62  ;;  %vm1091_vm14 = vweird.f32 %v3466_v15  ;;  %2301 = vrsqrt.f32 %v3395_v31  ;;  %vm1102_vm3 = vmor %vm1100_vm6, %vm1101_vm2 }
 0x105   :  { %v3525_v47 = vpop.xlane.xlu0 %382  ;;  %v1113_v51 = vsel %vm1112_vm8, %v3441_v55, %v1109_v25  ;;  %vm579_vm9 = vcmp.gt.f32.partialorder %v3333_v39, 1.0  ;;  %vm1090_vm7 = vweird.f32 %v3348_v13  ;;  %2303 = vrsqrt.f32 %v3402_v9 }
 0x106   :  { %v1988_v52 = vsel %vm580_vm5, %v1113_v51, 1.0  ;;  %v1103_v27 = vsel %vm1102_vm3, %v3452_v29, %v1099_v40  ;;  %v1089_v37 = vmul.f32 %v3466_v15, %v1088_v49  ;;  %v244_v53 = vmul.f32 %v116_v46, %v116_v46  ;;  %vm1092_vm10 = vmor %vm1090_vm7, %vm1091_vm14 }
 0x107   :  { %v3548_v58 = vpop.eup %2299  ;;  %2117 = vst.msk [vmem:[%s5323_s1 + $0x160] sm:$0xff] %vm2072_vm0, %v1988_v52  ;;  %v1987_v39 = vsel %vm579_vm9, %v1103_v27, 1.0  ;;  %v243_v42 = vmul.f32 %v115_v50, %v115_v50  ;;  %v242_v41 = vmul.f32 %v114_v10, %v114_v10  ;;  %vm578_vm12 = vcmp.gt.f32.partialorder %v3348_v13, 1.0 }
 0x108   :  { %2116 = vst.msk [vmem:[%s5323_s1 + $0x158] sm:$0xff] %vm2072_vm0, %v1987_v39  ;;  %v1093_v7 = vsel %vm1092_vm10, %v3466_v15, %v1089_v37  ;;  %v1135_v54 = vmul.f32 %v3548_v58, %v3393_v0  ;;  %464 = vadd.xlane.f32.xlu2 %v244_v53  ;;  %2305 = vrsqrt.f32 %v3448_v43  ;;  %vm583_vm15 = vcmp.gt.f32.partialorder %v3393_v0, 1.0 }
 0x109   :  { %v1986_v55 = vsel %vm578_vm12, %v1093_v7, 1.0  ;;  %462 = vadd.xlane.f32.xlu1 %v243_v42  ;;  %460 = vadd.xlane.f32.xlu0 %v242_v41  ;;  %2307 = vrsqrt.f32 %v3450_v63  ;;  %vm1140_vm1 = vweird.f32 %v3393_v0  ;;  %vm1130_vm11 = vweird.f32 %v3395_v31 }
 0x10a   :  { %v3566_v36 = vpop.eup %2301  ;;  %2115 = vst.msk [vmem:[%s5323_s1 + $0x150] sm:$0xff] %vm2072_vm0, %v1986_v55  ;;  %v1136_v13 = vmul.f32 %v3548_v58, %v1135_v54  ;;  %2309 = vrsqrt.f32 %v3464_v14  ;;  %v247_v15 = vmul.f32 %v119_v38, %v119_v38  ;;  %vm582_vm13 = vcmp.gt.f32.partialorder %v3395_v31, 1.0  ;;  %v122_v55 = vld [vmem:[#allocation2 + $0x310] sm:$0xff] }
 0x10b   :  { %v3574_v29 = vpop.eup %2303  ;;  %v1125_v57 = vmul.f32 %v3566_v36, %v3395_v31  ;;  %v3580_v5 = vpop.xlane.xlu2 %392  ;;  %v246_v32 = vmul.f32 %v118_v56, %v118_v56  ;;  %v245_v16 = vmul.f32 %v117_v59, %v117_v59  ;;  %2311 = vrsqrt.f32 %v3512_v48 }
 0x10c   :  { %v1137_v4 = vmul.f32 0.5, %v1136_v13  ;;  %v1115_v11 = vmul.f32 %v3574_v29, %v3402_v9  ;;  %v3585_v45 = vpop.xlane.xlu1 %390  ;;  %vm1141_vm4 = vweird.f32 %v3548_v58  ;;  %vm581_vm2 = vcmp.gt.f32.partialorder %v3402_v9, 1.0 }
 0x10d   :  { %v3587_v2 = vpop.xlane.xlu0 %388  ;;  %v1126_v30 = vmul.f32 %v3566_v36, %v1125_v57  ;;  %vm1120_vm5 = vweird.f32 %v3402_v9  ;;  %vm1170_vm6 = vweird.f32 %v3448_v43  ;;  %2313 = vrsqrt.f32 %v3514_v44  ;;  %vm3615_vm9 = vmor %vm1140_vm1, %vm1141_vm4 }
 0x10e   :  { %v3592_v60 = vpop.eup %2305  ;;  %v1138_v17 = vsub.f32 1.5, %v1137_v4  ;;  %v1116_v33 = vmul.f32 %v3574_v29, %v1115_v11  ;;  %vm1131_vm8 = vweird.f32 %v3566_v36  ;;  %vm1160_vm14 = vweird.f32 %v3450_v63 }
 0x10f   :  { %v3598_v18 = vpop.eup %2307  ;;  %v1127_v1 = vmul.f32 0.5, %v1126_v30  ;;  %v1165_v19 = vmul.f32 %v3592_v60, %v3448_v43  ;;  %vm1121_vm3 = vweird.f32 %v3574_v29  ;;  %vm586_vm7 = vcmp.gt.f32.partialorder %v3448_v43, 1.0 }
 0x110   :  { %v3604_v20 = vpop.eup %2309  ;;  %v1139_v61 = vmul.f32 %v3548_v58, %v1138_v17  ;;  %v1117_v6 = vmul.f32 0.5, %v1116_v33  ;;  %v1155_v35 = vmul.f32 %v3598_v18, %v3450_v63  ;;  %470 = vadd.xlane.f32.xlu2 %v247_v15  ;;  %vm1150_vm10 = vweird.f32 %v3464_v14  ;;  %vm1122_vm4 = vmor %vm1120_vm5, %vm1121_vm3 }
 0x111   :  { %v1128_v22 = vsub.f32 1.5, %v1127_v1  ;;  %v1166_v23 = vmul.f32 %v3592_v60, %v1165_v19  ;;  %v1145_v24 = vmul.f32 %v3604_v20, %v3464_v14  ;;  %468 = vadd.xlane.f32.xlu1 %v246_v32  ;;  %466 = vadd.xlane.f32.xlu0 %v245_v16  ;;  %vm1171_vm12 = vweird.f32 %v3592_v60  ;;  %v3631_v28 = vpop.eup %2311  ;;  %v124_v19 = vld [vmem:[#allocation2 + $0x320] sm:$0xff] }
 0x112   :  { %v1143_v3 = vsel %vm3615_vm9, %v3548_v58, %v1139_v61  ;;  %v1118_v8 = vsub.f32 1.5, %v1117_v6  ;;  %vm585_vm1 = vcmp.gt.f32.partialorder %v3450_v63, 1.0  ;;  %v1156_v26 = vmul.f32 %v3598_v18, %v1155_v35  ;;  %vm1132_vm9 = vmor %vm1130_vm11, %vm1131_vm8  ;;  %v123_v35 = vld [vmem:[#allocation2 + $0x318] sm:$0xff] }
 0x113   :  { %v1991_v34 = vsel %vm583_vm15, %v1143_v3, 1.0  ;;  %v1129_v62 = vmul.f32 %v3566_v36, %v1128_v22  ;;  %v1167_v12 = vmul.f32 0.5, %v1166_v23  ;;  %v1146_v25 = vmul.f32 %v3604_v20, %v1145_v24  ;;  %v3650_v49 = vpop.eup %2313  ;;  %v3658_v52 = vpop.xlane.xlu2 %398 }
 0x114   :  { %2120 = vst.msk [vmem:[%s5323_s1 + $0x178] sm:$0xff] %vm2072_vm0, %v1991_v34  ;;  %v1119_v0 = vmul.f32 %v3574_v29, %v1118_v8  ;;  %v1157_v46 = vmul.f32 0.5, %v1156_v26  ;;  %vm1161_vm15 = vweird.f32 %v3598_v18  ;;  %v1195_v40 = vmul.f32 %v3631_v28, %v3512_v48  ;;  %v3664_v39 = vpop.xlane.xlu1 %396 }
 0x115   :  { %v1133_v50 = vsel %vm1132_vm9, %v3566_v36, %v1129_v62  ;;  %v1168_v10 = vsub.f32 1.5, %v1167_v12  ;;  %v1147_v51 = vmul.f32 0.5, %v1146_v25  ;;  %vm1151_vm11 = vweird.f32 %v3604_v20  ;;  %v3666_v42 = vpop.xlane.xlu0 %394  ;;  %v121_v36 = vld [vmem:[#allocation2 + $0x308] sm:$0xff]  ;;  %vm1162_vm5 = vmor %vm1160_vm14, %vm1161_vm15 }
 0x116   :  { %v1990_v27 = vsel %vm582_vm13, %v1133_v50, 1.0  ;;  %v1123_v37 = vsel %vm1122_vm4, %v3574_v29, %v1119_v0  ;;  %v1158_v53 = vsub.f32 1.5, %v1157_v46  ;;  %v1196_v58 = vmul.f32 %v3631_v28, %v1195_v40  ;;  %vm1172_vm13 = vmor %vm1170_vm6, %vm1171_vm12  ;;  %v120_v29 = vld [vmem:[#allocation2 + $0x300] sm:$0xff]  ;;  %v127_v40 = vld [vmem:[#allocation2 + $0x338] sm:$0xff] }
 0x117   :  { %2119 = vst.msk [vmem:[%s5323_s1 + $0x170] sm:$0xff] %vm2072_vm0, %v1990_v27  ;;  %v1989_v41 = vsel %vm581_vm2, %v1123_v37, 1.0  ;;  %v1169_v31 = vmul.f32 %v3592_v60, %v1168_v10  ;;  %v1148_v7 = vsub.f32 1.5, %v1147_v51  ;;  %v1185_v54 = vmul.f32 %v3650_v49, %v3514_v44  ;;  %vm1152_vm6 = vmor %vm1150_vm10, %vm1151_vm11  ;;  %v128_v46 = vld [vmem:[#allocation2 + $0x340] sm:$0xff]  ;;  %v126_v37 = vld [vmem:[#allocation2 + $0x330] sm:$0xff] }
 0x118   :  { %2118 = vst.msk [vmem:[%s5323_s1 + $0x168] sm:$0xff] %vm2072_vm0, %v1989_v41  ;;  %v1159_v9 = vmul.f32 %v3598_v18, %v1158_v53  ;;  %v1197_v38 = vmul.f32 0.5, %v1196_v58  ;;  %vm1200_vm2 = vweird.f32 %v3512_v48  ;;  %2315 = vrsqrt.f32 %v3525_v47 }
 0x119   :  { %v1173_v13 = vsel %vm1172_vm13, %v3592_v60, %v1169_v31  ;;  %v1149_v56 = vmul.f32 %v3604_v20, %v1148_v7  ;;  %vm1201_vm8 = vweird.f32 %v3631_v28  ;;  %v1186_v59 = vmul.f32 %v3650_v49, %v1185_v54 }
 0x11a   :  { %v1994_v57 = vsel %vm586_vm7, %v1173_v13, 1.0  ;;  %v1163_v4 = vsel %vm1162_vm5, %v3598_v18, %v1159_v9  ;;  %v1198_v11 = vsub.f32 1.5, %v1197_v38  ;;  %v250_v15 = vmul.f32 %v122_v55, %v122_v55  ;;  %vm1202_vm3 = vmor %vm1200_vm2, %vm1201_vm8 }
 0x11b   :  { %2123 = vst.msk [vmem:[%s5323_s1 + $0x190] sm:$0xff] %vm2072_vm0, %v1994_v57  ;;  %v1993_v30 = vsel %vm585_vm1, %v1163_v4, 1.0  ;;  %v1153_v43 = vsel %vm1152_vm6, %v3604_v20, %v1149_v56  ;;  %v1187_v32 = vmul.f32 0.5, %v1186_v59  ;;  %v249_v16 = vmul.f32 %v121_v36, %v121_v36  ;;  %v3736_v21 = vpop.xlane.xlu2 %404 }
 0x11c   :  { %2122 = vst.msk [vmem:[%s5323_s1 + $0x188] sm:$0xff] %vm2072_vm0, %v1993_v30  ;;  %vm5336_vm14 = vcmp.gt.f32.partialorder %v3464_v14, 1.0  ;;  %v1199_v17 = vmul.f32 %v3631_v28, %v1198_v11  ;;  %476 = vadd.xlane.f32.xlu2 %v250_v15  ;;  %v248_v33 = vmul.f32 %v120_v29, %v120_v29  ;;  %vm1191_vm7 = vweird.f32 %v3650_v49  ;;  %v125_v14 = vld [vmem:[#allocation2 + $0x328] sm:$0xff]  ;;  %v3745_v22 = vpop.xlane.xlu1 %402 }
 0x11d   :  { %v1992_v60 = vsel %vm5336_vm14, %v1153_v43, 1.0  ;;  %v1188_v63 = vsub.f32 1.5, %v1187_v32  ;;  %474 = vadd.xlane.f32.xlu1 %v249_v16  ;;  %2317 = vrsqrt.f32 %v3580_v5  ;;  %vm589_vm10 = vcmp.gt.f32.partialorder %v3512_v48, 1.0 }
 0x11e   :  { %2121 = vst.msk [vmem:[%s5323_s1 + $0x180] sm:$0xff] %vm2072_vm0, %v1992_v60  ;;  %v3727_v18 = vpop.eup %2315  ;;  %v1203_v1 = vsel %vm1202_vm3, %v3631_v28, %v1199_v17  ;;  %472 = vadd.xlane.f32.xlu0 %v248_v33  ;;  %2319 = vrsqrt.f32 %v3585_v45  ;;  %vm1190_vm12 = vweird.f32 %v3514_v44  ;;  %v253_v48 = vmul.f32 %v125_v14, %v125_v14 }
 0x11f   :  { %v1997_v20 = vsel %vm589_vm10, %v1203_v1, 1.0  ;;  %v1189_v61 = vmul.f32 %v3650_v49, %v1188_v63  ;;  %v1175_v6 = vmul.f32 %v3727_v18, %v3525_v47  ;;  %vm1192_vm1 = vmor %vm1190_vm12, %vm1191_vm7  ;;  %2321 = vrsqrt.f32 %v3587_v2  ;;  %v3747_v23 = vpop.xlane.xlu0 %400 }
 0x120   :  { %2126 = vst.msk [vmem:[%s5323_s1 + $0x1a8] sm:$0xff] %vm2072_vm0, %v1997_v20  ;;  %vm588_vm4 = vcmp.gt.f32.partialorder %v3514_v44, 1.0  ;;  %v252_v8 = vmul.f32 %v124_v19, %v124_v19  ;;  %v251_v28 = vmul.f32 %v123_v35, %v123_v35  ;;  %2323 = vrsqrt.f32 %v3658_v52 }
 0x121   :  { %v1193_v24 = vsel %vm1192_vm1, %v3650_v49, %v1189_v61  ;;  %v1176_v3 = vmul.f32 %v3727_v18, %v1175_v6  ;;  %2325 = vrsqrt.f32 %v3664_v39  ;;  %vm587_vm9 = vcmp.gt.f32.partialorder %v3525_v47, 1.0 }
 0x122   :  { %v1996_v26 = vsel %vm588_vm4, %v1193_v24, 1.0  ;;  %2327 = vrsqrt.f32 %v3666_v42  ;;  %vm1180_vm15 = vweird.f32 %v3525_v47  ;;  %vm1181_vm11 = vweird.f32 %v3727_v18 }
 0x123   :  { %v3753_v34 = vpop.eup %2317  ;;  %2125 = vst.msk [vmem:[%s5323_s1 + $0x1a0] sm:$0xff] %vm2072_vm0, %v1996_v26  ;;  %v1177_v62 = vmul.f32 0.5, %v1176_v3  ;;  %vm592_vm13 = vcmp.gt.f32.partialorder %v3580_v5, 1.0  ;;  %vm1230_vm2 = vweird.f32 %v3580_v5  ;;  %vm1220_vm8 = vweird.f32 %v3585_v45  ;;  %vm1182_vm10 = vmor %vm1180_vm15, %vm1181_vm11  ;;  %v131_v3 = vld [vmem:[#allocation2 + $0x358] sm:$0xff] }
 0x124   :  { %v3760_v44 = vpop.eup %2319  ;;  %v1225_v12 = vmul.f32 %v3753_v34, %v3580_v5  ;;  %482 = vadd.xlane.f32.xlu2 %v253_v48  ;;  %vm1231_vm5 = vweird.f32 %v3753_v34  ;;  %vm591_vm6 = vcmp.gt.f32.partialorder %v3585_v45, 1.0  ;;  %vm1210_vm3 = vweird.f32 %v3587_v2 }
 0x125   :  { %v1178_v25 = vsub.f32 1.5, %v1177_v62  ;;  %v1215_v0 = vmul.f32 %v3760_v44, %v3585_v45  ;;  %480 = vadd.xlane.f32.xlu1 %v252_v8  ;;  %v3770_v49 = vpop.eup %2321  ;;  %vm1221_vm14 = vweird.f32 %v3760_v44  ;;  %vm1260_vm7 = vweird.f32 %v3658_v52 }
 0x126   :  { %v1226_v50 = vmul.f32 %v3753_v34, %v1225_v12  ;;  %478 = vadd.xlane.f32.xlu0 %v251_v28  ;;  %v1205_v27 = vmul.f32 %v3770_v49, %v3587_v2  ;;  %v3785_v53 = vpop.eup %2323  ;;  %v256_v41 = vmul.f32 %v128_v46, %v128_v46  ;;  %v255_v31 = vmul.f32 %v127_v40, %v127_v40  ;;  %vm1222_vm11 = vmor %vm1220_vm8, %vm1221_vm14 }
 0x127   :  { %v1179_v10 = vmul.f32 %v3727_v18, %v1178_v25  ;;  %v1216_v51 = vmul.f32 %v3760_v44, %v1215_v0  ;;  %2329 = vrsqrt.f32 %v3736_v21  ;;  %v3792_v7 = vpop.eup %2325  ;;  %vm590_vm12 = vcmp.gt.f32.partialorder %v3587_v2, 1.0  ;;  %v129_v0 = vld [vmem:[#allocation2 + $0x348] sm:$0xff] }
 0x128   :  { %v1227_v58 = vmul.f32 0.5, %v1226_v50  ;;  %v1206_v9 = vmul.f32 %v3770_v49, %v1205_v27  ;;  %v1255_v38 = vmul.f32 %v3785_v53, %v3658_v52  ;;  %v3799_v36 = vpop.xlane.xlu2 %410  ;;  %v3801_v13 = vpop.eup %2327  ;;  %v1245_v29 = vmul.f32 %v3792_v7, %v3664_v39 }
 0x129   :  { %v1183_v54 = vsel %vm1182_vm10, %v3727_v18, %v1179_v10  ;;  %v1217_v55 = vmul.f32 0.5, %v1216_v51  ;;  %vm1250_vm1 = vweird.f32 %v3664_v39  ;;  %v254_v57 = vmul.f32 %v126_v37, %v126_v37  ;;  %vm1232_vm10 = vmor %vm1230_vm2, %vm1231_vm5 }
 0x12a   :  { %v1995_v56 = vsel %vm587_vm9, %v1183_v54, 1.0  ;;  %v1228_v59 = vsub.f32 1.5, %v1227_v58  ;;  %v3808_v4 = vpop.xlane.xlu1 %408  ;;  %v3810_v11 = vpop.xlane.xlu0 %406  ;;  %v1207_v30 = vmul.f32 0.5, %v1206_v9  ;;  %vm1211_vm4 = vweird.f32 %v3770_v49  ;;  %v134_v54 = vld [vmem:[#allocation2 + $0x370] sm:$0xff]  ;;  %v133_v9 = vld [vmem:[#allocation2 + $0x368] sm:$0xff] }
 0x12b   :  { %2124 = vst.msk [vmem:[%s5323_s1 + $0x198] sm:$0xff] %vm2072_vm0, %v1995_v56  ;;  %v1218_v15 = vsub.f32 1.5, %v1217_v55  ;;  %v1256_v47 = vmul.f32 %v3785_v53, %v1255_v38  ;;  %vm1261_vm15 = vweird.f32 %v3785_v53  ;;  %v1246_v32 = vmul.f32 %v3792_v7, %v1245_v29  ;;  %vm1212_vm2 = vmor %vm1210_vm3, %vm1211_vm4 }
 0x12c   :  { %v1229_v43 = vmul.f32 %v3753_v34, %v1228_v59  ;;  %v1235_v16 = vmul.f32 %v3801_v13, %v3666_v42  ;;  %488 = vadd.xlane.f32.xlu2 %v256_v41  ;;  %v1208_v17 = vsub.f32 1.5, %v1207_v30  ;;  %2331 = vrsqrt.f32 %v3745_v22  ;;  %vm1262_vm8 = vmor %vm1260_vm7, %vm1261_vm15 }
 0x12d   :  { %v1219_v60 = vmul.f32 %v3760_v44, %v1218_v15  ;;  %v1257_v33 = vmul.f32 0.5, %v1256_v47  ;;  %486 = vadd.xlane.f32.xlu1 %v255_v31  ;;  %v3831_v63 = vpop.eup %2329  ;;  %v1247_v18 = vmul.f32 0.5, %v1246_v32  ;;  %vm1251_vm9 = vweird.f32 %v3792_v7 }
 0x12e   :  { %v1233_v14 = vsel %vm1232_vm10, %v3753_v34, %v1229_v43  ;;  %v1236_v1 = vmul.f32 %v3801_v13, %v1235_v16  ;;  %484 = vadd.xlane.f32.xlu0 %v254_v57  ;;  %v1209_v61 = vmul.f32 %v3770_v49, %v1208_v17  ;;  %v1285_v24 = vmul.f32 %v3831_v63, %v3736_v21  ;;  %v138_v17 = vld [vmem:[#allocation2 + $0x390] sm:$0xff] }
 0x12f   :  { %v2000_v19 = vsel %vm592_vm13, %v1233_v14, 1.0  ;;  %v1223_v20 = vsel %vm1222_vm11, %v3760_v44, %v1219_v60  ;;  %v1258_v6 = vsub.f32 1.5, %v1257_v33  ;;  %v1248_v5 = vsub.f32 1.5, %v1247_v18  ;;  %v130_v44 = vld [vmem:[#allocation2 + $0x350] sm:$0xff]  ;;  %v137_v14 = vld [vmem:[#allocation2 + $0x388] sm:$0xff] }
 0x130   :  { %2129 = vst.msk [vmem:[%s5323_s1 + $0x1c0] sm:$0xff] %vm2072_vm0, %v2000_v19  ;;  %v1999_v35 = vsel %vm591_vm6, %v1223_v20, 1.0  ;;  %v1237_v48 = vmul.f32 0.5, %v1236_v1  ;;  %v1213_v8 = vsel %vm1212_vm2, %v3770_v49, %v1209_v61  ;;  %vm593_vm13 = vcmp.gt.f32.partialorder %v3666_v42, 1.0  ;;  %vm1252_vm6 = vmor %vm1250_vm1, %vm1251_vm9 }
 0x131   :  { %2128 = vst.msk [vmem:[%s5323_s1 + $0x1b8] sm:$0xff] %vm2072_vm0, %v1999_v35  ;;  %v1259_v45 = vmul.f32 %v3785_v53, %v1258_v6  ;;  %vm1241_vm5 = vweird.f32 %v3801_v13  ;;  %v1998_v26 = vsel %vm590_vm12, %v1213_v8, 1.0  ;;  %v1249_v28 = vmul.f32 %v3792_v7, %v1248_v5 }
 0x132   :  { %v1238_v34 = vsub.f32 1.5, %v1237_v48  ;;  %v1286_v62 = vmul.f32 %v3831_v63, %v1285_v24  ;;  %v3872_v12 = vpop.eup %2331  ;;  %2127 = vst.msk [vmem:[%s5323_s1 + $0x1b0] sm:$0xff] %vm2072_vm0, %v1998_v26  ;;  %vm1240_vm14 = vweird.f32 %v3666_v42  ;;  %2333 = vrsqrt.f32 %v3747_v23  ;;  %v3885_v46 = vpop.xlane.xlu2 %416  ;;  %v136_v24 = vld [vmem:[#allocation2 + $0x380] sm:$0xff] }
 0x133   :  { %v1263_v2 = vsel %vm1262_vm8, %v3785_v53, %v1259_v45  ;;  %v259_v25 = vmul.f32 %v131_v3, %v131_v3  ;;  %vm5337_vm3 = vcmp.gt.f32.partialorder %v3658_v52, 1.0  ;;  %v1253_v49 = vsel %vm1252_vm6, %v3792_v7, %v1249_v28  ;;  %v3891_v51 = vpop.xlane.xlu1 %414  ;;  %vm1242_vm12 = vmor %vm1240_vm14, %vm1241_vm5  ;;  %v135_v3 = vld [vmem:[#allocation2 + $0x378] sm:$0xff] }
 0x134   :  { %v2003_v40 = vsel %vm5337_vm3, %v1263_v2, 1.0  ;;  %v1239_v50 = vmul.f32 %v3801_v13, %v1238_v34  ;;  %v1287_v10 = vmul.f32 0.5, %v1286_v62  ;;  %v3893_v27 = vpop.xlane.xlu0 %412  ;;  %vm5338_vm7 = vcmp.gt.f32.partialorder %v3664_v39, 1.0 }
 0x135   :  { %2132 = vst.msk [vmem:[%s5323_s1 + $0x1d8] sm:$0xff] %vm2072_vm0, %v2003_v40  ;;  %v2002_v37 = vsel %vm5338_vm7, %v1253_v49, 1.0  ;;  %vm1290_vm1 = vweird.f32 %v3736_v21  ;;  %v1275_v52 = vmul.f32 %v3872_v12, %v3745_v22  ;;  %494 = vadd.xlane.f32.xlu2 %v259_v25  ;;  %v258_v53 = vmul.f32 %v130_v44, %v130_v44 }
 0x136   :  { %2131 = vst.msk [vmem:[%s5323_s1 + $0x1d0] sm:$0xff] %vm2072_vm0, %v2002_v37  ;;  %v1243_v58 = vsel %vm1242_vm12, %v3801_v13, %v1239_v50  ;;  %v1288_v41 = vsub.f32 1.5, %v1287_v10  ;;  %vm1291_vm4 = vweird.f32 %v3831_v63  ;;  %v257_v39 = vmul.f32 %v129_v0, %v129_v0  ;;  %v132_v13 = vld [vmem:[#allocation2 + $0x360] sm:$0xff] }
 0x137   :  { %v2001_v31 = vsel %vm593_vm13, %v1243_v58, 1.0  ;;  %v1276_v7 = vmul.f32 %v3872_v12, %v1275_v52  ;;  %492 = vadd.xlane.f32.xlu1 %v258_v53  ;;  %2335 = vrsqrt.f32 %v3799_v36  ;;  %vm1292_vm9 = vmor %vm1290_vm1, %vm1291_vm4  ;;  %vm598_vm15 = vcmp.gt.f32.partialorder %v3736_v21, 1.0 }
 0x138   :  { %2130 = vst.msk [vmem:[%s5323_s1 + $0x1c8] sm:$0xff] %vm2072_vm0, %v2001_v31  ;;  %v1289_v55 = vmul.f32 %v3831_v63, %v1288_v41  ;;  %490 = vadd.xlane.f32.xlu0 %v257_v39  ;;  %2337 = vrsqrt.f32 %v3808_v4  ;;  %v3922_v38 = vpop.eup %2333  ;;  %v262_v29 = vmul.f32 %v134_v54, %v134_v54  ;;  %vm1281_vm11 = vweird.f32 %v3872_v12 }
 0x139   :  { %v1277_v42 = vmul.f32 0.5, %v1276_v7  ;;  %2339 = vrsqrt.f32 %v3810_v11  ;;  %v1265_v59 = vmul.f32 %v3922_v38, %v3747_v23  ;;  %v261_v30 = vmul.f32 %v133_v9, %v133_v9 }
 0x13a   :  { %v1293_v56 = vsel %vm1292_vm9, %v3831_v63, %v1289_v55  ;;  %vm597_vm10 = vcmp.gt.f32.partialorder %v3745_v22, 1.0  ;;  %v260_v47 = vmul.f32 %v132_v13, %v132_v13  ;;  %2341 = vrsqrt.f32 %v3885_v46  ;;  %v3939_v43 = vpop.xlane.xlu2 %422 }
 0x13b   :  { %v2006_v57 = vsel %vm598_vm15, %v1293_v56, 1.0  ;;  %v1278_v15 = vsub.f32 1.5, %v1277_v42  ;;  %v1266_v21 = vmul.f32 %v3922_v38, %v1265_v59  ;;  %vm1280_vm2 = vweird.f32 %v3745_v22  ;;  %v3959_v18 = vpop.xlane.xlu1 %420 }
 0x13c   :  { %2135 = vst.msk [vmem:[%s5323_s1 + $0x1f0] sm:$0xff] %vm2072_vm0, %v2006_v57  ;;  %vm596_vm13 = vcmp.gt.f32.partialorder %v3747_v23, 1.0  ;;  %2343 = vrsqrt.f32 %v3891_v51  ;;  %vm3951_vm5 = vmor %vm1280_vm2, %vm1281_vm11  ;;  %vm1270_vm8 = vweird.f32 %v3747_v23  ;;  %vm1320_vm6 = vweird.f32 %v3799_v36  ;;  %v3961_v1 = vpop.xlane.xlu0 %418 }
 0x13d   :  { %v3941_v32 = vpop.eup %2335  ;;  %v1279_v16 = vmul.f32 %v3872_v12, %v1278_v15  ;;  %500 = vadd.xlane.f32.xlu2 %v262_v29  ;;  %v1267_v33 = vmul.f32 0.5, %v1266_v21  ;;  %vm1271_vm14 = vweird.f32 %v3922_v38  ;;  %vm1310_vm3 = vweird.f32 %v3808_v4 }
 0x13e   :  { %v3947_v60 = vpop.eup %2337  ;;  %v1315_v63 = vmul.f32 %v3941_v32, %v3799_v36  ;;  %2345 = vrsqrt.f32 %v3893_v27  ;;  %vm601_vm7 = vcmp.gt.f32.partialorder %v3799_v36, 1.0  ;;  %vm1300_vm12 = vweird.f32 %v3810_v11 }
 0x13f   :  { %v3963_v19 = vpop.eup %2339  ;;  %v1283_v20 = vsel %vm3951_vm5, %v3872_v12, %v1279_v16  ;;  %v1305_v61 = vmul.f32 %v3947_v60, %v3808_v4  ;;  %498 = vadd.xlane.f32.xlu1 %v261_v30  ;;  %v1268_v35 = vsub.f32 1.5, %v1267_v33  ;;  %vm1321_vm1 = vweird.f32 %v3941_v32 }
 0x140   :  { %v2005_v6 = vsel %vm597_vm10, %v1283_v20, 1.0  ;;  %v1316_v5 = vmul.f32 %v3941_v32, %v1315_v63  ;;  %v1295_v48 = vmul.f32 %v3963_v19, %v3810_v11  ;;  %496 = vadd.xlane.f32.xlu0 %v260_v47  ;;  %vm600_vm4 = vcmp.gt.f32.partialorder %v3808_v4, 1.0  ;;  %v3988_v45 = vpop.eup %2341  ;;  %vm1272_vm10 = vmor %vm1270_vm8, %vm1271_vm14  ;;  %v140_v4 = vld [vmem:[#allocation2 + $0x3a0] sm:$0xff] }
 0x141   :  { %2134 = vst.msk [vmem:[%s5323_s1 + $0x1e8] sm:$0xff] %vm2072_vm0, %v2005_v6  ;;  %v1306_v22 = vmul.f32 %v3947_v60, %v1305_v61  ;;  %vm1350_vm9 = vweird.f32 %v3885_v46  ;;  %v265_v8 = vmul.f32 %v137_v14, %v137_v14  ;;  %v1269_v26 = vmul.f32 %v3922_v38, %v1268_v35 }
 0x142   :  { %v1317_v28 = vmul.f32 0.5, %v1316_v5  ;;  %vm1311_vm15 = vweird.f32 %v3947_v60  ;;  %vm599_vm11 = vcmp.gt.f32.partialorder %v3810_v11, 1.0  ;;  %v1296_v34 = vmul.f32 %v3963_v19, %v1295_v48  ;;  %v3994_v62 = vpop.eup %2343 }
 0x143   :  { %v1307_v44 = vmul.f32 0.5, %v1306_v22  ;;  %v1345_v12 = vmul.f32 %v3988_v45, %v3885_v46  ;;  %v264_v2 = vmul.f32 %v136_v24, %v136_v24  ;;  %v263_v25 = vmul.f32 %v135_v3, %v135_v3  ;;  %vm1312_vm14 = vmor %vm1310_vm3, %vm1311_vm15 }
 0x144   :  { %v1273_v0 = vsel %vm1272_vm10, %v3922_v38, %v1269_v26  ;;  %v1318_v40 = vsub.f32 1.5, %v1317_v28  ;;  %v1297_v49 = vmul.f32 0.5, %v1296_v34  ;;  %v1335_v50 = vmul.f32 %v3994_v62, %v3891_v51  ;;  %v4005_v10 = vpop.eup %2345  ;;  %v142_v26 = vld [vmem:[#allocation2 + $0x3b0] sm:$0xff]  ;;  %v141_v28 = vld [vmem:[#allocation2 + $0x3a8] sm:$0xff] }
 0x145   :  { %v2004_v37 = vsel %vm596_vm13, %v1273_v0, 1.0  ;;  %v1308_v52 = vsub.f32 1.5, %v1307_v44  ;;  %vm1301_vm2 = vweird.f32 %v3963_v19  ;;  %v1346_v53 = vmul.f32 %v3988_v45, %v1345_v12  ;;  %506 = vadd.xlane.f32.xlu2 %v265_v8  ;;  %vm1322_vm13 = vmor %vm1320_vm6, %vm1321_vm1  ;;  %v143_v8 = vld [vmem:[#allocation2 + $0x3b8] sm:$0xff] }
 0x146   :  { %2133 = vst.msk [vmem:[%s5323_s1 + $0x1e0] sm:$0xff] %vm2072_vm0, %v2004_v37  ;;  %v1319_v58 = vmul.f32 %v3941_v32, %v1318_v40  ;;  %v1298_v41 = vsub.f32 1.5, %v1297_v49  ;;  %v1336_v39 = vmul.f32 %v3994_v62, %v1335_v50  ;;  %v1325_v23 = vmul.f32 %v4005_v10, %v3893_v27  ;;  %v4019_v31 = vpop.xlane.xlu2 %428  ;;  %vm1302_vm6 = vmor %vm1300_vm12, %vm1301_vm2 }
 0x147   :  { %v1309_v7 = vmul.f32 %v3947_v60, %v1308_v52  ;;  %v1347_v54 = vmul.f32 0.5, %v1346_v53  ;;  %vm1351_vm5 = vweird.f32 %v3988_v45  ;;  %vm1341_vm8 = vweird.f32 %v3994_v62  ;;  %504 = vadd.xlane.f32.xlu1 %v264_v2 }
 0x148   :  { %v1323_v55 = vsel %vm1322_vm13, %v3941_v32, %v1319_v58  ;;  %v1299_v9 = vmul.f32 %v3963_v19, %v1298_v41  ;;  %v1337_v38 = vmul.f32 0.5, %v1336_v39  ;;  %v1326_v42 = vmul.f32 %v4005_v10, %v1325_v23  ;;  %502 = vadd.xlane.f32.xlu0 %v263_v25  ;;  %v4035_v13 = vpop.xlane.xlu1 %426  ;;  %v4037_v56 = vpop.xlane.xlu0 %424  ;;  %vm1352_vm12 = vmor %vm1350_vm9, %vm1351_vm5 }
 0x149   :  { %v2009_v59 = vsel %vm601_vm7, %v1323_v55, 1.0  ;;  %v1313_v29 = vsel %vm1312_vm14, %v3947_v60, %v1309_v7  ;;  %v1348_v57 = vsub.f32 1.5, %v1347_v54  ;;  %2347 = vrsqrt.f32 %v3939_v43  ;;  %v139_v60 = vld [vmem:[#allocation2 + $0x398] sm:$0xff] }
 0x14a   :  { %2138 = vst.msk [vmem:[%s5323_s1 + $0x208] sm:$0xff] %vm2072_vm0, %v2009_v59  ;;  %v2008_v15 = vsel %vm600_vm4, %v1313_v29, 1.0  ;;  %v1303_v36 = vsel %vm1302_vm6, %v3963_v19, %v1299_v9  ;;  %v1338_v30 = vsub.f32 1.5, %v1337_v38  ;;  %v1327_v21 = vmul.f32 0.5, %v1326_v42 }
 0x14b   :  { %2137 = vst.msk [vmem:[%s5323_s1 + $0x200] sm:$0xff] %vm2072_vm0, %v2008_v15  ;;  %v2007_v47 = vsel %vm599_vm11, %v1303_v36, 1.0  ;;  %vm604_vm3 = vcmp.gt.f32.partialorder %v3885_v46, 1.0  ;;  %v1349_v32 = vmul.f32 %v3988_v45, %v1348_v57  ;;  %vm1340_vm7 = vweird.f32 %v3891_v51 }
 0x14c   :  { %2136 = vst.msk [vmem:[%s5323_s1 + $0x1f8] sm:$0xff] %vm2072_vm0, %v2007_v47  ;;  %v1339_v11 = vmul.f32 %v3994_v62, %v1338_v30  ;;  %v1328_v16 = vsub.f32 1.5, %v1327_v21  ;;  %vm1331_vm1 = vweird.f32 %v4005_v10  ;;  %2349 = vrsqrt.f32 %v3959_v18  ;;  %vm1342_vm15 = vmor %vm1340_vm7, %vm1341_vm8 }
 0x14d   :  { %v1353_v33 = vsel %vm1352_vm12, %v3988_v45, %v1349_v32  ;;  %vm603_vm4 = vcmp.gt.f32.partialorder %v3891_v51, 1.0  ;;  %vm1330_vm11 = vweird.f32 %v3893_v27  ;;  %2351 = vrsqrt.f32 %v3961_v1 }
 0x14e   :  { %v2012_v63 = vsel %vm604_vm3, %v1353_v33, 1.0  ;;  %v1343_v14 = vsel %vm1342_vm15, %v3994_v62, %v1339_v11  ;;  %v1329_v19 = vmul.f32 %v4005_v10, %v1328_v16  ;;  %v268_v20 = vmul.f32 %v140_v4, %v140_v4  ;;  %v4084_v61 = vpop.xlane.xlu2 %434  ;;  %vm1332_vm9 = vmor %vm1330_vm11, %vm1331_vm1 }
 0x14f   :  { %v4086_v6 = vpop.eup %2347  ;;  %2141 = vst.msk [vmem:[%s5323_s1 + $0x220] sm:$0xff] %vm2072_vm0, %v2012_v63  ;;  %v2011_v51 = vsel %vm603_vm4, %v1343_v14, 1.0  ;;  %v267_v46 = vmul.f32 %v139_v60, %v139_v60  ;;  %v266_v35 = vmul.f32 %v138_v17, %v138_v17  ;;  %vm602_vm10 = vcmp.gt.f32.partialorder %v3893_v27, 1.0 }
 0x150   :  { %2140 = vst.msk [vmem:[%s5323_s1 + $0x218] sm:$0xff] %vm2072_vm0, %v2011_v51  ;;  %v1333_v5 = vsel %vm1332_vm9, %v4005_v10, %v1329_v19  ;;  %v1375_v48 = vmul.f32 %v4086_v6, %v3939_v43  ;;  %512 = vadd.xlane.f32.xlu2 %v268_v20  ;;  %2353 = vrsqrt.f32 %v4019_v31  ;;  %v4103_v24 = vpop.xlane.xlu1 %432  ;;  %v4105_v3 = vpop.xlane.xlu0 %430  ;;  %vm607_vm2 = vcmp.gt.f32.partialorder %v3939_v43, 1.0 }
 0x151   :  { %v2010_v22 = vsel %vm602_vm10, %v1333_v5, 1.0  ;;  %510 = vadd.xlane.f32.xlu1 %v267_v46  ;;  %508 = vadd.xlane.f32.xlu0 %v266_v35  ;;  %2355 = vrsqrt.f32 %v4035_v13  ;;  %vm1380_vm13 = vweird.f32 %v3939_v43  ;;  %vm1370_vm5 = vweird.f32 %v3959_v18  ;;  %v146_v35 = vld [vmem:[#allocation2 + $0x3d0] sm:$0xff] }
 0x152   :  { %v4108_v45 = vpop.eup %2349  ;;  %2139 = vst.msk [vmem:[%s5323_s1 + $0x210] sm:$0xff] %vm2072_vm0, %v2010_v22  ;;  %v1376_v27 = vmul.f32 %v4086_v6, %v1375_v48  ;;  %2357 = vrsqrt.f32 %v4037_v56  ;;  %v271_v2 = vmul.f32 %v143_v8, %v143_v8  ;;  %vm606_vm8 = vcmp.gt.f32.partialorder %v3959_v18, 1.0  ;;  %v145_v48 = vld [vmem:[#allocation2 + $0x3c8] sm:$0xff] }
 0x153   :  { %v4116_v34 = vpop.eup %2351  ;;  %v1365_v62 = vmul.f32 %v4108_v45, %v3959_v18  ;;  %v270_v0 = vmul.f32 %v142_v26, %v142_v26  ;;  %v269_v40 = vmul.f32 %v141_v28, %v141_v28  ;;  %2359 = vrsqrt.f32 %v4084_v61 }
 0x154   :  { %v1377_v44 = vmul.f32 0.5, %v1376_v27  ;;  %v1355_v12 = vmul.f32 %v4116_v34, %v3961_v1  ;;  %vm1381_vm14 = vweird.f32 %v4086_v6  ;;  %vm605_vm6 = vcmp.gt.f32.partialorder %v3961_v1, 1.0  ;;  %v144_v27 = vld [vmem:[#allocation2 + $0x3c0] sm:$0xff] }
 0x155   :  { %v1366_v25 = vmul.f32 %v4108_v45, %v1365_v62  ;;  %vm1360_vm3 = vweird.f32 %v3961_v1  ;;  %vm1410_vm7 = vweird.f32 %v4019_v31  ;;  %2361 = vrsqrt.f32 %v4103_v24  ;;  %vm4157_vm4 = vmor %vm1380_vm13, %vm1381_vm14 }
 0x156   :  { %v4128_v49 = vpop.eup %2353  ;;  %v1378_v50 = vsub.f32 1.5, %v1377_v44  ;;  %v1356_v10 = vmul.f32 %v4116_v34, %v1355_v12  ;;  %v4140_v58 = vpop.xlane.xlu2 %440  ;;  %vm1371_vm12 = vweird.f32 %v4108_v45  ;;  %vm1400_vm1 = vweird.f32 %v4035_v13 }
 0x157   :  { %v4134_v37 = vpop.eup %2355  ;;  %v1367_v52 = vmul.f32 0.5, %v1366_v25  ;;  %v1405_v53 = vmul.f32 %v4128_v49, %v4019_v31  ;;  %vm1361_vm15 = vweird.f32 %v4116_v34  ;;  %vm610_vm11 = vcmp.gt.f32.partialorder %v4019_v31, 1.0 }
 0x158   :  { %v4142_v41 = vpop.eup %2357  ;;  %v1379_v39 = vmul.f32 %v4086_v6, %v1378_v50  ;;  %v1357_v23 = vmul.f32 0.5, %v1356_v10  ;;  %v1395_v7 = vmul.f32 %v4134_v37, %v4035_v13  ;;  %518 = vadd.xlane.f32.xlu2 %v271_v2  ;;  %v4149_v54 = vpop.xlane.xlu1 %438  ;;  %vm1390_vm9 = vweird.f32 %v4037_v56  ;;  %vm1362_vm14 = vmor %vm1360_vm3, %vm1361_vm15 }
 0x159   :  { %v4151_v55 = vpop.xlane.xlu0 %436  ;;  %v1368_v38 = vsub.f32 1.5, %v1367_v52  ;;  %v1406_v42 = vmul.f32 %v4128_v49, %v1405_v53  ;;  %v1385_v59 = vmul.f32 %v4142_v41, %v4037_v56  ;;  %516 = vadd.xlane.f32.xlu1 %v270_v0  ;;  %514 = vadd.xlane.f32.xlu0 %v269_v40  ;;  %vm1411_vm10 = vweird.f32 %v4128_v49  ;;  %v4173_v36 = vpop.eup %2359  ;;  %v148_v53 = vld [vmem:[#allocation2 + $0x3e0] sm:$0xff] }
 0x15a   :  { %v1383_v29 = vsel %vm4157_vm4, %v4086_v6, %v1379_v39  ;;  %v1358_v57 = vsub.f32 1.5, %v1357_v23  ;;  %vm609_vm13 = vcmp.gt.f32.partialorder %v4035_v13, 1.0  ;;  %v1396_v15 = vmul.f32 %v4134_v37, %v1395_v7  ;;  %vm1372_vm4 = vmor %vm1370_vm5, %vm1371_vm12  ;;  %v147_v7 = vld [vmem:[#allocation2 + $0x3d8] sm:$0xff] }
 0x15b   :  { %v2015_v30 = vsel %vm607_vm2, %v1383_v29, 1.0  ;;  %v1369_v21 = vmul.f32 %v4108_v45, %v1368_v38  ;;  %v1407_v47 = vmul.f32 0.5, %v1406_v42  ;;  %v1386_v32 = vmul.f32 %v4142_v41, %v1385_v59  ;;  %v4192_v16 = vpop.eup %2361 }
 0x15c   :  { %2144 = vst.msk [vmem:[%s5323_s1 + $0x238] sm:$0xff] %vm2072_vm0, %v2015_v30  ;;  %v1359_v43 = vmul.f32 %v4116_v34, %v1358_v57  ;;  %v1397_v4 = vmul.f32 0.5, %v1396_v15  ;;  %vm1401_vm2 = vweird.f32 %v4134_v37  ;;  %v1435_v11 = vmul.f32 %v4173_v36, %v4084_v61 }
 0x15d   :  { %v1373_v60 = vsel %vm1372_vm4, %v4108_v45, %v1369_v21  ;;  %v1408_v17 = vsub.f32 1.5, %v1407_v47  ;;  %v1387_v33 = vmul.f32 0.5, %v1386_v32  ;;  %vm1391_vm5 = vweird.f32 %v4142_v41  ;;  %vm1402_vm3 = vmor %vm1400_vm1, %vm1401_vm2 }
 0x15e   :  { %v2014_v63 = vsel %vm606_vm8, %v1373_v60, 1.0  ;;  %v1363_v14 = vsel %vm1362_vm14, %v4116_v34, %v1359_v43  ;;  %v1398_v19 = vsub.f32 1.5, %v1397_v4  ;;  %v1436_v20 = vmul.f32 %v4173_v36, %v1435_v11  ;;  %vm1412_vm8 = vmor %vm1410_vm7, %vm1411_vm10  ;;  %v151_v4 = vld [vmem:[#allocation2 + $0x3f8] sm:$0xff] }
 0x15f   :  { %2143 = vst.msk [vmem:[%s5323_s1 + $0x230] sm:$0xff] %vm2072_vm0, %v2014_v63  ;;  %v2013_v6 = vsel %vm605_vm6, %v1363_v14, 1.0  ;;  %v1409_v51 = vmul.f32 %v4128_v49, %v1408_v17  ;;  %v1388_v46 = vsub.f32 1.5, %v1387_v33  ;;  %v1425_v18 = vmul.f32 %v4192_v16, %v4103_v24  ;;  %vm1392_vm7 = vmor %vm1390_vm9, %vm1391_vm5  ;;  %v150_v63 = vld [vmem:[#allocation2 + $0x3f0] sm:$0xff] }
 0x160   :  { %2142 = vst.msk [vmem:[%s5323_s1 + $0x228] sm:$0xff] %vm2072_vm0, %v2013_v6  ;;  %v1399_v1 = vmul.f32 %v4134_v37, %v1398_v19  ;;  %v1437_v5 = vmul.f32 0.5, %v1436_v20  ;;  %vm1440_vm6 = vweird.f32 %v4084_v61  ;;  %2363 = vrsqrt.f32 %v4105_v3 }
 0x161   :  { %v1413_v22 = vsel %vm1412_vm8, %v4128_v49, %v1409_v51  ;;  %v1389_v8 = vmul.f32 %v4142_v41, %v1388_v46  ;;  %vm1441_vm12 = vweird.f32 %v4173_v36  ;;  %v1426_v45 = vmul.f32 %v4192_v16, %v1425_v18  ;;  %v4232_v26 = vpop.xlane.xlu2 %446 }
 0x162   :  { %v2018_v28 = vsel %vm610_vm11, %v1413_v22, 1.0  ;;  %v1403_v34 = vsel %vm1402_vm3, %v4134_v37, %v1399_v1  ;;  %v1438_v62 = vsub.f32 1.5, %v1437_v5  ;;  %v274_v44 = vmul.f32 %v146_v35, %v146_v35  ;;  %v4241_v12 = vpop.xlane.xlu1 %444  ;;  %v4243_v2 = vpop.xlane.xlu0 %442  ;;  %vm1442_vm15 = vmor %vm1440_vm6, %vm1441_vm12 }
 0x163   :  { %2147 = vst.msk [vmem:[%s5323_s1 + $0x250] sm:$0xff] %vm2072_vm0, %v2018_v28  ;;  %v2017_v31 = vsel %vm609_vm13, %v1403_v34, 1.0  ;;  %v1393_v25 = vsel %vm1392_vm7, %v4142_v41, %v1389_v8  ;;  %v1427_v0 = vmul.f32 0.5, %v1426_v45  ;;  %v273_v40 = vmul.f32 %v145_v48, %v145_v48 }
 0x164   :  { %2146 = vst.msk [vmem:[%s5323_s1 + $0x248] sm:$0xff] %vm2072_vm0, %v2017_v31  ;;  %vm5343_vm1 = vcmp.gt.f32.partialorder %v4037_v56, 1.0  ;;  %v1439_v50 = vmul.f32 %v4173_v36, %v1438_v62  ;;  %524 = vadd.xlane.f32.xlu2 %v274_v44  ;;  %v272_v10 = vmul.f32 %v144_v27, %v144_v27  ;;  %vm1431_vm11 = vweird.f32 %v4192_v16  ;;  %v149_v56 = vld [vmem:[#allocation2 + $0x3e8] sm:$0xff] }
 0x165   :  { %v2016_v49 = vsel %vm5343_vm1, %v1393_v25, 1.0  ;;  %v1428_v13 = vsub.f32 1.5, %v1427_v0  ;;  %522 = vadd.xlane.f32.xlu1 %v273_v40  ;;  %2365 = vrsqrt.f32 %v4140_v58  ;;  %vm613_vm9 = vcmp.gt.f32.partialorder %v4084_v61, 1.0 }
 0x166   :  { %2145 = vst.msk [vmem:[%s5323_s1 + $0x240] sm:$0xff] %vm2072_vm0, %v2016_v49  ;;  %v4269_v37 = vpop.eup %2363  ;;  %v1443_v52 = vsel %vm1442_vm15, %v4173_v36, %v1439_v50  ;;  %520 = vadd.xlane.f32.xlu0 %v272_v10  ;;  %2367 = vrsqrt.f32 %v4149_v54  ;;  %vm1430_vm10 = vweird.f32 %v4103_v24  ;;  %v277_v61 = vmul.f32 %v149_v56, %v149_v56 }
 0x167   :  { %v2021_v41 = vsel %vm613_vm9, %v1443_v52, 1.0  ;;  %v1429_v39 = vmul.f32 %v4192_v16, %v1428_v13  ;;  %v1415_v23 = vmul.f32 %v4269_v37, %v4105_v3  ;;  %vm1432_vm13 = vmor %vm1430_vm10, %vm1431_vm11  ;;  %2369 = vrsqrt.f32 %v4151_v55 }
 0x168   :  { %2150 = vst.msk [vmem:[%s5323_s1 + $0x268] sm:$0xff] %vm2072_vm0, %v2021_v41  ;;  %vm612_vm14 = vcmp.gt.f32.partialorder %v4103_v24, 1.0  ;;  %v276_v42 = vmul.f32 %v148_v53, %v148_v53  ;;  %v275_v57 = vmul.f32 %v147_v7, %v147_v7  ;;  %2371 = vrsqrt.f32 %v4232_v26 }
 0x169   :  { %v1433_v9 = vsel %vm1432_vm13, %v4192_v16, %v1429_v39  ;;  %v1416_v38 = vmul.f32 %v4269_v37, %v1415_v23  ;;  %v4288_v59 = vpop.xlane.xlu2 %452  ;;  %2373 = vrsqrt.f32 %v4241_v12  ;;  %vm611_vm4 = vcmp.gt.f32.partialorder %v4105_v3, 1.0 }
 0x16a   :  { %v2020_v29 = vsel %vm612_vm14, %v1433_v9, 1.0  ;;  %v4291_v15 = vpop.xlane.xlu1 %450  ;;  %v4293_v36 = vpop.xlane.xlu0 %448  ;;  %2375 = vrsqrt.f32 %v4243_v2  ;;  %vm1420_vm2 = vweird.f32 %v4105_v3  ;;  %vm1421_vm5 = vweird.f32 %v4269_v37 }
 0x16b   :  { %v4295_v30 = vpop.eup %2365  ;;  %2149 = vst.msk [vmem:[%s5323_s1 + $0x260] sm:$0xff] %vm2072_vm0, %v2020_v29  ;;  %v1417_v24 = vmul.f32 0.5, %v1416_v38  ;;  %vm616_vm8 = vcmp.gt.f32.partialorder %v4140_v58, 1.0  ;;  %vm1470_vm6 = vweird.f32 %v4140_v58  ;;  %vm1460_vm3 = vweird.f32 %v4149_v54  ;;  %vm1422_vm11 = vmor %vm1420_vm2, %vm1421_vm5 }
 0x16c   :  { %v4302_v21 = vpop.eup %2367  ;;  %v1465_v47 = vmul.f32 %v4295_v30, %v4140_v58  ;;  %530 = vadd.xlane.f32.xlu2 %v277_v61  ;;  %2377 = vrsqrt.f32 %v4288_v59  ;;  %vm1471_vm12 = vweird.f32 %v4295_v30  ;;  %vm615_vm7 = vcmp.gt.f32.partialorder %v4149_v54, 1.0 }
 0x16d   :  { %v1418_v32 = vsub.f32 1.5, %v1417_v24  ;;  %v1455_v43 = vmul.f32 %v4302_v21, %v4149_v54  ;;  %528 = vadd.xlane.f32.xlu1 %v276_v42  ;;  %v4312_v11 = vpop.eup %2369  ;;  %vm1450_vm1 = vweird.f32 %v4151_v55  ;;  %vm1500_vm15 = vweird.f32 %v4232_v26 }
 0x16e   :  { %v1466_v16 = vmul.f32 %v4295_v30, %v1465_v47  ;;  %526 = vadd.xlane.f32.xlu0 %v275_v57  ;;  %v1445_v33 = vmul.f32 %v4312_v11, %v4151_v55  ;;  %v4327_v14 = vpop.eup %2371  ;;  %vm1461_vm9 = vweird.f32 %v4302_v21  ;;  %v279_v20 = vmul.f32 %v151_v4, %v151_v4 }
 0x16f   :  { %v1419_v60 = vmul.f32 %v4269_v37, %v1418_v32  ;;  %v1456_v17 = vmul.f32 %v4302_v21, %v1455_v43  ;;  %2379 = vrsqrt.f32 %v4291_v15  ;;  %v4335_v6 = vpop.eup %2373  ;;  %vm614_vm10 = vcmp.gt.f32.partialorder %v4151_v55, 1.0 }
 0x170   :  { %v1467_v19 = vmul.f32 0.5, %v1466_v16  ;;  %v1446_v18 = vmul.f32 %v4312_v11, %v1445_v33  ;;  %v1495_v35 = vmul.f32 %v4327_v14, %v4232_v26  ;;  %v4344_v5 = vpop.eup %2375  ;;  %v1485_v8 = vmul.f32 %v4335_v6, %v4241_v12 }
 0x171   :  { %v1423_v51 = vsel %vm1422_vm11, %v4269_v37, %v1419_v60  ;;  %v1457_v46 = vmul.f32 0.5, %v1456_v17  ;;  %v4342_v1 = vpop.xlane.xlu2 %458  ;;  %vm1490_vm13 = vweird.f32 %v4241_v12  ;;  %v278_v45 = vmul.f32 %v150_v63, %v150_v63  ;;  %vm1462_vm11 = vmor %vm1460_vm3, %vm1461_vm9 }
 0x172   :  { %v2019_v48 = vsel %vm611_vm4, %v1423_v51, 1.0  ;;  %v1468_v22 = vsub.f32 1.5, %v1467_v19  ;;  %v4351_v27 = vpop.xlane.xlu1 %456  ;;  %v1447_v34 = vmul.f32 0.5, %v1446_v18  ;;  %vm1451_vm14 = vweird.f32 %v4312_v11  ;;  %v4360_v62 = vpop.eup %2377  ;;  %vm1472_vm4 = vmor %vm1470_vm6, %vm1471_vm12 }
 0x173   :  { %2148 = vst.msk [vmem:[%s5323_s1 + $0x258] sm:$0xff] %vm2072_vm0, %v2019_v48  ;;  %v1458_v28 = vsub.f32 1.5, %v1457_v46  ;;  %v1496_v3 = vmul.f32 %v4327_v14, %v1495_v35  ;;  %vm1501_vm2 = vweird.f32 %v4327_v14  ;;  %vm618_vm5 = vcmp.gt.f32.partialorder %v4241_v12, 1.0  ;;  %vm1452_vm3 = vmor %vm1450_vm1, %vm1451_vm14 }
 0x174   :  { %v1469_v44 = vmul.f32 %v4295_v30, %v1468_v22  ;;  %v1486_v31 = vmul.f32 %v4335_v6, %v1485_v8  ;;  %v1475_v25 = vmul.f32 %v4344_v5, %v4243_v2  ;;  %v4369_v0 = vpop.xlane.xlu0 %454  ;;  %v1448_v49 = vsub.f32 1.5, %v1447_v34  ;;  %vm1502_vm12 = vmor %vm1500_vm15, %vm1501_vm2 }
 0x175   :  { %v1459_v40 = vmul.f32 %v4302_v21, %v1458_v28  ;;  %v1497_v50 = vmul.f32 0.5, %v1496_v3  ;;  %534 = vadd.xlane.f32.xlu1 %v279_v20  ;;  %v1525_v10 = vmul.f32 %v4360_v62, %v4288_v59  ;;  %v4378_v13 = vpop.eup %2379  ;;  %vm1491_vm6 = vweird.f32 %v4335_v6 }
 0x176   :  { %v1473_v56 = vsel %vm1472_vm4, %v4295_v30, %v1469_v44  ;;  %v1487_v37 = vmul.f32 0.5, %v1486_v31  ;;  %v1476_v52 = vmul.f32 %v4344_v5, %v1475_v25  ;;  %532 = vadd.xlane.f32.xlu0 %v278_v45  ;;  %v1449_v39 = vmul.f32 %v4312_v11, %v1448_v49 }
 0x177   :  { %v2024_v53 = vsel %vm616_vm8, %v1473_v56, 1.0  ;;  %v1463_v41 = vsel %vm1462_vm11, %v4302_v21, %v1459_v40  ;;  %v1498_v23 = vsub.f32 1.5, %v1497_v50  ;;  %v1526_v9 = vmul.f32 %v4360_v62, %v1525_v10 }
 0x178   :  { %2153 = vst.msk [vmem:[%s5323_s1 + $0x280] sm:$0xff] %vm2072_vm0, %v2024_v53  ;;  %v2023_v7 = vsel %vm615_vm7, %v1463_v41, 1.0  ;;  %v1488_v58 = vsub.f32 1.5, %v1487_v37  ;;  %v1477_v61 = vmul.f32 0.5, %v1476_v52  ;;  %v1453_v38 = vsel %vm1452_vm3, %v4312_v11, %v1449_v39  ;;  %vm1492_vm7 = vmor %vm1490_vm13, %vm1491_vm6 }
 0x179   :  { %2152 = vst.msk [vmem:[%s5323_s1 + $0x278] sm:$0xff] %vm2072_vm0, %v2023_v7  ;;  %v1499_v42 = vmul.f32 %v4327_v14, %v1498_v23  ;;  %vm1481_vm8 = vweird.f32 %v4344_v5  ;;  %v1515_v54 = vmul.f32 %v4378_v13, %v4291_v15  ;;  %v2022_v29 = vsel %vm614_vm10, %v1453_v38, 1.0 }
 0x17a   :  { %v1489_v57 = vmul.f32 %v4335_v6, %v1488_v58  ;;  %v1478_v30 = vsub.f32 1.5, %v1477_v61  ;;  %v1527_v24 = vmul.f32 0.5, %v1526_v9  ;;  %2151 = vst.msk [vmem:[%s5323_s1 + $0x270] sm:$0xff] %vm2072_vm0, %v2022_v29  ;;  %vm1530_vm1 = vweird.f32 %v4288_v59 }
 0x17b   :  { %v1503_v21 = vsel %vm1502_vm12, %v4327_v14, %v1499_v42  ;;  %vm1531_vm15 = vweird.f32 %v4360_v62  ;;  %v1516_v55 = vmul.f32 %v4378_v13, %v1515_v54  ;;  %v4430_v47 = vpop.xlane.xlu2 %464  ;;  %vm5344_vm9 = vcmp.gt.f32.partialorder %v4232_v26, 1.0 }
 0x17c   :  { %v2027_v32 = vsel %vm5344_vm9, %v1503_v21, 1.0  ;;  %v1493_v43 = vsel %vm1492_vm7, %v4335_v6, %v1489_v57  ;;  %v1479_v4 = vmul.f32 %v4344_v5, %v1478_v30  ;;  %v1528_v11 = vsub.f32 1.5, %v1527_v24  ;;  %v4436_v16 = vpop.xlane.xlu1 %462  ;;  %v4449_v17 = vpop.xlane.xlu0 %460  ;;  %vm1532_vm4 = vmor %vm1530_vm1, %vm1531_vm15 }
 0x17d   :  { %2156 = vst.msk [vmem:[%s5323_s1 + $0x298] sm:$0xff] %vm2072_vm0, %v2027_v32  ;;  %v2026_v60 = vsel %vm618_vm5, %v1493_v43, 1.0  ;;  %vm5345_vm10 = vweird.f32 %v4243_v2  ;;  %v1517_v26 = vmul.f32 0.5, %v1516_v55  ;;  %2381 = vrsqrt.f32 %v4293_v36 }
 0x17e   :  { %vm1482_vm13 = vmor %vm5345_vm10, %vm1481_vm8  ;;  %2155 = vst.msk [vmem:[%s5323_s1 + $0x290] sm:$0xff] %vm2072_vm0, %v2026_v60  ;;  %vm617_vm14 = vcmp.gt.f32.partialorder %v4243_v2, 1.0  ;;  %v1529_v33 = vmul.f32 %v4360_v62, %v1528_v11  ;;  %2383 = vrsqrt.f32 %v4342_v1  ;;  %vm1521_vm2 = vweird.f32 %v4378_v13 }
 0x17f   :  { %v1483_v12 = vsel %vm1482_vm13, %v4344_v5, %v1479_v4  ;;  %v1518_v14 = vsub.f32 1.5, %v1517_v26  ;;  %vm622_vm5 = vcmp.gt.f32.partialorder %v4288_v59, 1.0  ;;  %2385 = vrsqrt.f32 %v4351_v27 }
 0x180   :  { %v2025_v63 = vsel %vm617_vm14, %v1483_v12, 1.0  ;;  %v1533_v2 = vsel %vm1532_vm4, %v4360_v62, %v1529_v33  ;;  %vm1520_vm11 = vweird.f32 %v4291_v15  ;;  %2387 = vrsqrt.f32 %v4369_v0 }
 0x181   :  { %2154 = vst.msk [vmem:[%s5323_s1 + $0x288] sm:$0xff] %vm2072_vm0, %v2025_v63  ;;  %v2030_v19 = vsel %vm622_vm5, %v1533_v2, 1.0  ;;  %v1519_v20 = vmul.f32 %v4378_v13, %v1518_v14  ;;  %vm1522_vm6 = vmor %vm1520_vm11, %vm1521_vm2  ;;  %2389 = vrsqrt.f32 %v4430_v47  ;;  %vm621_vm3 = vcmp.gt.f32.partialorder %v4291_v15, 1.0 }
 0x182   :  { %2159 = vst.msk [vmem:[%s5323_s1 + $0x2b0] sm:$0xff] %vm2072_vm0, %v2030_v19  ;;  %2391 = vrsqrt.f32 %v4436_v16  ;;  %vm620_vm8 = vcmp.gt.f32.partialorder %v4293_v36, 1.0  ;;  %vm1510_vm12 = vweird.f32 %v4293_v36  ;;  %vm1560_vm7 = vweird.f32 %v4342_v1 }
 0x183   :  { %v4479_v59 = vpop.eup %2381  ;;  %v1523_v6 = vsel %vm1522_vm6, %v4378_v13, %v1519_v20  ;;  %v4484_v51 = vpop.xlane.xlu2 %470  ;;  %2393 = vrsqrt.f32 %v4449_v17  ;;  %vm625_vm15 = vcmp.gt.f32.partialorder %v4342_v1, 1.0  ;;  %vm1550_vm10 = vweird.f32 %v4351_v27 }
 0x184   :  { %v4486_v46 = vpop.eup %2383  ;;  %v2029_v18 = vsel %vm621_vm3, %v1523_v6, 1.0  ;;  %v1505_v35 = vmul.f32 %v4479_v59, %v4293_v36  ;;  %v4497_v5 = vpop.xlane.xlu1 %468  ;;  %2395 = vrsqrt.f32 %v4484_v51  ;;  %vm1511_vm1 = vweird.f32 %v4479_v59 }
 0x185   :  { %2158 = vst.msk [vmem:[%s5323_s1 + $0x2a8] sm:$0xff] %vm2072_vm0, %v2029_v18  ;;  %v1555_v15 = vmul.f32 %v4486_v46, %v4342_v1  ;;  %v4499_v48 = vpop.eup %2385  ;;  %vm1561_vm9 = vweird.f32 %v4486_v46  ;;  %v4516_v34 = vpop.xlane.xlu0 %466  ;;  %vm1540_vm4 = vweird.f32 %v4369_v0  ;;  %2397 = vrsqrt.f32 %v4497_v5  ;;  %vm1512_vm13 = vmor %vm1510_vm12, %vm1511_vm1 }
 0x186   :  { %v1506_v22 = vmul.f32 %v4479_v59, %v1505_v35  ;;  %v4506_v8 = vpop.eup %2387  ;;  %v1545_v28 = vmul.f32 %v4499_v48, %v4351_v27  ;;  %vm1551_vm14 = vweird.f32 %v4499_v48  ;;  %vm624_vm2 = vcmp.gt.f32.partialorder %v4351_v27, 1.0  ;;  %vm1562_vm6 = vmor %vm1560_vm7, %vm1561_vm9 }
 0x187   :  { %v1556_v45 = vmul.f32 %v4486_v46, %v1555_v15  ;;  %v4518_v3 = vpop.eup %2389  ;;  %v1535_v44 = vmul.f32 %v4506_v8, %v4369_v0  ;;  %vm1541_vm5 = vweird.f32 %v4506_v8  ;;  %vm627_vm11 = vcmp.gt.f32.partialorder %v4436_v16, 1.0 }
 0x188   :  { %v1507_v62 = vmul.f32 0.5, %v1506_v22  ;;  %v4525_v31 = vpop.eup %2391  ;;  %v1546_v40 = vmul.f32 %v4499_v48, %v1545_v28  ;;  %v1585_v49 = vmul.f32 %v4518_v3, %v4430_v47  ;;  %vm1542_vm12 = vmor %vm1540_vm4, %vm1541_vm5  ;;  %vm5346_vm1 = vweird.f32 %v4518_v3 }
 0x189   :  { %v1557_v25 = vmul.f32 0.5, %v1556_v45  ;;  %v4532_v50 = vpop.eup %2393  ;;  %v1536_v13 = vmul.f32 %v4506_v8, %v1535_v44  ;;  %v1575_v56 = vmul.f32 %v4525_v31, %v4436_v16  ;;  %vm1581_vm3 = vweird.f32 %v4525_v31 }
 0x18a   :  { %v1508_v10 = vsub.f32 1.5, %v1507_v62  ;;  %v1547_v52 = vmul.f32 0.5, %v1546_v40  ;;  %v1586_v53 = vmul.f32 %v4518_v3, %v1585_v49  ;;  %v1565_v41 = vmul.f32 %v4532_v50, %v4449_v17  ;;  %v4544_v39 = vpop.eup %2395 }
 0x18b   :  { %v1558_v37 = vsub.f32 1.5, %v1557_v25  ;;  %v1537_v7 = vmul.f32 0.5, %v1536_v13  ;;  %v1576_v58 = vmul.f32 %v4525_v31, %v1575_v56  ;;  %v4557_v54 = vpop.eup %2397  ;;  %v1615_v24 = vmul.f32 %v4544_v39, %v4484_v51 }
 0x18c   :  { %v1509_v23 = vmul.f32 %v4479_v59, %v1508_v10  ;;  %v1548_v9 = vsub.f32 1.5, %v1547_v52  ;;  %v1587_v38 = vmul.f32 0.5, %v1586_v53  ;;  %v1566_v42 = vmul.f32 %v4532_v50, %v1565_v41 }
 0x18d   :  { %v1559_v61 = vmul.f32 %v4486_v46, %v1558_v37  ;;  %v1538_v57 = vsub.f32 1.5, %v1537_v7  ;;  %v1577_v30 = vmul.f32 0.5, %v1576_v58  ;;  %vm1571_vm7 = vweird.f32 %v4532_v50 }
 0x18e   :  { %v1513_v29 = vsel %vm1512_vm13, %v4479_v59, %v1509_v23  ;;  %v1549_v32 = vmul.f32 %v4499_v48, %v1548_v9  ;;  %v1588_v43 = vsub.f32 1.5, %v1587_v38  ;;  %v1567_v26 = vmul.f32 0.5, %v1566_v42 }
 0x18f   :  { %v2028_v21 = vsel %vm620_vm8, %v1513_v29, 1.0  ;;  %v1563_v55 = vsel %vm1562_vm6, %v4486_v46, %v1559_v61  ;;  %v4570_v4 = vpop.xlane.xlu2 %476  ;;  %vm1552_vm8 = vmor %vm1550_vm10, %vm1551_vm14  ;;  %v1539_v36 = vmul.f32 %v4506_v8, %v1538_v57  ;;  %v1578_v60 = vsub.f32 1.5, %v1577_v30 }
 0x190   :  { %2157 = vst.msk [vmem:[%s5323_s1 + $0x2a0] sm:$0xff] %vm2072_vm0, %v2028_v21  ;;  %v2033_v11 = vsel %vm625_vm15, %v1563_v55, 1.0  ;;  %v4583_v12 = vpop.xlane.xlu1 %474  ;;  %v1553_v33 = vsel %vm1552_vm8, %v4499_v48, %v1549_v32  ;;  %v1589_v1 = vmul.f32 %v4518_v3, %v1588_v43  ;;  %v1616_v63 = vmul.f32 %v4544_v39, %v1615_v24 }
 0x191   :  { %2162 = vst.msk [vmem:[%s5323_s1 + $0x2c8] sm:$0xff] %vm2072_vm0, %v2033_v11  ;;  %v4597_v14 = vpop.xlane.xlu0 %472  ;;  %v2032_v2 = vsel %vm624_vm2, %v1553_v33, 1.0  ;;  %v1543_v19 = vsel %vm1542_vm12, %v4506_v8, %v1539_v36  ;;  %vm5347_vm15 = vweird.f32 %v4430_v47  ;;  %v1579_v20 = vmul.f32 %v4525_v31, %v1578_v60 }
 0x192   :  { %vm1592_vm9 = vmor %vm5347_vm15, %vm5346_vm1  ;;  %v1568_v59 = vsub.f32 1.5, %v1567_v26  ;;  %2161 = vst.msk [vmem:[%s5323_s1 + $0x2c0] sm:$0xff] %vm2072_vm0, %v2032_v2  ;;  %vm5348_vm10 = vcmp.gt.f32.partialorder %v4369_v0, 1.0  ;;  %vm5349_vm13 = vweird.f32 %v4436_v16  ;;  %v1617_v46 = vmul.f32 0.5, %v1616_v63 }
 0x193   :  { %v2031_v6 = vsel %vm5348_vm10, %v1543_v19, 1.0  ;;  %v1593_v27 = vsel %vm1592_vm9, %v4518_v3, %v1589_v1  ;;  %vm1582_vm14 = vmor %vm5349_vm13, %vm1581_vm3  ;;  %v1605_v18 = vmul.f32 %v4557_v54, %v4497_v5  ;;  %vm5350_vm4 = vcmp.gt.f32.partialorder %v4430_v47, 1.0 }
 0x194   :  { %2160 = vst.msk [vmem:[%s5323_s1 + $0x2b8] sm:$0xff] %vm2072_vm0, %v2031_v6  ;;  %v2036_v0 = vsel %vm5350_vm4, %v1593_v27, 1.0  ;;  %v1583_v35 = vsel %vm1582_vm14, %v4525_v31, %v1579_v20  ;;  %v1569_v15 = vmul.f32 %v4532_v50, %v1568_v59  ;;  %vm1620_vm2 = vweird.f32 %v4484_v51 }
 0x195   :  { %2165 = vst.msk [vmem:[%s5323_s1 + $0x2e0] sm:$0xff] %vm2072_vm0, %v2036_v0  ;;  %v2035_v48 = vsel %vm627_vm11, %v1583_v35, 1.0  ;;  %vm5351_vm5 = vweird.f32 %v4449_v17  ;;  %v1618_v47 = vsub.f32 1.5, %v1617_v46  ;;  %vm1621_vm3 = vweird.f32 %v4544_v39 }
 0x196   :  { %vm1572_vm6 = vmor %vm5351_vm5, %vm1571_vm7  ;;  %v1606_v22 = vmul.f32 %v4557_v54, %v1605_v18  ;;  %2164 = vst.msk [vmem:[%s5323_s1 + $0x2d8] sm:$0xff] %vm2072_vm0, %v2035_v48  ;;  %vm626_vm8 = vcmp.gt.f32.partialorder %v4449_v17, 1.0  ;;  %2399 = vrsqrt.f32 %v4516_v34  ;;  %vm631_vm11 = vcmp.gt.f32.partialorder %v4484_v51, 1.0 }
 0x197   :  { %v1573_v16 = vsel %vm1572_vm6, %v4532_v50, %v1569_v15  ;;  %v1619_v45 = vmul.f32 %v4544_v39, %v1618_v47  ;;  %2401 = vrsqrt.f32 %v4570_v4  ;;  %v4650_v3 = vpop.xlane.xlu2 %482  ;;  %vm1622_vm12 = vmor %vm1620_vm2, %vm1621_vm3  ;;  %vm1611_vm7 = vweird.f32 %v4557_v54 }
 0x198   :  { %v2034_v8 = vsel %vm626_vm8, %v1573_v16, 1.0  ;;  %v1607_v28 = vmul.f32 0.5, %v1606_v22  ;;  %2403 = vrsqrt.f32 %v4583_v12  ;;  %v4660_v17 = vpop.xlane.xlu1 %480  ;;  %vm1610_vm1 = vweird.f32 %v4497_v5 }
 0x199   :  { %2163 = vst.msk [vmem:[%s5323_s1 + $0x2d0] sm:$0xff] %vm2072_vm0, %v2034_v8  ;;  %v1623_v62 = vsel %vm1622_vm12, %v4544_v39, %v1619_v45  ;;  %2405 = vrsqrt.f32 %v4597_v14  ;;  %v4665_v31 = vpop.xlane.xlu0 %478  ;;  %vm1612_vm15 = vmor %vm1610_vm1, %vm1611_vm7  ;;  %vm630_vm9 = vcmp.gt.f32.partialorder %v4497_v5, 1.0  ;;  %vm1600_vm10 = vweird.f32 %v4516_v34 }
 0x19a   :  { %v1608_v44 = vsub.f32 1.5, %v1607_v28  ;;  %v2039_v25 = vsel %vm631_vm11, %v1623_v62, 1.0  ;;  %2407 = vrsqrt.f32 %v4650_v3  ;;  %vm1650_vm13 = vweird.f32 %v4570_v4 }
 0x19b   :  { %2168 = vst.msk [vmem:[%s5323_s1 + $0x2f8] sm:$0xff] %vm2072_vm0, %v2039_v25  ;;  %2409 = vrsqrt.f32 %v4660_v17  ;;  %vm629_vm14 = vcmp.gt.f32.partialorder %v4516_v34, 1.0  ;;  %vm1640_vm5 = vweird.f32 %v4583_v12  ;;  %vm634_vm3 = vcmp.gt.f32.partialorder %v4570_v4, 1.0 }
 0x19c   :  { %v1609_v51 = vmul.f32 %v4557_v54, %v1608_v44  ;;  %v4675_v40 = vpop.eup %2399  ;;  %2411 = vrsqrt.f32 %v4665_v31  ;;  %vm1630_vm11 = vweird.f32 %v4597_v14  ;;  %vm633_vm7 = vcmp.gt.f32.partialorder %v4583_v12, 1.0 }
 0x19d   :  { %v4678_v49 = vpop.eup %2401  ;;  %v1595_v10 = vmul.f32 %v4675_v40, %v4516_v34  ;;  %vm1601_vm4 = vweird.f32 %v4675_v40 }
 0x19e   :  { %v1613_v50 = vsel %vm1612_vm15, %v4557_v54, %v1609_v51  ;;  %v4684_v13 = vpop.eup %2403  ;;  %v1645_v37 = vmul.f32 %v4678_v49, %v4570_v4  ;;  %vm1651_vm2 = vweird.f32 %v4678_v49  ;;  %vm1602_vm6 = vmor %vm1600_vm10, %vm1601_vm4 }
 0x19f   :  { %v2038_v56 = vsel %vm630_vm9, %v1613_v50, 1.0  ;;  %v4690_v52 = vpop.eup %2405  ;;  %v1596_v5 = vmul.f32 %v4675_v40, %v1595_v10  ;;  %v1635_v53 = vmul.f32 %v4684_v13, %v4583_v12  ;;  %v4704_v41 = vpop.xlane.xlu2 %488  ;;  %vm1641_vm8 = vweird.f32 %v4684_v13  ;;  %vm1652_vm15 = vmor %vm1650_vm13, %vm1651_vm2 }
 0x1a0   :  { %2167 = vst.msk [vmem:[%s5323_s1 + $0x2f0] sm:$0xff] %vm2072_vm0, %v2038_v56  ;;  %v4706_v39 = vpop.eup %2407  ;;  %v1646_v23 = vmul.f32 %v4678_v49, %v1645_v37  ;;  %v1625_v7 = vmul.f32 %v4690_v52, %v4597_v14  ;;  %vm1631_vm12 = vweird.f32 %v4690_v52  ;;  %v4715_v58 = vpop.xlane.xlu1 %486  ;;  %2413 = vrsqrt.f32 %v4704_v41  ;;  %vm1642_vm10 = vmor %vm1640_vm5, %vm1641_vm8 }
 0x1a1   :  { %v4717_v61 = vpop.eup %2409  ;;  %v1597_v9 = vmul.f32 0.5, %v1596_v5  ;;  %v1636_v38 = vmul.f32 %v4684_v13, %v1635_v53  ;;  %v1675_v42 = vmul.f32 %v4706_v39, %v4650_v3  ;;  %vm1681_vm1 = vweird.f32 %v4706_v39  ;;  %v4724_v54 = vpop.xlane.xlu0 %484  ;;  %vm1632_vm13 = vmor %vm1630_vm11, %vm1631_vm12 }
 0x1a2   :  { %v4726_v29 = vpop.eup %2411  ;;  %v1647_v57 = vmul.f32 0.5, %v1646_v23  ;;  %v1626_v30 = vmul.f32 %v4690_v52, %v1625_v7  ;;  %v1665_v24 = vmul.f32 %v4717_v61, %v4660_v17  ;;  %vm1671_vm9 = vweird.f32 %v4717_v61 }
 0x1a3   :  { %v1598_v21 = vsub.f32 1.5, %v1597_v9  ;;  %v1637_v55 = vmul.f32 0.5, %v1636_v38  ;;  %v1676_v32 = vmul.f32 %v4706_v39, %v1675_v42  ;;  %v1655_v43 = vmul.f32 %v4726_v29, %v4665_v31 }
 0x1a4   :  { %v1648_v11 = vsub.f32 1.5, %v1647_v57  ;;  %v1627_v36 = vmul.f32 0.5, %v1626_v30  ;;  %v1666_v60 = vmul.f32 %v4717_v61, %v1665_v24  ;;  %vm1670_vm2 = vweird.f32 %v4660_v17 }
 0x1a5   :  { %v1599_v26 = vmul.f32 %v4675_v40, %v1598_v21  ;;  %v1638_v33 = vsub.f32 1.5, %v1637_v55  ;;  %v1677_v1 = vmul.f32 0.5, %v1676_v32  ;;  %v1656_v63 = vmul.f32 %v4726_v29, %v1655_v43 }
 0x1a6   :  { %v1649_v2 = vmul.f32 %v4678_v49, %v1648_v11  ;;  %v1628_v19 = vsub.f32 1.5, %v1627_v36  ;;  %v1667_v20 = vmul.f32 0.5, %v1666_v60  ;;  %vm5353_vm5 = vcmp.gt.f32.partialorder %v4597_v14, 1.0  ;;  %v2414_v51 = vpop.eup %2413 }
 0x1a7   :  { %v1603_v59 = vsel %vm1602_vm6, %v4675_v40, %v1599_v26  ;;  %v1639_v6 = vmul.f32 %v4684_v13, %v1638_v33  ;;  %v1678_v27 = vsub.f32 1.5, %v1677_v1  ;;  %v1657_v46 = vmul.f32 0.5, %v1656_v63  ;;  %vm1672_vm6 = vmor %vm1670_vm2, %vm1671_vm9 }
 0x1a8   :  { %v2037_v18 = vsel %vm629_vm14, %v1603_v59, 1.0  ;;  %v1653_v0 = vsel %vm1652_vm15, %v4678_v49, %v1649_v2  ;;  %v1629_v35 = vmul.f32 %v4690_v52, %v1628_v19  ;;  %v1668_v15 = vsub.f32 1.5, %v1667_v20  ;;  %v4761_v48 = vpop.xlane.xlu2 %494 }
 0x1a9   :  { %2166 = vst.msk [vmem:[%s5323_s1 + $0x2e8] sm:$0xff] %vm2072_vm0, %v2037_v18  ;;  %v2042_v34 = vsel %vm634_vm3, %v1653_v0, 1.0  ;;  %v1643_v47 = vsel %vm1642_vm10, %v4684_v13, %v1639_v6  ;;  %v1679_v22 = vmul.f32 %v4706_v39, %v1678_v27  ;;  %v1658_v16 = vsub.f32 1.5, %v1657_v46 }
 0x1aa   :  { %2171 = vst.msk [vmem:[%s5323_s1 + $0x310] sm:$0xff] %vm2072_vm0, %v2042_v34  ;;  %v2041_v8 = vsel %vm633_vm7, %v1643_v47, 1.0  ;;  %v1633_v4 = vsel %vm1632_vm13, %v4690_v52, %v1629_v35  ;;  %vm5352_vm14 = vweird.f32 %v4650_v3  ;;  %v1669_v45 = vmul.f32 %v4717_v61, %v1668_v15  ;;  %v4788_v28 = vpop.xlane.xlu1 %492 }
 0x1ab   :  { %vm1682_vm4 = vmor %vm5352_vm14, %vm1681_vm1  ;;  %2170 = vst.msk [vmem:[%s5323_s1 + $0x308] sm:$0xff] %vm2072_vm0, %v2041_v8  ;;  %v2040_v12 = vsel %vm5353_vm5, %v1633_v4, 1.0  ;;  %v1659_v44 = vmul.f32 %v4726_v29, %v1658_v16  ;;  %vm1660_vm3 = vweird.f32 %v4665_v31  ;;  %v4801_v25 = vpop.xlane.xlu0 %490  ;;  %vm5354_vm8 = vcmp.gt.f32.partialorder %v4650_v3, 1.0 }
 0x1ac   :  { %v1683_v62 = vsel %vm1682_vm4, %v4706_v39, %v1679_v22  ;;  %2169 = vst.msk [vmem:[%s5323_s1 + $0x300] sm:$0xff] %vm2072_vm0, %v2040_v12  ;;  %vm636_vm11 = vcmp.gt.f32.partialorder %v4660_v17, 1.0  ;;  %v1673_v40 = vsel %vm1672_vm6, %v4717_v61, %v1669_v45  ;;  %vm5355_vm12 = vweird.f32 %v4726_v29 }
 0x1ad   :  { %v2045_v14 = vsel %vm5354_vm8, %v1683_v62, 1.0  ;;  %vm1662_vm7 = vmor %vm1660_vm3, %vm5355_vm12  ;;  %2415 = vrsqrt.f32 %v4715_v58  ;;  %v2044_v49 = vsel %vm636_vm11, %v1673_v40, 1.0  ;;  %vm635_vm1 = vcmp.gt.f32.partialorder %v4665_v31, 1.0 }
 0x1ae   :  { %2174 = vst.msk [vmem:[%s5323_s1 + $0x328] sm:$0xff] %vm2072_vm0, %v2045_v14  ;;  %v1663_v3 = vsel %vm1662_vm7, %v4726_v29, %v1659_v44  ;;  %v1705_v50 = vmul.f32 %v2414_v51, %v4704_v41  ;;  %2417 = vrsqrt.f32 %v4724_v54  ;;  %vm1710_vm15 = vweird.f32 %v4704_v41 }
 0x1af   :  { %2173 = vst.msk [vmem:[%s5323_s1 + $0x320] sm:$0xff] %vm2072_vm0, %v2044_v49  ;;  %v2043_v17 = vsel %vm635_vm1, %v1663_v3, 1.0  ;;  %2419 = vrsqrt.f32 %v4761_v48  ;;  %vm1711_vm9 = vweird.f32 %v2414_v51  ;;  %vm640_vm10 = vcmp.gt.f32.partialorder %v4704_v41, 1.0 }
 0x1b0   :  { %2172 = vst.msk [vmem:[%s5323_s1 + $0x318] sm:$0xff] %vm2072_vm0, %v2043_v17  ;;  %v1706_v10 = vmul.f32 %v2414_v51, %v1705_v50  ;;  %2421 = vrsqrt.f32 %v4788_v28  ;;  %v4832_v31 = vpop.xlane.xlu2 %500  ;;  %vm1700_vm13 = vweird.f32 %v4715_v58  ;;  %vm1740_vm14 = vweird.f32 %v4761_v48  ;;  %vm1712_vm6 = vmor %vm1710_vm15, %vm1711_vm9 }
 0x1b1   :  { %2423 = vrsqrt.f32 %v4801_v25  ;;  %vm639_vm4 = vcmp.gt.f32.partialorder %v4715_v58, 1.0  ;;  %vm1690_vm5 = vweird.f32 %v4724_v54  ;;  %vm638_vm11 = vcmp.gt.f32.partialorder %v4724_v54, 1.0 }
 0x1b2   :  { %v1707_v13 = vmul.f32 0.5, %v1706_v10  ;;  %2425 = vrsqrt.f32 %v4832_v31  ;;  %v4838_v37 = vpop.xlane.xlu1 %498  ;;  %vm1730_vm12 = vweird.f32 %v4788_v28  ;;  %vm643_vm7 = vcmp.gt.f32.partialorder %v4761_v48, 1.0 }
 0x1b3   :  { %v4835_v56 = vpop.eup %2415  ;;  %v4843_v53 = vpop.xlane.xlu0 %496  ;;  %2427 = vrsqrt.f32 %v4838_v37 }
 0x1b4   :  { %v1708_v52 = vsub.f32 1.5, %v1707_v13  ;;  %v1695_v5 = vmul.f32 %v4835_v56, %v4715_v58  ;;  %v4845_v39 = vpop.eup %2417  ;;  %vm1701_vm2 = vweird.f32 %v4835_v56  ;;  %2429 = vrsqrt.f32 %v4843_v53 }
 0x1b5   :  { %v4851_v23 = vpop.eup %2419  ;;  %v1685_v9 = vmul.f32 %v4845_v39, %v4724_v54  ;;  %vm1691_vm3 = vweird.f32 %v4845_v39  ;;  %vm1702_vm9 = vmor %vm1700_vm13, %vm1701_vm2 }
 0x1b6   :  { %v1709_v7 = vmul.f32 %v2414_v51, %v1708_v52  ;;  %v1696_v61 = vmul.f32 %v4835_v56, %v1695_v5  ;;  %v4859_v38 = vpop.eup %2421  ;;  %v1735_v42 = vmul.f32 %v4851_v23, %v4761_v48  ;;  %vm1741_vm8 = vweird.f32 %v4851_v23  ;;  %vm1692_vm13 = vmor %vm1690_vm5, %vm1691_vm3 }
 0x1b7   :  { %v4869_v29 = vpop.eup %2423  ;;  %v1686_v24 = vmul.f32 %v4845_v39, %v1685_v9  ;;  %v1725_v21 = vmul.f32 %v4859_v38, %v4788_v28  ;;  %vm1731_vm1 = vweird.f32 %v4859_v38  ;;  %vm646_vm3 = vcmp.gt.f32.partialorder %v4832_v31, 1.0 }
 0x1b8   :  { %v1713_v57 = vsel %vm1712_vm6, %v2414_v51, %v1709_v7  ;;  %v1697_v30 = vmul.f32 0.5, %v1696_v61  ;;  %v4876_v55 = vpop.eup %2425  ;;  %v1736_v43 = vmul.f32 %v4851_v23, %v1735_v42  ;;  %v1715_v11 = vmul.f32 %v4869_v29, %v4801_v25  ;;  %v4894_v26 = vpop.xlane.xlu2 %506  ;;  %vm1732_vm2 = vmor %vm1730_vm12, %vm1731_vm1 }
 0x1b9   :  { %v2048_v32 = vsel %vm640_vm10, %v1713_v57, 1.0  ;;  %v1687_v36 = vmul.f32 0.5, %v1686_v24  ;;  %vm642_vm10 = vcmp.gt.f32.partialorder %v4788_v28, 1.0  ;;  %v1726_v60 = vmul.f32 %v4859_v38, %v1725_v21  ;;  %v4896_v33 = vpop.eup %2427 }
 0x1ba   :  { %2177 = vst.msk [vmem:[%s5323_s1 + $0x340] sm:$0xff] %vm2072_vm0, %v2048_v32  ;;  %v1698_v41 = vsub.f32 1.5, %v1697_v30  ;;  %vm1721_vm6 = vweird.f32 %v4869_v29  ;;  %v1737_v1 = vmul.f32 0.5, %v1736_v43  ;;  %v1716_v63 = vmul.f32 %v4869_v29, %v1715_v11  ;;  %v4903_v19 = vpop.xlane.xlu1 %504  ;;  %v4910_v18 = vpop.eup %2429 }
 0x1bb   :  { %v1765_v2 = vmul.f32 %v4876_v55, %v4832_v31  ;;  %v1688_v59 = vsub.f32 1.5, %v1687_v36  ;;  %v1727_v6 = vmul.f32 0.5, %v1726_v60  ;;  %v1755_v27 = vmul.f32 %v4896_v33, %v4838_v37  ;;  %v4908_v46 = vpop.xlane.xlu0 %502 }
 0x1bc   :  { %v1699_v20 = vmul.f32 %v4835_v56, %v1698_v41  ;;  %v1738_v0 = vsub.f32 1.5, %v1737_v1  ;;  %v1717_v35 = vmul.f32 0.5, %v1716_v63  ;;  %vm1761_vm15 = vweird.f32 %v4896_v33 }
 0x1bd   :  { %v1766_v15 = vmul.f32 %v4876_v55, %v1765_v2  ;;  %v1689_v47 = vmul.f32 %v4845_v39, %v1688_v59  ;;  %v1728_v22 = vsub.f32 1.5, %v1727_v6  ;;  %v1756_v16 = vmul.f32 %v4896_v33, %v1755_v27 }
 0x1be   :  { %v1703_v34 = vsel %vm1702_vm9, %v4835_v56, %v1699_v20  ;;  %v1739_v4 = vmul.f32 %v4851_v23, %v1738_v0  ;;  %v1718_v45 = vsub.f32 1.5, %v1717_v35  ;;  %v1745_v51 = vmul.f32 %v4910_v18, %v4843_v53 }
 0x1bf   :  { %v2047_v8 = vsel %vm639_vm4, %v1703_v34, 1.0  ;;  %v1767_v12 = vmul.f32 0.5, %v1766_v15  ;;  %v1693_v62 = vsel %vm1692_vm13, %v4845_v39, %v1689_v47  ;;  %vm1742_vm4 = vmor %vm1740_vm14, %vm1741_vm8  ;;  %v1729_v58 = vmul.f32 %v4859_v38, %v1728_v22 }
 0x1c0   :  { %2176 = vst.msk [vmem:[%s5323_s1 + $0x338] sm:$0xff] %vm2072_vm0, %v2047_v8  ;;  %v1757_v44 = vmul.f32 0.5, %v1756_v16  ;;  %v2046_v14 = vsel %vm638_vm11, %v1693_v62, 1.0  ;;  %v1743_v40 = vsel %vm1742_vm4, %v4851_v23, %v1739_v4  ;;  %v1719_v49 = vmul.f32 %v4869_v29, %v1718_v45 }
 0x1c1   :  { %v1768_v3 = vsub.f32 1.5, %v1767_v12  ;;  %2175 = vst.msk [vmem:[%s5323_s1 + $0x330] sm:$0xff] %vm2072_vm0, %v2046_v14  ;;  %v2051_v50 = vsel %vm643_vm7, %v1743_v40, 1.0  ;;  %v1733_v54 = vsel %vm1732_vm2, %v4859_v38, %v1729_v58  ;;  %vm5356_vm14 = vweird.f32 %v4801_v25 }
 0x1c2   :  { %vm1722_vm5 = vmor %vm5356_vm14, %vm1721_vm6  ;;  %v1758_v17 = vsub.f32 1.5, %v1757_v44  ;;  %v1746_v10 = vmul.f32 %v4910_v18, %v1745_v51  ;;  %2180 = vst.msk [vmem:[%s5323_s1 + $0x358] sm:$0xff] %vm2072_vm0, %v2051_v50  ;;  %v2050_v13 = vsel %vm642_vm10, %v1733_v54, 1.0  ;;  %vm5357_vm8 = vcmp.gt.f32.partialorder %v4801_v25, 1.0 }
 0x1c3   :  { %v1723_v48 = vsel %vm1722_vm5, %v4869_v29, %v1719_v49  ;;  %v1769_v56 = vmul.f32 %v4876_v55, %v1768_v3  ;;  %2179 = vst.msk [vmem:[%s5323_s1 + $0x350] sm:$0xff] %vm2072_vm0, %v2050_v13  ;;  %vm5358_vm11 = vweird.f32 %v4876_v55  ;;  %vm5359_vm12 = vweird.f32 %v4832_v31  ;;  %v4981_v39 = vpop.xlane.xlu2 %512 }
 0x1c4   :  { %v2049_v52 = vsel %vm5357_vm8, %v1723_v48, 1.0  ;;  %vm1772_vm7 = vmor %vm5359_vm12, %vm5358_vm11  ;;  %v1759_v28 = vmul.f32 %v4896_v33, %v1758_v17  ;;  %vm1760_vm1 = vweird.f32 %v4838_v37  ;;  %v1747_v5 = vmul.f32 0.5, %v1746_v10  ;;  %v4993_v23 = vpop.xlane.xlu1 %510  ;;  %v4999_v38 = vpop.xlane.xlu0 %508 }
 0x1c5   :  { %2178 = vst.msk [vmem:[%s5323_s1 + $0x348] sm:$0xff] %vm2072_vm0, %v2049_v52  ;;  %v1773_v25 = vsel %vm1772_vm7, %v4876_v55, %v1769_v56  ;;  %vm645_vm9 = vcmp.gt.f32.partialorder %v4838_v37, 1.0  ;;  %vm1762_vm10 = vmor %vm1760_vm1, %vm1761_vm15  ;;  %vm1751_vm6 = vweird.f32 %v4910_v18  ;;  %2431 = vrsqrt.f32 %v4894_v26 }
 0x1c6   :  { %v2054_v7 = vsel %vm646_vm3, %v1773_v25, 1.0  ;;  %v1763_v61 = vsel %vm1762_vm10, %v4896_v33, %v1759_v28  ;;  %v1748_v9 = vsub.f32 1.5, %v1747_v5  ;;  %2433 = vrsqrt.f32 %v4903_v19 }
 0x1c7   :  { %2183 = vst.msk [vmem:[%s5323_s1 + $0x370] sm:$0xff] %vm2072_vm0, %v2054_v7  ;;  %v2053_v37 = vsel %vm645_vm9, %v1763_v61, 1.0  ;;  %2435 = vrsqrt.f32 %v4908_v46  ;;  %vm1750_vm15 = vweird.f32 %v4843_v53  ;;  %vm644_vm4 = vcmp.gt.f32.partialorder %v4843_v53, 1.0 }
 0x1c8   :  { %2182 = vst.msk [vmem:[%s5323_s1 + $0x368] sm:$0xff] %vm2072_vm0, %v2053_v37  ;;  %v1749_v31 = vmul.f32 %v4910_v18, %v1748_v9  ;;  %2437 = vrsqrt.f32 %v4981_v39  ;;  %vm1752_vm13 = vmor %vm1750_vm15, %vm1751_vm6  ;;  %vm1800_vm2 = vweird.f32 %v4894_v26  ;;  %vm1790_vm14 = vweird.f32 %v4903_v19 }
 0x1c9   :  { %2439 = vrsqrt.f32 %v4993_v23  ;;  %vm649_vm5 = vcmp.gt.f32.partialorder %v4894_v26, 1.0  ;;  %vm1780_vm3 = vweird.f32 %v4908_v46  ;;  %vm1830_vm8 = vweird.f32 %v4981_v39 }
 0x1ca   :  { %v1753_v42 = vsel %vm1752_vm13, %v4910_v18, %v1749_v31  ;;  %2441 = vrsqrt.f32 %v4999_v38  ;;  %vm648_vm12 = vcmp.gt.f32.partialorder %v4903_v19, 1.0  ;;  %vm647_vm1 = vcmp.gt.f32.partialorder %v4908_v46, 1.0 }
 0x1cb   :  { %v5019_v29 = vpop.eup %2431  ;;  %v2052_v57 = vsel %vm644_vm4, %v1753_v42, 1.0  ;;  %v5029_v21 = vpop.xlane.xlu2 %518 }
 0x1cc   :  { %v5021_v30 = vpop.eup %2433  ;;  %2181 = vst.msk [vmem:[%s5323_s1 + $0x360] sm:$0xff] %vm2072_vm0, %v2052_v57  ;;  %v1795_v24 = vmul.f32 %v5019_v29, %v4894_v26  ;;  %2443 = vrsqrt.f32 %v5029_v21  ;;  %vm1801_vm11 = vweird.f32 %v5019_v29  ;;  %v5054_v33 = vpop.xlane.xlu1 %516 }
 0x1cd   :  { %v5031_v53 = vpop.eup %2435  ;;  %v1785_v55 = vmul.f32 %v5021_v30, %v4903_v19  ;;  %vm1791_vm7 = vweird.f32 %v5021_v30  ;;  %v5064_v59 = vpop.xlane.xlu0 %514  ;;  %2445 = vrsqrt.f32 %v5054_v33  ;;  %vm1802_vm10 = vmor %vm1800_vm2, %vm1801_vm11  ;;  %vm5362_vm11 = vweird.f32 %v4999_v38 }
 0x1ce   :  { %v5038_v32 = vpop.eup %2437  ;;  %v1796_v43 = vmul.f32 %v5019_v29, %v1795_v24  ;;  %v1775_v11 = vmul.f32 %v5031_v53, %v4908_v46  ;;  %vm1781_vm9 = vweird.f32 %v5031_v53  ;;  %vm1792_vm13 = vmor %vm1790_vm14, %vm1791_vm7  ;;  %2447 = vrsqrt.f32 %v5064_v59 }
 0x1cf   :  { %v5046_v41 = vpop.eup %2439  ;;  %v1786_v36 = vmul.f32 %v5021_v30, %v1785_v55  ;;  %v1825_v60 = vmul.f32 %v5038_v32, %v4981_v39  ;;  %vm1831_vm15 = vweird.f32 %v5038_v32  ;;  %vm1782_vm2 = vmor %vm1780_vm3, %vm1781_vm9  ;;  %vm650_vm9 = vcmp.gt.f32.partialorder %v4999_v38, 1.0 }
 0x1d0   :  { %v5056_v1 = vpop.eup %2441  ;;  %v1797_v63 = vmul.f32 0.5, %v1796_v43  ;;  %v1776_v2 = vmul.f32 %v5031_v53, %v1775_v11  ;;  %v1815_v20 = vmul.f32 %v5046_v41, %v4993_v23  ;;  %vm1821_vm6 = vweird.f32 %v5046_v41  ;;  %vm1832_vm14 = vmor %vm1830_vm8, %vm1831_vm15 }
 0x1d1   :  { %v1787_v6 = vmul.f32 0.5, %v1786_v36  ;;  %v1826_v27 = vmul.f32 %v5038_v32, %v1825_v60  ;;  %v1805_v18 = vmul.f32 %v5056_v1, %v4999_v38  ;;  %vm1811_vm4 = vweird.f32 %v5056_v1 }
 0x1d2   :  { %v1798_v0 = vsub.f32 1.5, %v1797_v63  ;;  %v1777_v35 = vmul.f32 0.5, %v1776_v2  ;;  %v1816_v15 = vmul.f32 %v5046_v41, %v1815_v20  ;;  %v5076_v34 = vpop.eup %2443  ;;  %vm5361_vm8 = vcmp.gt.f32.partialorder %v4981_v39, 1.0 }
 0x1d3   :  { %v1788_v47 = vsub.f32 1.5, %v1787_v6  ;;  %v1827_v22 = vmul.f32 0.5, %v1826_v27  ;;  %v1806_v16 = vmul.f32 %v5056_v1, %v1805_v18  ;;  %v1855_v12 = vmul.f32 %v5076_v34, %v5029_v21  ;;  %v2446_v10 = vpop.eup %2445 }
 0x1d4   :  { %v1799_v8 = vmul.f32 %v5019_v29, %v1798_v0  ;;  %v1778_v4 = vsub.f32 1.5, %v1777_v35  ;;  %v1817_v45 = vmul.f32 0.5, %v1816_v15  ;;  %v1845_v25 = vmul.f32 %v2446_v10, %v5054_v33 }
 0x1d5   :  { %v1789_v62 = vmul.f32 %v5021_v30, %v1788_v47  ;;  %v1828_v58 = vsub.f32 1.5, %v1827_v22  ;;  %v1807_v44 = vmul.f32 0.5, %v1806_v16  ;;  %v1856_v49 = vmul.f32 %v5076_v34, %v1855_v12 }
 0x1d6   :  { %v1803_v51 = vsel %vm1802_vm10, %v5019_v29, %v1799_v8  ;;  %v1779_v14 = vmul.f32 %v5031_v53, %v1778_v4  ;;  %v1818_v40 = vsub.f32 1.5, %v1817_v45  ;;  %vm1861_vm7 = vweird.f32 %v5076_v34 }
 0x1d7   :  { %v2057_v3 = vsel %vm649_vm5, %v1803_v51, 1.0  ;;  %v1793_v50 = vsel %vm1792_vm13, %v5021_v30, %v1789_v62  ;;  %v1829_v54 = vmul.f32 %v5038_v32, %v1828_v58  ;;  %v1808_v17 = vsub.f32 1.5, %v1807_v44  ;;  %v5116_v52 = vpop.xlane.xlu2 %524 }
 0x1d8   :  { %2186 = vst.msk [vmem:[%s5323_s1 + $0x388] sm:$0xff] %vm2072_vm0, %v2057_v3  ;;  %v2056_v26 = vsel %vm648_vm12, %v1793_v50, 1.0  ;;  %v1783_v13 = vsel %vm1782_vm2, %v5031_v53, %v1779_v14  ;;  %v1819_v48 = vmul.f32 %v5046_v41, %v1818_v40  ;;  %v1857_v56 = vmul.f32 0.5, %v1856_v49  ;;  %v5131_v7 = vpop.xlane.xlu1 %522  ;;  %vm1812_vm12 = vmor %vm5362_vm11, %vm1811_vm4 }
 0x1d9   :  { %2185 = vst.msk [vmem:[%s5323_s1 + $0x380] sm:$0xff] %vm2072_vm0, %v2056_v26  ;;  %v2055_v19 = vsel %vm647_vm1, %v1783_v13, 1.0  ;;  %v1833_v28 = vsel %vm1832_vm14, %v5038_v32, %v1829_v54  ;;  %vm5360_vm5 = vweird.f32 %v4993_v23  ;;  %v1809_v5 = vmul.f32 %v5056_v1, %v1808_v17  ;;  %v5145_v37 = vpop.xlane.xlu0 %520  ;;  %v5182_v32 = vpop.eup %2447 }
 0x1da   :  { %vm1822_vm3 = vmor %vm5360_vm5, %vm1821_vm6  ;;  %2184 = vst.msk [vmem:[%s5323_s1 + $0x378] sm:$0xff] %vm2072_vm0, %v2055_v19  ;;  %v2060_v46 = vsel %vm5361_vm8, %v1833_v28, 1.0  ;;  %v1858_v9 = vsub.f32 1.5, %v1857_v56  ;;  %vm5363_vm1 = vcmp.gt.f32.partialorder %v4993_v23, 1.0  ;;  %v1846_v42 = vmul.f32 %v2446_v10, %v1845_v25 }
 0x1db   :  { %v1823_v61 = vsel %vm1822_vm3, %v5046_v41, %v1819_v48  ;;  %2189 = vst.msk [vmem:[%s5323_s1 + $0x3a0] sm:$0xff] %vm2072_vm0, %v2060_v46  ;;  %v1813_v31 = vsel %vm1812_vm12, %v5056_v1, %v1809_v5  ;;  %vm5364_vm10 = vweird.f32 %v5029_v21  ;;  %2449 = vrsqrt.f32 %v5116_v52 }
 0x1dc   :  { %v2059_v39 = vsel %vm5363_vm1, %v1823_v61, 1.0  ;;  %v2058_v29 = vsel %vm650_vm9, %v1813_v31, 1.0  ;;  %v1859_v57 = vmul.f32 %v5076_v34, %v1858_v9  ;;  %vm1862_vm6 = vmor %vm5364_vm10, %vm1861_vm7  ;;  %v1847_v23 = vmul.f32 0.5, %v1846_v42 }
 0x1dd   :  { %2188 = vst.msk [vmem:[%s5323_s1 + $0x398] sm:$0xff] %vm2072_vm0, %v2059_v39  ;;  %vm655_vm15 = vcmp.gt.f32.partialorder %v5029_v21, 1.0  ;;  %2451 = vrsqrt.f32 %v5131_v7  ;;  %vm1851_vm13 = vweird.f32 %v2446_v10  ;;  %vm1850_vm4 = vweird.f32 %v5054_v33 }
 0x1de   :  { %2187 = vst.msk [vmem:[%s5323_s1 + $0x390] sm:$0xff] %vm2072_vm0, %v2058_v29  ;;  %v1863_v38 = vsel %vm1862_vm6, %v5076_v34, %v1859_v57  ;;  %v1848_v24 = vsub.f32 1.5, %v1847_v23  ;;  %2453 = vrsqrt.f32 %v5145_v37  ;;  %vm1852_vm2 = vmor %vm1850_vm4, %vm1851_vm13  ;;  %vm654_vm14 = vcmp.gt.f32.partialorder %v5054_v33, 1.0 }
 0x1df   :  { %v2063_v30 = vsel %vm655_vm15, %v1863_v38, 1.0  ;;  %v5176_v53 = vpop.xlane.xlu2 %530  ;;  %v1835_v36 = vmul.f32 %v5182_v32, %v5064_v59  ;;  %vm1840_vm5 = vweird.f32 %v5064_v59  ;;  %vm653_vm3 = vcmp.gt.f32.partialorder %v5064_v59, 1.0 }
 0x1e0   :  { %2192 = vst.msk [vmem:[%s5323_s1 + $0x3b8] sm:$0xff] %vm2072_vm0, %v2063_v30  ;;  %v1849_v55 = vmul.f32 %v2446_v10, %v1848_v24  ;;  %2455 = vrsqrt.f32 %v5176_v53  ;;  %v5180_v21 = vpop.xlane.xlu1 %528  ;;  %vm1890_vm8 = vweird.f32 %v5116_v52  ;;  %vm1880_vm11 = vweird.f32 %v5131_v7 }
 0x1e1   :  { %2457 = vrsqrt.f32 %v5180_v21  ;;  %v5185_v43 = vpop.xlane.xlu0 %526  ;;  %v5187_v11 = vpop.eup %2449  ;;  %v1836_v33 = vmul.f32 %v5182_v32, %v1835_v36  ;;  %vm658_vm12 = vcmp.gt.f32.partialorder %v5116_v52, 1.0  ;;  %vm1870_vm7 = vweird.f32 %v5145_v37 }
 0x1e2   :  { %v1853_v41 = vsel %vm1852_vm2, %v2446_v10, %v1849_v55  ;;  %v1885_v63 = vmul.f32 %v5187_v11, %v5116_v52  ;;  %2459 = vrsqrt.f32 %v5185_v43  ;;  %vm1841_vm9 = vweird.f32 %v5182_v32 }
 0x1e3   :  { %v5192_v60 = vpop.eup %2451  ;;  %v2062_v1 = vsel %vm654_vm14, %v1853_v41, 1.0  ;;  %v1837_v0 = vmul.f32 0.5, %v1836_v33  ;;  %vm1891_vm10 = vweird.f32 %v5187_v11  ;;  %vm657_vm6 = vcmp.gt.f32.partialorder %v5131_v7, 1.0  ;;  %vm1842_vm1 = vmor %vm1840_vm5, %vm1841_vm9 }
 0x1e4   :  { %v5198_v2 = vpop.eup %2453  ;;  %2191 = vst.msk [vmem:[%s5323_s1 + $0x3b0] sm:$0xff] %vm2072_vm0, %v2062_v1  ;;  %v1875_v20 = vmul.f32 %v5192_v60, %v5131_v7  ;;  %v1886_v6 = vmul.f32 %v5187_v11, %v1885_v63  ;;  %vm1881_vm15 = vweird.f32 %v5192_v60  ;;  %vm656_vm13 = vcmp.gt.f32.partialorder %v5145_v37, 1.0  ;;  %vm1892_vm14 = vmor %vm1890_vm8, %vm1891_vm10 }
 0x1e5   :  { %v1865_v27 = vmul.f32 %v5198_v2, %v5145_v37  ;;  %v1838_v16 = vsub.f32 1.5, %v1837_v0  ;;  %vm1871_vm4 = vweird.f32 %v5198_v2  ;;  %vm1882_vm5 = vmor %vm1880_vm11, %vm1881_vm15  ;;  %vm5366_vm11 = vweird.f32 %v5176_v53 }
 0x1e6   :  { %v5216_v18 = vpop.eup %2455  ;;  %v1876_v35 = vmul.f32 %v5192_v60, %v1875_v20  ;;  %v1887_v34 = vmul.f32 0.5, %v1886_v6  ;;  %vm660_vm9 = vcmp.gt.f32.partialorder %v5180_v21, 1.0  ;;  %vm5367_vm10 = vweird.f32 %v5180_v21 }
 0x1e7   :  { %v5222_v15 = vpop.eup %2457  ;;  %v1866_v47 = vmul.f32 %v5198_v2, %v1865_v27  ;;  %v1915_v22 = vmul.f32 %v5216_v18, %v5176_v53  ;;  %v1839_v44 = vmul.f32 %v5182_v32, %v1838_v16  ;;  %vm5365_vm8 = vweird.f32 %v5216_v18 }
 0x1e8   :  { %v1877_v8 = vmul.f32 0.5, %v1876_v35  ;;  %v1905_v4 = vmul.f32 %v5222_v15, %v5180_v21  ;;  %v2460_v45 = vpop.eup %2459  ;;  %v1888_v12 = vsub.f32 1.5, %v1887_v34  ;;  %vm1911_vm2 = vweird.f32 %v5222_v15  ;;  %v535_v13 = vpop.xlane.xlu1 %534 }
 0x1e9   :  { %v1867_v62 = vmul.f32 0.5, %v1866_v47  ;;  %v1916_v58 = vmul.f32 %v5216_v18, %v1915_v22  ;;  %v1895_v40 = vmul.f32 %v2460_v45, %v5185_v43  ;;  %v1843_v54 = vsel %vm1842_vm1, %v5182_v32, %v1839_v44  ;;  %v533_v61 = vpop.xlane.xlu0 %532 }
 0x1ea   :  { %v1878_v51 = vsub.f32 1.5, %v1877_v8  ;;  %v1906_v14 = vmul.f32 %v5222_v15, %v1905_v4  ;;  %v1889_v49 = vmul.f32 %v5187_v11, %v1888_v12  ;;  %v2061_v48 = vsel %vm653_vm3, %v1843_v54, 1.0  ;;  %vm1872_vm3 = vmor %vm1870_vm7, %vm1871_vm4 }
 0x1eb   :  { %v1868_v3 = vsub.f32 1.5, %v1867_v62  ;;  %v1917_v50 = vmul.f32 0.5, %v1916_v58  ;;  %v1896_v26 = vmul.f32 %v2460_v45, %v1895_v40  ;;  %2190 = vst.msk [vmem:[%s5323_s1 + $0x3a8] sm:$0xff] %vm2072_vm0, %v2061_v48  ;;  %2461 = vrsqrt.f32 %v535_v13 }
 0x1ec   :  { %v1879_v17 = vmul.f32 %v5192_v60, %v1878_v51  ;;  %v1907_v10 = vmul.f32 0.5, %v1906_v14  ;;  %v1893_v56 = vsel %vm1892_vm14, %v5187_v11, %v1889_v49  ;;  %vm1901_vm7 = vweird.f32 %v2460_v45 }
 0x1ed   :  { %v1869_v19 = vmul.f32 %v5198_v2, %v1868_v3  ;;  %v1918_v28 = vsub.f32 1.5, %v1917_v50  ;;  %v2066_v5 = vsel %vm658_vm12, %v1893_v56, 1.0  ;;  %v1897_v46 = vmul.f32 0.5, %v1896_v26  ;;  %vm1922_vm12 = vmor %vm5366_vm11, %vm5365_vm8 }
 0x1ee   :  { %v1883_v59 = vsel %vm1882_vm5, %v5192_v60, %v1879_v17  ;;  %v1908_v25 = vsub.f32 1.5, %v1907_v10  ;;  %2195 = vst.msk [vmem:[%s5323_s1 + $0x3d0] sm:$0xff] %vm2072_vm0, %v2066_v5  ;;  %vm661_vm1 = vcmp.gt.f32.partialorder %v5176_v53, 1.0  ;;  %2463 = vrsqrt.f32 %v533_v61 }
 0x1ef   :  { %v2065_v9 = vsel %vm657_vm6, %v1883_v59, 1.0  ;;  %v1873_v52 = vsel %vm1872_vm3, %v5198_v2, %v1869_v19  ;;  %v1919_v39 = vmul.f32 %v5216_v18, %v1918_v28  ;;  %v1898_v42 = vsub.f32 1.5, %v1897_v46  ;;  %vm1912_vm6 = vmor %vm5367_vm10, %vm1911_vm2 }
 0x1f0   :  { %2194 = vst.msk [vmem:[%s5323_s1 + $0x3c8] sm:$0xff] %vm2072_vm0, %v2065_v9  ;;  %v2064_v31 = vsel %vm656_vm13, %v1873_v52, 1.0  ;;  %v1909_v7 = vmul.f32 %v5222_v15, %v1908_v25  ;;  %vm1900_vm15 = vweird.f32 %v5185_v43  ;;  %vm659_vm4 = vcmp.gt.f32.partialorder %v5185_v43, 1.0 }
 0x1f1   :  { %2193 = vst.msk [vmem:[%s5323_s1 + $0x3c0] sm:$0xff] %vm2072_vm0, %v2064_v31  ;;  %v1923_v29 = vsel %vm1922_vm12, %v5216_v18, %v1919_v39  ;;  %v1899_v23 = vmul.f32 %v2460_v45, %v1898_v42  ;;  %vm1902_vm13 = vmor %vm1900_vm15, %vm1901_vm7  ;;  %v2462_v24 = vpop.eup %2461  ;;  %vm1940_vm14 = vweird.f32 %v535_v13  ;;  %vm663_vm8 = vcmp.gt.f32.partialorder %v535_v13, 1.0 }
 0x1f2   :  { %v2069_v37 = vsel %vm661_vm1, %v1923_v29, 1.0  ;;  %v1913_v57 = vsel %vm1912_vm6, %v5222_v15, %v1909_v7  ;;  %v1935_v55 = vmul.f32 %v2462_v24, %v535_v13  ;;  %vm1941_vm2 = vweird.f32 %v2462_v24 }
 0x1f3   :  { %2198 = vst.msk [vmem:[%s5323_s1 + $0x3e8] sm:$0xff] %vm2072_vm0, %v2069_v37  ;;  %v2068_v38 = vsel %vm660_vm9, %v1913_v57, 1.0  ;;  %v1903_v30 = vsel %vm1902_vm13, %v2460_v45, %v1899_v23  ;;  %vm1942_vm3 = vmor %vm1940_vm14, %vm1941_vm2  ;;  %vm1930_vm11 = vweird.f32 %v533_v61  ;;  %vm662_vm7 = vcmp.gt.f32.partialorder %v533_v61, 1.0 }
 0x1f4   :  { %2197 = vst.msk [vmem:[%s5323_s1 + $0x3e0] sm:$0xff] %vm2072_vm0, %v2068_v38  ;;  %v2067_v53 = vsel %vm659_vm4, %v1903_v30, 1.0  ;;  %v2464_v21 = vpop.eup %2463  ;;  %v1936_v32 = vmul.f32 %v2462_v24, %v1935_v55 }
 0x1f5   :  { %2196 = vst.msk [vmem:[%s5323_s1 + $0x3d8] sm:$0xff] %vm2072_vm0, %v2067_v53  ;;  %v1925_v11 = vmul.f32 %v2464_v21, %v533_v61  ;;  %vm1931_vm5 = vweird.f32 %v2464_v21 }
 0x1f6   :  { %v1937_v41 = vmul.f32 0.5, %v1936_v32  ;;  %vm1932_vm12 = vmor %vm1930_vm11, %vm1931_vm5 }
 0x1f7   :  { %v1926_v36 = vmul.f32 %v2464_v21, %v1925_v11 }
 0x1f8   :  { %v1938_v60 = vsub.f32 1.5, %v1937_v41 }
 0x1f9   :  { %v1927_v1 = vmul.f32 0.5, %v1926_v36 }
 0x1fa   :  { %v1939_v63 = vmul.f32 %v2462_v24, %v1938_v60 }
 0x1fb   :  { %v1928_v43 = vsub.f32 1.5, %v1927_v1 }
 0x1fc   :  { %v1943_v2 = vsel %vm1942_vm3, %v2462_v24, %v1939_v63 }
 0x1fd   :  { %v1929_v33 = vmul.f32 %v2464_v21, %v1928_v43  ;;  %v2071_v20 = vsel %vm663_vm8, %v1943_v2, 1.0 }
 0x1fe   :  { %2200 = vst.msk [vmem:[%s5323_s1 + $0x3f8] sm:$0xff] %vm2072_vm0, %v2071_v20 }
 0x1ff   :  { %v1933_v6 = vsel %vm1932_vm12, %v2464_v21, %v1929_v33 }
 0x200   :  { %v2070_v27 = vsel %vm662_vm7, %v1933_v6, 1.0 }
 0x201   :  { %2199 = vst.msk [vmem:[%s5323_s1 + $0x3f0] sm:$0xff] %vm2072_vm0, %v2070_v27 }
 0x202   :  { %2205 = vsyncpa [#allocation3], 1 }

</bundles_post_ra>
